<compile_context>
chip_gen: v7x
topology: tpu7x:2x2x1
jax: 0.10.0
libtpu: 0.0.40
codegen_flags: <defaults>
</compile_context>

<pallas_src>
import numpy as np

import jax
import jax.numpy as jnp
from jax.experimental import pallas as pl
from jax.experimental.pallas import tpu as pltpu


BN_EPS = 9.999999747378752e-06

# Conv chain after the stem conv.  name, (kh,kw), (sh,sw), (ph,pw), tanh2-after
_CHAIN = (
    ("1a", (3, 3), (1, 1), (1, 1), False),
    ("1b", (1, 3), (1, 2), (0, 1), False),
    ("1c", (3, 1), (2, 2), (0, 0), True),    # v5 = tanh(tanh(conv1c(v4)))
    ("1d", (3, 3), (1, 1), (1, 1), False),
    ("1e", (1, 3), (1, 2), (0, 1), False),
    ("1f", (3, 1), (2, 2), (0, 0), False),
)


# --------------------------------------------------------------------------
# Host-side (one-time) planning helpers
# --------------------------------------------------------------------------

def _shift_plan(h, w, kh, kw, ph, pw):
    """Stride-1 'same' conv: per-tap flat-row shift + 0/1 validity mask."""
    shifts, full = [], []
    mask = np.zeros((kh * kw, h * w, 1), np.float32)
    for di in range(kh):
        for dj in range(kw):
            t = di * kw + dj
            shifts.append((di - ph) * w + (dj - pw))
            for oh in range(h):
                ih = oh + di - ph
                if not 0 <= ih < h:
                    continue
                for ow in range(w):
                    iw = ow + dj - pw
                    if not 0 <= iw < w:
                        continue
                    mask[t, oh * w + ow, 0] = 1.0
            full.append(bool(mask[t].min() > 0.5))
    return shifts, full, mask


def _gather_plan(h, w, kh, kw, sh, sw, ph, pw):
    """Per-image 0/1 row-selection matrices (taps, Ho*Wo, H*W) for strided convs."""
    ho = (h + 2 * ph - kh) // sh + 1
    wo = (w + 2 * pw - kw) // sw + 1
    sel = np.zeros((kh * kw, ho * wo, h * w), np.float32)
    for di in range(kh):
        for dj in range(kw):
            t = di * kw + dj
            for oh in range(ho):
                ih = oh * sh + di - ph
                if not 0 <= ih < h:
                    continue
                for ow in range(wo):
                    iw = ow * sw + dj - pw
                    if not 0 <= iw < w:
                        continue
                    sel[t, oh * wo + ow, ih * w + iw] = 1.0
    return sel, ho, wo


def pack_params(params, h, w):
    """Pack torch-layout params into matmul-ready, kernel-order arrays (once)."""
    h0, w0 = (h - 3) // 2 + 1, (w - 3) // 2 + 1          # Conv2d_0a_1x1: 3x3 s2 p0

    def conv_weight(name, kh, kw):
        wt = params["w" + name]                           # (Cout, Cin, kh, kw)
        cout, cin = int(wt.shape[0]), int(wt.shape[1])
        wp = jnp.transpose(wt, (2, 3, 1, 0)).reshape(kh * kw * cin, cout)
        bp = params["b" + name].reshape(1, cout)
        return wp.astype(jnp.float32), bp.astype(jnp.float32)

    w0a, b0a = conv_weight("0a", 3, 3)
    conv_arrays = [w0a, b0a]
    meta = []
    ch, cw = h0, w0
    for name, (kh, kw), (sh, sw), (ph, pw), tanh2 in _CHAIN:
        wp, bp = conv_weight(name, kh, kw)
        if (sh, sw) == (1, 1) and (2 * ph, 2 * pw) == (kh - 1, kw - 1):
            # stride-1 'same' conv -> shift/slice gather, no selection matmuls
            shifts, full, mask = _shift_plan(ch, cw, kh, kw, ph, pw)
            conv_arrays += [jnp.asarray(mask), wp, bp]
            meta.append(dict(kind="shift", shifts=tuple(shifts), full=tuple(full),
                             pad=max(abs(s) for s in shifts),
                             taps=kh * kw, tanh2=tanh2))
            ho, wo = ch, cw
        else:
            sel, ho, wo = _gather_plan(ch, cw, kh, kw, sh, sw, ph, pw)
            conv_arrays += [jnp.asarray(sel), wp, bp]
            meta.append(dict(kind="gather", taps=kh * kw, tanh2=tanh2))
        ch, cw = ho, wo
    assert (ch, cw) == (1, 1), (ch, cw)                   # spatial collapses to 1x1

    head_arrays = (
        params["bn_g"].reshape(1, -1).astype(jnp.float32),
        params["bn_b"].reshape(1, -1).astype(jnp.float32),
        params["w0b"].reshape(params["w0b"].shape[0],
                              params["w0b"].shape[1]).T.astype(jnp.float32),   # (32, 256)
        params["b0b"].reshape(1, -1).astype(jnp.float32),
        params["lin_w"].T.astype(jnp.float32),                                  # (256, 10)
        params["lin_b"].reshape(1, -1).astype(jnp.float32),
    )
    return tuple(conv_arrays), head_arrays, tuple(meta), (h0, w0)


# --------------------------------------------------------------------------
# Kernel A: the conv chain, one grid step per image (parallel over batch)
# --------------------------------------------------------------------------

def _make_conv_chain_kernel(meta):
    def kernel(*refs):
        out_ref = refs[-1]
        it = iter(refs[:-1])
        xcol_ref = next(it)                               # (1, R0, 9) stem im2col block
        w0a_ref, b0a_ref = next(it), next(it)

        # Conv2d_0a_1x1: single (R0, 9) @ (9, 32) matmul.
        act = jnp.dot(xcol_ref[0], w0a_ref[...],
                      preferred_element_type=jnp.float32) + b0a_ref[...]

        for m in meta:
            aux_ref, w_ref, b_ref = next(it), next(it), next(it)
            r, c = act.shape
            if m["kind"] == "shift":
                # stride-1 'same' conv: zero-pad rows once, per-tap static slice + mask.
                p = m["pad"]
                zpad = jnp.zeros((p, c), jnp.float32)
                padded = jnp.concatenate([zpad, act, zpad], axis=0)   # (r + 2p, c)
                pieces = []
                for t, s in enumerate(m["shifts"]):
                    if s == 0 and m["full"][t]:
                        pieces.append(act)                 # center tap: no shift/mask
                        continue
                    piece = padded[s + p: s + p + r, :]    # gathered[o] = act[o + s] or 0
                    if not m["full"][t]:
                        piece = piece * aux_ref[t]         # (r, 1) 0/1 validity mask
                    pieces.append(piece)
            else:
                # strided conv: tiny per-image 0/1 selection matmuls (O(1) in batch).
                pieces = [jnp.dot(aux_ref[t], act, preferred_element_type=jnp.float32)
                          for t in range(m["taps"])]
            # Fused im2col block -> single K = taps*Cin matmul per conv.
            g = jnp.concatenate(pieces, axis=1)            # (R_out, taps*Cin)
            act = jnp.dot(g, w_ref[...],
                          preferred_element_type=jnp.float32) + b_ref[...]
            if m["tanh2"]:
                act = jnp.tanh(jnp.tanh(act))              # v5 = tanh(tanh(v4))

        out_ref[0] = act                                   # (1, 32): spatial is 1x1
    return kernel


# --------------------------------------------------------------------------
# Kernel B: BatchNorm (batch stats) + 1x1 conv + softmax + tanh + Linear
# --------------------------------------------------------------------------

def _head_kernel(feat_ref, bn_g_ref, bn_b_ref, w0b_ref, b0b_ref,
                 lw_ref, lb_ref, out_ref):
    feat = feat_ref[...]                                   # (N, 32)
    # BatchNorm2d, training-mode batch statistics (biased variance), H=W=1.
    mean = jnp.mean(feat, axis=0, keepdims=True)
    var = jnp.mean(jnp.square(feat - mean), axis=0, keepdims=True)
    xbn = (feat - mean) * jax.lax.rsqrt(var + BN_EPS) * bn_g_ref[...] + bn_b_ref[...]
    # Conv2d_0b_1x1 (32 -> 256) as a matmul.
    z = jnp.dot(xbn, w0b_ref[...], preferred_element_type=jnp.float32) + b0b_ref[...]
    # Softmax over the 256 features (Softmax() with dim=None -> dim=1).
    mx = jnp.max(z, axis=-1, keepdims=True)
    e = jnp.exp(z - mx)
    sm = e * pl.reciprocal(jnp.sum(e, axis=-1, keepdims=True), approx=True)
    y = jnp.tanh(sm)
    # Dropout(p=0.2): identity (inference semantics).
    out_ref[...] = (jnp.dot(y, lw_ref[...],
                            preferred_element_type=jnp.float32) + lb_ref[...])


# --------------------------------------------------------------------------
# Wrapper: XLA-side stem im2col (layout plumbing only) + two pallas_calls
# --------------------------------------------------------------------------

def _im2col_stem(x):
    """(N,1,H,W) -> (N, Ho*Wo, 9) patches for Conv2d_0a_1x1 (3x3, stride 2)."""
    n, _, h, w = x.shape
    ho, wo = (h - 3) // 2 + 1, (w - 3) // 2 + 1
    cols = []
    for di in range(3):
        for dj in range(3):
            patch = x[:, 0, di:di + 2 * (ho - 1) + 1:2, dj:dj + 2 * (wo - 1) + 1:2]
            cols.append(patch.reshape(n, ho * wo))
    return jnp.stack(cols, axis=-1).astype(jnp.float32)


def build_forward(meta, h0, w0):
    r0 = h0 * w0
    conv_kernel = _make_conv_chain_kernel(meta)

    def forward(x, conv_arrays, head_arrays):
        n = x.shape[0]
        xcol = _im2col_stem(x)                             # (N, R0, 9)

        in_specs = [pl.BlockSpec((1, r0, 9), lambda i: (i, 0, 0))]
        for arr in conv_arrays:                            # weights/masks/selectors:
            in_specs.append(                               # whole-array, fetched once
                pl.BlockSpec(arr.shape, lambda i, _nd=arr.ndim: (0,) * _nd))

        feat = pl.pallas_call(
            conv_kernel,
            out_shape=jax.ShapeDtypeStruct((n, 1, 32), jnp.float32),
            grid=(n,),
            in_specs=in_specs,
            out_specs=pl.BlockSpec((1, 1, 32), lambda i: (i, 0, 0)),
            compiler_params=pltpu.CompilerParams(
                dimension_semantics=("parallel",)),        # both TCs on v7x
        )(xcol, *conv_arrays)

        out = pl.pallas_call(
            _head_kernel,
            out_shape=jax.ShapeDtypeStruct((n, 10), jnp.float32),
            in_specs=[pl.BlockSpec(memory_space=pltpu.MemorySpace.VMEM)]
                     * (1 + len(head_arrays)),
            out_specs=pl.BlockSpec(memory_space=pltpu.MemorySpace.VMEM),
        )(feat.reshape(n, 32), *head_arrays)
        return out

    return forward


# --------------------------------------------------------------------------
# Deterministic torch-like initialization (uniform(-1/sqrt(fan_in), +...))
# --------------------------------------------------------------------------

def init_conv(key, cout, cin, kh, kw):
    kw_, kb_ = jax.random.split(key)
    bound = 1.0 / float(cin * kh * kw) ** 0.5
    w = jax.random.uniform(kw_, (cout, cin, kh, kw), jnp.float32, -bound, bound)
    b = jax.random.uniform(kb_, (cout,), jnp.float32, -bound, bound)
    return w, b


def init_linear(key, out_f, in_f):
    kw_, kb_ = jax.random.split(key)
    bound = 1.0 / float(in_f) ** 0.5
    w = jax.random.uniform(kw_, (out_f, in_f), jnp.float32, -bound, bound)
    b = jax.random.uniform(kb_, (out_f,), jnp.float32, -bound, bound)
    return w, b


def init_params(key):
    ks = jax.random.split(key, 10)
    p = {}
    p["w0a"], p["b0a"] = init_conv(ks[0], 32, 1, 3, 3)
    p["w1a"], p["b1a"] = init_conv(ks[1], 32, 32, 3, 3)
    p["w1b"], p["b1b"] = init_conv(ks[2], 32, 32, 1, 3)
    p["w1c"], p["b1c"] = init_conv(ks[3], 32, 32, 3, 1)
    p["w1d"], p["b1d"] = init_conv(ks[4], 32, 32, 3, 3)
    p["w1e"], p["b1e"] = init_conv(ks[5], 32, 32, 1, 3)
    p["w1f"], p["b1f"] = init_conv(ks[6], 32, 32, 3, 1)
    p["bn_g"] = jnp.ones((32,), jnp.float32)      # BatchNorm2d default weight
    p["bn_b"] = jnp.zeros((32,), jnp.float32)     # BatchNorm2d default bias
    p["w0b"], p["b0b"] = init_conv(ks[7], 256, 32, 1, 1)
    p["lin_w"], p["lin_b"] = init_linear(ks[8], 10, 256)
    return p


if __name__ == "__main__":
    key = jax.random.PRNGKey(0)
    pkey, xkey = jax.random.split(key)
    params = init_params(pkey)

    N, H, W = 2, 16, 16   # 16x16 spatial so every conv in the chain is valid
    conv_arrays, head_arrays, meta, (h0, w0) = pack_params(params, H, W)
    forward = jax.jit(build_forward(meta, h0, w0))

    x = jax.random.normal(xkey, (N, 1, H, W), jnp.float32)
    out = jax.block_until_ready(forward(x, conv_arrays, head_arrays))
    assert out.shape == (N, 10), out.shape
    assert bool(jnp.all(jnp.isfinite(out))), "non-finite output"
    print("KERNEL_OK")
</pallas_src>

<mosaic_0001>
module attributes {stable_mosaic.version = 11 : i64} {
  func.func @_head_kernel(%arg0: memref<2x32xf32, #tpu.memory_space<vmem>>, %arg1: memref<1x32xf32, #tpu.memory_space<vmem>>, %arg2: memref<1x32xf32, #tpu.memory_space<vmem>>, %arg3: memref<32x256xf32, #tpu.memory_space<vmem>>, %arg4: memref<1x256xf32, #tpu.memory_space<vmem>>, %arg5: memref<256x10xf32, #tpu.memory_space<vmem>>, %arg6: memref<1x10xf32, #tpu.memory_space<vmem>>, %arg7: memref<2x10xf32, #tpu.memory_space<vmem>>) attributes {dimension_semantics = [], scalar_prefetch = 0 : i64, scratch_operands = 0 : i64, tpu.core_type = #tpu.core_type<tc>} {
    %c0 = arith.constant 0 : index
    %c0_0 = arith.constant 0 : index
    %0 = vector.load %arg0[%c0, %c0_0] : memref<2x32xf32, #tpu.memory_space<vmem>>, vector<2x32xf32>
    %cst = arith.constant dense<0.000000e+00> : vector<32xf32>
    %1 = vector.multi_reduction <add>, %0, %cst [0] : vector<2x32xf32> to vector<32xf32>
    %2 = vector.shape_cast %1 : vector<32xf32> to vector<1x32xf32>
    %cst_1 = arith.constant 2.000000e+00 : f32
    %3 = vector.broadcast %cst_1 : f32 to vector<1x32xf32>
    %4 = arith.divf %2, %3 : vector<1x32xf32>
    %5 = vector.broadcast %4 : vector<1x32xf32> to vector<2x32xf32>
    %6 = arith.subf %0, %5 : vector<2x32xf32>
    %7 = arith.mulf %6, %6 : vector<2x32xf32>
    %cst_2 = arith.constant dense<0.000000e+00> : vector<32xf32>
    %8 = vector.multi_reduction <add>, %7, %cst_2 [0] : vector<2x32xf32> to vector<32xf32>
    %9 = vector.shape_cast %8 : vector<32xf32> to vector<1x32xf32>
    %cst_3 = arith.constant 2.000000e+00 : f32
    %10 = vector.broadcast %cst_3 : f32 to vector<1x32xf32>
    %11 = arith.divf %9, %10 : vector<1x32xf32>
    %12 = vector.broadcast %4 : vector<1x32xf32> to vector<2x32xf32>
    %13 = arith.subf %0, %12 : vector<2x32xf32>
    %cst_4 = arith.constant 9.99999974E-6 : f32
    %14 = vector.broadcast %cst_4 : f32 to vector<1x32xf32>
    %15 = arith.addf %11, %14 : vector<1x32xf32>
    %16 = math.rsqrt %15 : vector<1x32xf32>
    %17 = vector.broadcast %16 : vector<1x32xf32> to vector<2x32xf32>
    %18 = arith.mulf %13, %17 : vector<2x32xf32>
    %c0_5 = arith.constant 0 : index
    %c0_6 = arith.constant 0 : index
    %19 = vector.load %arg1[%c0_5, %c0_6] : memref<1x32xf32, #tpu.memory_space<vmem>>, vector<1x32xf32>
    %20 = vector.broadcast %19 : vector<1x32xf32> to vector<2x32xf32>
    %21 = arith.mulf %18, %20 : vector<2x32xf32>
    %c0_7 = arith.constant 0 : index
    %c0_8 = arith.constant 0 : index
    %22 = vector.load %arg2[%c0_7, %c0_8] : memref<1x32xf32, #tpu.memory_space<vmem>>, vector<1x32xf32>
    %23 = vector.broadcast %22 : vector<1x32xf32> to vector<2x32xf32>
    %24 = arith.addf %21, %23 : vector<2x32xf32>
    %c0_9 = arith.constant 0 : index
    %c0_10 = arith.constant 0 : index
    %25 = vector.load %arg3[%c0_9, %c0_10] : memref<32x256xf32, #tpu.memory_space<vmem>>, vector<32x256xf32>
    %cst_11 = arith.constant dense<0.000000e+00> : vector<2x256xf32>
    %26 = tpu.matmul %24, %25, %cst_11 {dimension_numbers = #tpu.dot_dimension_numbers<[1], [0], [0], [1], [0, 0, 1, 1], [], []>} : vector<2x32xf32>, vector<32x256xf32>, vector<2x256xf32> -> vector<2x256xf32>
    %c0_12 = arith.constant 0 : index
    %c0_13 = arith.constant 0 : index
    %27 = vector.load %arg4[%c0_12, %c0_13] : memref<1x256xf32, #tpu.memory_space<vmem>>, vector<1x256xf32>
    %28 = vector.broadcast %27 : vector<1x256xf32> to vector<2x256xf32>
    %29 = arith.addf %26, %28 : vector<2x256xf32>
    %cst_14 = arith.constant dense<0xFF800000> : vector<2xf32>
    %30 = vector.multi_reduction <maximumf>, %29, %cst_14 [1] : vector<2x256xf32> to vector<2xf32>
    %31 = vector.shape_cast %30 : vector<2xf32> to vector<2x1xf32>
    %32 = vector.broadcast %31 : vector<2x1xf32> to vector<2x256xf32>
    %33 = arith.subf %29, %32 : vector<2x256xf32>
    %34 = math.exp %33 : vector<2x256xf32>
    %cst_15 = arith.constant dense<0.000000e+00> : vector<2xf32>
    %35 = vector.multi_reduction <add>, %34, %cst_15 [1] : vector<2x256xf32> to vector<2xf32>
    %36 = vector.shape_cast %35 : vector<2xf32> to vector<2x1xf32>
    %37 = tpu.reciprocal %36 {approx = true} : vector<2x1xf32> -> vector<2x1xf32>
    %38 = vector.broadcast %37 : vector<2x1xf32> to vector<2x256xf32>
    %39 = arith.mulf %34, %38 : vector<2x256xf32>
    %40 = math.tanh %39 : vector<2x256xf32>
    %c0_16 = arith.constant 0 : index
    %c0_17 = arith.constant 0 : index
    %41 = vector.load %arg5[%c0_16, %c0_17] : memref<256x10xf32, #tpu.memory_space<vmem>>, vector<256x10xf32>
    %cst_18 = arith.constant dense<0.000000e+00> : vector<2x10xf32>
    %42 = tpu.matmul %40, %41, %cst_18 {dimension_numbers = #tpu.dot_dimension_numbers<[1], [0], [0], [1], [0, 0, 1, 1], [], []>} : vector<2x256xf32>, vector<256x10xf32>, vector<2x10xf32> -> vector<2x10xf32>
    %c0_19 = arith.constant 0 : index
    %c0_20 = arith.constant 0 : index
    %43 = vector.load %arg6[%c0_19, %c0_20] : memref<1x10xf32, #tpu.memory_space<vmem>>, vector<1x10xf32>
    %44 = vector.broadcast %43 : vector<1x10xf32> to vector<2x10xf32>
    %45 = arith.addf %42, %44 : vector<2x10xf32>
    %c0_21 = arith.constant 0 : index
    %c0_22 = arith.constant 0 : index
    %46 = vector.load %arg7[%c0_21, %c0_22] : memref<2x10xf32, #tpu.memory_space<vmem>>, vector<2x10xf32>
    tpu.vector_store %arg7[%c0_21, %c0_22], %45 {strides = array<i32>} : memref<2x10xf32, #tpu.memory_space<vmem>>, vector<2x10xf32>,
    return
  }
}

module attributes {stable_mosaic.version = 11 : i64} {
  func.func @kernel(%arg0: i32, %arg1: memref<1x49x9xf32, #tpu.memory_space<vmem>>, %arg2: memref<9x32xf32, #tpu.memory_space<vmem>>, %arg3: memref<1x32xf32, #tpu.memory_space<vmem>>, %arg4: memref<9x49x1xf32, #tpu.memory_space<vmem>>, %arg5: memref<288x32xf32, #tpu.memory_space<vmem>>, %arg6: memref<1x32xf32, #tpu.memory_space<vmem>>, %arg7: memref<3x28x49xf32, #tpu.memory_space<vmem>>, %arg8: memref<96x32xf32, #tpu.memory_space<vmem>>, %arg9: memref<1x32xf32, #tpu.memory_space<vmem>>, %arg10: memref<3x6x28xf32, #tpu.memory_space<vmem>>, %arg11: memref<96x32xf32, #tpu.memory_space<vmem>>, %arg12: memref<1x32xf32, #tpu.memory_space<vmem>>, %arg13: memref<9x6x1xf32, #tpu.memory_space<vmem>>, %arg14: memref<288x32xf32, #tpu.memory_space<vmem>>, %arg15: memref<1x32xf32, #tpu.memory_space<vmem>>, %arg16: memref<3x3x6xf32, #tpu.memory_space<vmem>>, %arg17: memref<96x32xf32, #tpu.memory_space<vmem>>, %arg18: memref<1x32xf32, #tpu.memory_space<vmem>>, %arg19: memref<3x1x3xf32, #tpu.memory_space<vmem>>, %arg20: memref<96x32xf32, #tpu.memory_space<vmem>>, %arg21: memref<1x32xf32, #tpu.memory_space<vmem>>, %arg22: memref<1x1x32xf32, #tpu.memory_space<vmem>>) attributes {dimension_semantics = [#tpu.dimension_semantics<parallel>], iteration_bounds = array<i64: 2>, scalar_prefetch = 0 : i64, scratch_operands = 0 : i64, tpu.core_type = #tpu.core_type<tc>, window_params = [{transform_indices = @transform_0, window_bounds = array<i64: 1, 49, 9>}, {pipeline_mode = #tpu.pipeline_mode<synchronous>, transform_indices = @transform_1, window_bounds = array<i64: 9, 32>}, {pipeline_mode = #tpu.pipeline_mode<synchronous>, transform_indices = @transform_2, window_bounds = array<i64: 1, 32>}, {pipeline_mode = #tpu.pipeline_mode<synchronous>, transform_indices = @transform_3, window_bounds = array<i64: 9, 49, 1>}, {pipeline_mode = #tpu.pipeline_mode<synchronous>, transform_indices = @transform_4, window_bounds = array<i64: 288, 32>}, {pipeline_mode = #tpu.pipeline_mode<synchronous>, transform_indices = @transform_5, window_bounds = array<i64: 1, 32>}, {pipeline_mode = #tpu.pipeline_mode<synchronous>, transform_indices = @transform_6, window_bounds = array<i64: 3, 28, 49>}, {pipeline_mode = #tpu.pipeline_mode<synchronous>, transform_indices = @transform_7, window_bounds = array<i64: 96, 32>}, {pipeline_mode = #tpu.pipeline_mode<synchronous>, transform_indices = @transform_8, window_bounds = array<i64: 1, 32>}, {pipeline_mode = #tpu.pipeline_mode<synchronous>, transform_indices = @transform_9, window_bounds = array<i64: 3, 6, 28>}, {pipeline_mode = #tpu.pipeline_mode<synchronous>, transform_indices = @transform_10, window_bounds = array<i64: 96, 32>}, {pipeline_mode = #tpu.pipeline_mode<synchronous>, transform_indices = @transform_11, window_bounds = array<i64: 1, 32>}, {pipeline_mode = #tpu.pipeline_mode<synchronous>, transform_indices = @transform_12, window_bounds = array<i64: 9, 6, 1>}, {pipeline_mode = #tpu.pipeline_mode<synchronous>, transform_indices = @transform_13, window_bounds = array<i64: 288, 32>}, {pipeline_mode = #tpu.pipeline_mode<synchronous>, transform_indices = @transform_14, window_bounds = array<i64: 1, 32>}, {pipeline_mode = #tpu.pipeline_mode<synchronous>, transform_indices = @transform_15, window_bounds = array<i64: 3, 3, 6>}, {pipeline_mode = #tpu.pipeline_mode<synchronous>, transform_indices = @transform_16, window_bounds = array<i64: 96, 32>}, {pipeline_mode = #tpu.pipeline_mode<synchronous>, transform_indices = @transform_17, window_bounds = array<i64: 1, 32>}, {pipeline_mode = #tpu.pipeline_mode<synchronous>, transform_indices = @transform_18, window_bounds = array<i64: 3, 1, 3>}, {pipeline_mode = #tpu.pipeline_mode<synchronous>, transform_indices = @transform_19, window_bounds = array<i64: 96, 32>}, {pipeline_mode = #tpu.pipeline_mode<synchronous>, transform_indices = @transform_20, window_bounds = array<i64: 1, 32>}, {transform_indices = @transform_21, window_bounds = array<i64: 1, 1, 32>}]} {
    %c0 = arith.constant 0 : index
    %c0_0 = arith.constant 0 : index
    %c0_1 = arith.constant 0 : index
    %0 = vector.load %arg1[%c0, %c0_0, %c0_1] : memref<1x49x9xf32, #tpu.memory_space<vmem>>, vector<1x49x9xf32>
    %1 = vector.shape_cast %0 : vector<1x49x9xf32> to vector<49x9xf32>
    %c0_2 = arith.constant 0 : index
    %c0_3 = arith.constant 0 : index
    %2 = vector.load %arg2[%c0_2, %c0_3] : memref<9x32xf32, #tpu.memory_space<vmem>>, vector<9x32xf32>
    %cst = arith.constant dense<0.000000e+00> : vector<49x32xf32>
    %3 = tpu.matmul %1, %2, %cst {dimension_numbers = #tpu.dot_dimension_numbers<[1], [0], [0], [1], [0, 0, 1, 1], [], []>} : vector<49x9xf32>, vector<9x32xf32>, vector<49x32xf32> -> vector<49x32xf32>
    %c0_4 = arith.constant 0 : index
    %c0_5 = arith.constant 0 : index
    %4 = vector.load %arg3[%c0_4, %c0_5] : memref<1x32xf32, #tpu.memory_space<vmem>>, vector<1x32xf32>
    %5 = vector.broadcast %4 : vector<1x32xf32> to vector<49x32xf32>
    %6 = arith.addf %3, %5 : vector<49x32xf32>
    %cst_6 = arith.constant 0.000000e+00 : f32
    %7 = vector.broadcast %cst_6 : f32 to vector<8x32xf32>
    %8 = tpu.concatenate %7, %6, %7 in 0 : vector<8x32xf32>, vector<49x32xf32>, vector<8x32xf32> -> vector<65x32xf32>
    %9 = vector.extract_strided_slice %8 {offsets = [0, 0], sizes = [49, 32], strides = [1, 1]} : vector<65x32xf32> to vector<49x32xf32>
    %c0_7 = arith.constant 0 : index
    %c0_8 = arith.constant 0 : index
    %c0_9 = arith.constant 0 : index
    %10 = vector.load %arg4[%c0_7, %c0_8, %c0_9] : memref<9x49x1xf32, #tpu.memory_space<vmem>>, vector<1x49x1xf32>
    %11 = vector.shape_cast %10 : vector<1x49x1xf32> to vector<49x1xf32>
    %12 = vector.broadcast %11 : vector<49x1xf32> to vector<49x32xf32>
    %13 = arith.mulf %9, %12 : vector<49x32xf32>
    %14 = vector.extract_strided_slice %8 {offsets = [1, 0], sizes = [49, 32], strides = [1, 1]} : vector<65x32xf32> to vector<49x32xf32>
    %c1 = arith.constant 1 : index
    %c0_10 = arith.constant 0 : index
    %c0_11 = arith.constant 0 : index
    %15 = vector.load %arg4[%c1, %c0_10, %c0_11] : memref<9x49x1xf32, #tpu.memory_space<vmem>>, vector<1x49x1xf32>
    %16 = vector.shape_cast %15 : vector<1x49x1xf32> to vector<49x1xf32>
    %17 = vector.broadcast %16 : vector<49x1xf32> to vector<49x32xf32>
    %18 = arith.mulf %14, %17 : vector<49x32xf32>
    %19 = vector.extract_strided_slice %8 {offsets = [2, 0], sizes = [49, 32], strides = [1, 1]} : vector<65x32xf32> to vector<49x32xf32>
    %c2 = arith.constant 2 : index
    %c0_12 = arith.constant 0 : index
    %c0_13 = arith.constant 0 : index
    %20 = vector.load %arg4[%c2, %c0_12, %c0_13] : memref<9x49x1xf32, #tpu.memory_space<vmem>>, vector<1x49x1xf32>
    %21 = vector.shape_cast %20 : vector<1x49x1xf32> to vector<49x1xf32>
    %22 = vector.broadcast %21 : vector<49x1xf32> to vector<49x32xf32>
    %23 = arith.mulf %19, %22 : vector<49x32xf32>
    %24 = vector.extract_strided_slice %8 {offsets = [7, 0], sizes = [49, 32], strides = [1, 1]} : vector<65x32xf32> to vector<49x32xf32>
    %c3 = arith.constant 3 : index
    %c0_14 = arith.constant 0 : index
    %c0_15 = arith.constant 0 : index
    %25 = vector.load %arg4[%c3, %c0_14, %c0_15] : memref<9x49x1xf32, #tpu.memory_space<vmem>>, vector<1x49x1xf32>
    %26 = vector.shape_cast %25 : vector<1x49x1xf32> to vector<49x1xf32>
    %27 = vector.broadcast %26 : vector<49x1xf32> to vector<49x32xf32>
    %28 = arith.mulf %24, %27 : vector<49x32xf32>
    %29 = vector.extract_strided_slice %8 {offsets = [9, 0], sizes = [49, 32], strides = [1, 1]} : vector<65x32xf32> to vector<49x32xf32>
    %c5 = arith.constant 5 : index
    %c0_16 = arith.constant 0 : index
    %c0_17 = arith.constant 0 : index
    %30 = vector.load %arg4[%c5, %c0_16, %c0_17] : memref<9x49x1xf32, #tpu.memory_space<vmem>>, vector<1x49x1xf32>
    %31 = vector.shape_cast %30 : vector<1x49x1xf32> to vector<49x1xf32>
    %32 = vector.broadcast %31 : vector<49x1xf32> to vector<49x32xf32>
    %33 = arith.mulf %29, %32 : vector<49x32xf32>
    %34 = vector.extract_strided_slice %8 {offsets = [14, 0], sizes = [49, 32], strides = [1, 1]} : vector<65x32xf32> to vector<49x32xf32>
    %c6 = arith.constant 6 : index
    %c0_18 = arith.constant 0 : index
    %c0_19 = arith.constant 0 : index
    %35 = vector.load %arg4[%c6, %c0_18, %c0_19] : memref<9x49x1xf32, #tpu.memory_space<vmem>>, vector<1x49x1xf32>
    %36 = vector.shape_cast %35 : vector<1x49x1xf32> to vector<49x1xf32>
    %37 = vector.broadcast %36 : vector<49x1xf32> to vector<49x32xf32>
    %38 = arith.mulf %34, %37 : vector<49x32xf32>
    %39 = vector.extract_strided_slice %8 {offsets = [15, 0], sizes = [49, 32], strides = [1, 1]} : vector<65x32xf32> to vector<49x32xf32>
    %c7 = arith.constant 7 : index
    %c0_20 = arith.constant 0 : index
    %c0_21 = arith.constant 0 : index
    %40 = vector.load %arg4[%c7, %c0_20, %c0_21] : memref<9x49x1xf32, #tpu.memory_space<vmem>>, vector<1x49x1xf32>
    %41 = vector.shape_cast %40 : vector<1x49x1xf32> to vector<49x1xf32>
    %42 = vector.broadcast %41 : vector<49x1xf32> to vector<49x32xf32>
    %43 = arith.mulf %39, %42 : vector<49x32xf32>
    %44 = vector.extract_strided_slice %8 {offsets = [16, 0], sizes = [49, 32], strides = [1, 1]} : vector<65x32xf32> to vector<49x32xf32>
    %c8 = arith.constant 8 : index
    %c0_22 = arith.constant 0 : index
    %c0_23 = arith.constant 0 : index
    %45 = vector.load %arg4[%c8, %c0_22, %c0_23] : memref<9x49x1xf32, #tpu.memory_space<vmem>>, vector<1x49x1xf32>
    %46 = vector.shape_cast %45 : vector<1x49x1xf32> to vector<49x1xf32>
    %47 = vector.broadcast %46 : vector<49x1xf32> to vector<49x32xf32>
    %48 = arith.mulf %44, %47 : vector<49x32xf32>
    %49 = tpu.concatenate %13, %18, %23, %28, %6, %33, %38, %43, %48 in 1 : vector<49x32xf32>, vector<49x32xf32>, vector<49x32xf32>, vector<49x32xf32>, vector<49x32xf32>, vector<49x32xf32>, vector<49x32xf32>, vector<49x32xf32>, vector<49x32xf32> -> vector<49x288xf32>
    %c0_24 = arith.constant 0 : index
    %c0_25 = arith.constant 0 : index
    %50 = vector.load %arg5[%c0_24, %c0_25] : memref<288x32xf32, #tpu.memory_space<vmem>>, vector<288x32xf32>
    %cst_26 = arith.constant dense<0.000000e+00> : vector<49x32xf32>
    %51 = tpu.matmul %49, %50, %cst_26 {dimension_numbers = #tpu.dot_dimension_numbers<[1], [0], [0], [1], [0, 0, 1, 1], [], []>} : vector<49x288xf32>, vector<288x32xf32>, vector<49x32xf32> -> vector<49x32xf32>
    %c0_27 = arith.constant 0 : index
    %c0_28 = arith.constant 0 : index
    %52 = vector.load %arg6[%c0_27, %c0_28] : memref<1x32xf32, #tpu.memory_space<vmem>>, vector<1x32xf32>
    %53 = vector.broadcast %52 : vector<1x32xf32> to vector<49x32xf32>
    %54 = arith.addf %51, %53 : vector<49x32xf32>
    %c0_29 = arith.constant 0 : index
    %c0_30 = arith.constant 0 : index
    %c0_31 = arith.constant 0 : index
    %55 = vector.load %arg7[%c0_29, %c0_30, %c0_31] : memref<3x28x49xf32, #tpu.memory_space<vmem>>, vector<1x28x49xf32>
    %56 = vector.shape_cast %55 : vector<1x28x49xf32> to vector<28x49xf32>
    %cst_32 = arith.constant dense<0.000000e+00> : vector<28x32xf32>
    %57 = tpu.matmul %56, %54, %cst_32 {dimension_numbers = #tpu.dot_dimension_numbers<[1], [0], [0], [1], [0, 0, 1, 1], [], []>} : vector<28x49xf32>, vector<49x32xf32>, vector<28x32xf32> -> vector<28x32xf32>
    %c1_33 = arith.constant 1 : index
    %c0_34 = arith.constant 0 : index
    %c0_35 = arith.constant 0 : index
    %58 = vector.load %arg7[%c1_33, %c0_34, %c0_35] : memref<3x28x49xf32, #tpu.memory_space<vmem>>, vector<1x28x49xf32>
    %59 = vector.shape_cast %58 : vector<1x28x49xf32> to vector<28x49xf32>
    %cst_36 = arith.constant dense<0.000000e+00> : vector<28x32xf32>
    %60 = tpu.matmul %59, %54, %cst_36 {dimension_numbers = #tpu.dot_dimension_numbers<[1], [0], [0], [1], [0, 0, 1, 1], [], []>} : vector<28x49xf32>, vector<49x32xf32>, vector<28x32xf32> -> vector<28x32xf32>
    %c2_37 = arith.constant 2 : index
    %c0_38 = arith.constant 0 : index
    %c0_39 = arith.constant 0 : index
    %61 = vector.load %arg7[%c2_37, %c0_38, %c0_39] : memref<3x28x49xf32, #tpu.memory_space<vmem>>, vector<1x28x49xf32>
    %62 = vector.shape_cast %61 : vector<1x28x49xf32> to vector<28x49xf32>
    %cst_40 = arith.constant dense<0.000000e+00> : vector<28x32xf32>
    %63 = tpu.matmul %62, %54, %cst_40 {dimension_numbers = #tpu.dot_dimension_numbers<[1], [0], [0], [1], [0, 0, 1, 1], [], []>} : vector<28x49xf32>, vector<49x32xf32>, vector<28x32xf32> -> vector<28x32xf32>
    %64 = tpu.concatenate %57, %60, %63 in 1 : vector<28x32xf32>, vector<28x32xf32>, vector<28x32xf32> -> vector<28x96xf32>
    %c0_41 = arith.constant 0 : index
    %c0_42 = arith.constant 0 : index
    %65 = vector.load %arg8[%c0_41, %c0_42] : memref<96x32xf32, #tpu.memory_space<vmem>>, vector<96x32xf32>
    %cst_43 = arith.constant dense<0.000000e+00> : vector<28x32xf32>
    %66 = tpu.matmul %64, %65, %cst_43 {dimension_numbers = #tpu.dot_dimension_numbers<[1], [0], [0], [1], [0, 0, 1, 1], [], []>} : vector<28x96xf32>, vector<96x32xf32>, vector<28x32xf32> -> vector<28x32xf32>
    %c0_44 = arith.constant 0 : index
    %c0_45 = arith.constant 0 : index
    %67 = vector.load %arg9[%c0_44, %c0_45] : memref<1x32xf32, #tpu.memory_space<vmem>>, vector<1x32xf32>
    %68 = vector.broadcast %67 : vector<1x32xf32> to vector<28x32xf32>
    %69 = arith.addf %66, %68 : vector<28x32xf32>
    %c0_46 = arith.constant 0 : index
    %c0_47 = arith.constant 0 : index
    %c0_48 = arith.constant 0 : index
    %70 = vector.load %arg10[%c0_46, %c0_47, %c0_48] : memref<3x6x28xf32, #tpu.memory_space<vmem>>, vector<1x6x28xf32>
    %71 = vector.shape_cast %70 : vector<1x6x28xf32> to vector<6x28xf32>
    %cst_49 = arith.constant dense<0.000000e+00> : vector<6x32xf32>
    %72 = tpu.matmul %71, %69, %cst_49 {dimension_numbers = #tpu.dot_dimension_numbers<[1], [0], [0], [1], [0, 0, 1, 1], [], []>} : vector<6x28xf32>, vector<28x32xf32>, vector<6x32xf32> -> vector<6x32xf32>
    %c1_50 = arith.constant 1 : index
    %c0_51 = arith.constant 0 : index
    %c0_52 = arith.constant 0 : index
    %73 = vector.load %arg10[%c1_50, %c0_51, %c0_52] : memref<3x6x28xf32, #tpu.memory_space<vmem>>, vector<1x6x28xf32>
    %74 = vector.shape_cast %73 : vector<1x6x28xf32> to vector<6x28xf32>
    %cst_53 = arith.constant dense<0.000000e+00> : vector<6x32xf32>
    %75 = tpu.matmul %74, %69, %cst_53 {dimension_numbers = #tpu.dot_dimension_numbers<[1], [0], [0], [1], [0, 0, 1, 1], [], []>} : vector<6x28xf32>, vector<28x32xf32>, vector<6x32xf32> -> vector<6x32xf32>
    %c2_54 = arith.constant 2 : index
    %c0_55 = arith.constant 0 : index
    %c0_56 = arith.constant 0 : index
    %76 = vector.load %arg10[%c2_54, %c0_55, %c0_56] : memref<3x6x28xf32, #tpu.memory_space<vmem>>, vector<1x6x28xf32>
    %77 = vector.shape_cast %76 : vector<1x6x28xf32> to vector<6x28xf32>
    %cst_57 = arith.constant dense<0.000000e+00> : vector<6x32xf32>
    %78 = tpu.matmul %77, %69, %cst_57 {dimension_numbers = #tpu.dot_dimension_numbers<[1], [0], [0], [1], [0, 0, 1, 1], [], []>} : vector<6x28xf32>, vector<28x32xf32>, vector<6x32xf32> -> vector<6x32xf32>
    %79 = tpu.concatenate %72, %75, %78 in 1 : vector<6x32xf32>, vector<6x32xf32>, vector<6x32xf32> -> vector<6x96xf32>
    %c0_58 = arith.constant 0 : index
    %c0_59 = arith.constant 0 : index
    %80 = vector.load %arg11[%c0_58, %c0_59] : memref<96x32xf32, #tpu.memory_space<vmem>>, vector<96x32xf32>
    %cst_60 = arith.constant dense<0.000000e+00> : vector<6x32xf32>
    %81 = tpu.matmul %79, %80, %cst_60 {dimension_numbers = #tpu.dot_dimension_numbers<[1], [0], [0], [1], [0, 0, 1, 1], [], []>} : vector<6x96xf32>, vector<96x32xf32>, vector<6x32xf32> -> vector<6x32xf32>
    %c0_61 = arith.constant 0 : index
    %c0_62 = arith.constant 0 : index
    %82 = vector.load %arg12[%c0_61, %c0_62] : memref<1x32xf32, #tpu.memory_space<vmem>>, vector<1x32xf32>
    %83 = vector.broadcast %82 : vector<1x32xf32> to vector<6x32xf32>
    %84 = arith.addf %81, %83 : vector<6x32xf32>
    %85 = math.tanh %84 : vector<6x32xf32>
    %86 = math.tanh %85 : vector<6x32xf32>
    %cst_63 = arith.constant 0.000000e+00 : f32
    %87 = vector.broadcast %cst_63 : f32 to vector<3x32xf32>
    %88 = tpu.concatenate %87, %86, %87 in 0 : vector<3x32xf32>, vector<6x32xf32>, vector<3x32xf32> -> vector<12x32xf32>
    %89 = vector.extract_strided_slice %88 {offsets = [0, 0], sizes = [6, 32], strides = [1, 1]} : vector<12x32xf32> to vector<6x32xf32>
    %c0_64 = arith.constant 0 : index
    %c0_65 = arith.constant 0 : index
    %c0_66 = arith.constant 0 : index
    %90 = vector.load %arg13[%c0_64, %c0_65, %c0_66] : memref<9x6x1xf32, #tpu.memory_space<vmem>>, vector<1x6x1xf32>
    %91 = vector.shape_cast %90 : vector<1x6x1xf32> to vector<6x1xf32>
    %92 = vector.broadcast %91 : vector<6x1xf32> to vector<6x32xf32>
    %93 = arith.mulf %89, %92 : vector<6x32xf32>
    %94 = vector.extract_strided_slice %88 {offsets = [1, 0], sizes = [6, 32], strides = [1, 1]} : vector<12x32xf32> to vector<6x32xf32>
    %c1_67 = arith.constant 1 : index
    %c0_68 = arith.constant 0 : index
    %c0_69 = arith.constant 0 : index
    %95 = vector.load %arg13[%c1_67, %c0_68, %c0_69] : memref<9x6x1xf32, #tpu.memory_space<vmem>>, vector<1x6x1xf32>
    %96 = vector.shape_cast %95 : vector<1x6x1xf32> to vector<6x1xf32>
    %97 = vector.broadcast %96 : vector<6x1xf32> to vector<6x32xf32>
    %98 = arith.mulf %94, %97 : vector<6x32xf32>
    %99 = vector.extract_strided_slice %88 {offsets = [2, 0], sizes = [6, 32], strides = [1, 1]} : vector<12x32xf32> to vector<6x32xf32>
    %c2_70 = arith.constant 2 : index
    %c0_71 = arith.constant 0 : index
    %c0_72 = arith.constant 0 : index
    %100 = vector.load %arg13[%c2_70, %c0_71, %c0_72] : memref<9x6x1xf32, #tpu.memory_space<vmem>>, vector<1x6x1xf32>
    %101 = vector.shape_cast %100 : vector<1x6x1xf32> to vector<6x1xf32>
    %102 = vector.broadcast %101 : vector<6x1xf32> to vector<6x32xf32>
    %103 = arith.mulf %99, %102 : vector<6x32xf32>
    %104 = vector.extract_strided_slice %88 {offsets = [2, 0], sizes = [6, 32], strides = [1, 1]} : vector<12x32xf32> to vector<6x32xf32>
    %c3_73 = arith.constant 3 : index
    %c0_74 = arith.constant 0 : index
    %c0_75 = arith.constant 0 : index
    %105 = vector.load %arg13[%c3_73, %c0_74, %c0_75] : memref<9x6x1xf32, #tpu.memory_space<vmem>>, vector<1x6x1xf32>
    %106 = vector.shape_cast %105 : vector<1x6x1xf32> to vector<6x1xf32>
    %107 = vector.broadcast %106 : vector<6x1xf32> to vector<6x32xf32>
    %108 = arith.mulf %104, %107 : vector<6x32xf32>
    %109 = vector.extract_strided_slice %88 {offsets = [4, 0], sizes = [6, 32], strides = [1, 1]} : vector<12x32xf32> to vector<6x32xf32>
    %c5_76 = arith.constant 5 : index
    %c0_77 = arith.constant 0 : index
    %c0_78 = arith.constant 0 : index
    %110 = vector.load %arg13[%c5_76, %c0_77, %c0_78] : memref<9x6x1xf32, #tpu.memory_space<vmem>>, vector<1x6x1xf32>
    %111 = vector.shape_cast %110 : vector<1x6x1xf32> to vector<6x1xf32>
    %112 = vector.broadcast %111 : vector<6x1xf32> to vector<6x32xf32>
    %113 = arith.mulf %109, %112 : vector<6x32xf32>
    %114 = vector.extract_strided_slice %88 {offsets = [4, 0], sizes = [6, 32], strides = [1, 1]} : vector<12x32xf32> to vector<6x32xf32>
    %c6_79 = arith.constant 6 : index
    %c0_80 = arith.constant 0 : index
    %c0_81 = arith.constant 0 : index
    %115 = vector.load %arg13[%c6_79, %c0_80, %c0_81] : memref<9x6x1xf32, #tpu.memory_space<vmem>>, vector<1x6x1xf32>
    %116 = vector.shape_cast %115 : vector<1x6x1xf32> to vector<6x1xf32>
    %117 = vector.broadcast %116 : vector<6x1xf32> to vector<6x32xf32>
    %118 = arith.mulf %114, %117 : vector<6x32xf32>
    %119 = vector.extract_strided_slice %88 {offsets = [5, 0], sizes = [6, 32], strides = [1, 1]} : vector<12x32xf32> to vector<6x32xf32>
    %c7_82 = arith.constant 7 : index
    %c0_83 = arith.constant 0 : index
    %c0_84 = arith.constant 0 : index
    %120 = vector.load %arg13[%c7_82, %c0_83, %c0_84] : memref<9x6x1xf32, #tpu.memory_space<vmem>>, vector<1x6x1xf32>
    %121 = vector.shape_cast %120 : vector<1x6x1xf32> to vector<6x1xf32>
    %122 = vector.broadcast %121 : vector<6x1xf32> to vector<6x32xf32>
    %123 = arith.mulf %119, %122 : vector<6x32xf32>
    %124 = vector.extract_strided_slice %88 {offsets = [6, 0], sizes = [6, 32], strides = [1, 1]} : vector<12x32xf32> to vector<6x32xf32>
    %c8_85 = arith.constant 8 : index
    %c0_86 = arith.constant 0 : index
    %c0_87 = arith.constant 0 : index
    %125 = vector.load %arg13[%c8_85, %c0_86, %c0_87] : memref<9x6x1xf32, #tpu.memory_space<vmem>>, vector<1x6x1xf32>
    %126 = vector.shape_cast %125 : vector<1x6x1xf32> to vector<6x1xf32>
    %127 = vector.broadcast %126 : vector<6x1xf32> to vector<6x32xf32>
    %128 = arith.mulf %124, %127 : vector<6x32xf32>
    %129 = tpu.concatenate %93, %98, %103, %108, %86, %113, %118, %123, %128 in 1 : vector<6x32xf32>, vector<6x32xf32>, vector<6x32xf32>, vector<6x32xf32>, vector<6x32xf32>, vector<6x32xf32>, vector<6x32xf32>, vector<6x32xf32>, vector<6x32xf32> -> vector<6x288xf32>
    %c0_88 = arith.constant 0 : index
    %c0_89 = arith.constant 0 : index
    %130 = vector.load %arg14[%c0_88, %c0_89] : memref<288x32xf32, #tpu.memory_space<vmem>>, vector<288x32xf32>
    %cst_90 = arith.constant dense<0.000000e+00> : vector<6x32xf32>
    %131 = tpu.matmul %129, %130, %cst_90 {dimension_numbers = #tpu.dot_dimension_numbers<[1], [0], [0], [1], [0, 0, 1, 1], [], []>} : vector<6x288xf32>, vector<288x32xf32>, vector<6x32xf32> -> vector<6x32xf32>
    %c0_91 = arith.constant 0 : index
    %c0_92 = arith.constant 0 : index
    %132 = vector.load %arg15[%c0_91, %c0_92] : memref<1x32xf32, #tpu.memory_space<vmem>>, vector<1x32xf32>
    %133 = vector.broadcast %132 : vector<1x32xf32> to vector<6x32xf32>
    %134 = arith.addf %131, %133 : vector<6x32xf32>
    %c0_93 = arith.constant 0 : index
    %c0_94 = arith.constant 0 : index
    %c0_95 = arith.constant 0 : index
    %135 = vector.load %arg16[%c0_93, %c0_94, %c0_95] : memref<3x3x6xf32, #tpu.memory_space<vmem>>, vector<1x3x6xf32>
    %136 = vector.shape_cast %135 : vector<1x3x6xf32> to vector<3x6xf32>
    %cst_96 = arith.constant dense<0.000000e+00> : vector<3x32xf32>
    %137 = tpu.matmul %136, %134, %cst_96 {dimension_numbers = #tpu.dot_dimension_numbers<[1], [0], [0], [1], [0, 0, 1, 1], [], []>} : vector<3x6xf32>, vector<6x32xf32>, vector<3x32xf32> -> vector<3x32xf32>
    %c1_97 = arith.constant 1 : index
    %c0_98 = arith.constant 0 : index
    %c0_99 = arith.constant 0 : index
    %138 = vector.load %arg16[%c1_97, %c0_98, %c0_99] : memref<3x3x6xf32, #tpu.memory_space<vmem>>, vector<1x3x6xf32>
    %139 = vector.shape_cast %138 : vector<1x3x6xf32> to vector<3x6xf32>
    %cst_100 = arith.constant dense<0.000000e+00> : vector<3x32xf32>
    %140 = tpu.matmul %139, %134, %cst_100 {dimension_numbers = #tpu.dot_dimension_numbers<[1], [0], [0], [1], [0, 0, 1, 1], [], []>} : vector<3x6xf32>, vector<6x32xf32>, vector<3x32xf32> -> vector<3x32xf32>
    %c2_101 = arith.constant 2 : index
    %c0_102 = arith.constant 0 : index
    %c0_103 = arith.constant 0 : index
    %141 = vector.load %arg16[%c2_101, %c0_102, %c0_103] : memref<3x3x6xf32, #tpu.memory_space<vmem>>, vector<1x3x6xf32>
    %142 = vector.shape_cast %141 : vector<1x3x6xf32> to vector<3x6xf32>
    %cst_104 = arith.constant dense<0.000000e+00> : vector<3x32xf32>
    %143 = tpu.matmul %142, %134, %cst_104 {dimension_numbers = #tpu.dot_dimension_numbers<[1], [0], [0], [1], [0, 0, 1, 1], [], []>} : vector<3x6xf32>, vector<6x32xf32>, vector<3x32xf32> -> vector<3x32xf32>
    %144 = tpu.concatenate %137, %140, %143 in 1 : vector<3x32xf32>, vector<3x32xf32>, vector<3x32xf32> -> vector<3x96xf32>
    %c0_105 = arith.constant 0 : index
    %c0_106 = arith.constant 0 : index
    %145 = vector.load %arg17[%c0_105, %c0_106] : memref<96x32xf32, #tpu.memory_space<vmem>>, vector<96x32xf32>
    %cst_107 = arith.constant dense<0.000000e+00> : vector<3x32xf32>
    %146 = tpu.matmul %144, %145, %cst_107 {dimension_numbers = #tpu.dot_dimension_numbers<[1], [0], [0], [1], [0, 0, 1, 1], [], []>} : vector<3x96xf32>, vector<96x32xf32>, vector<3x32xf32> -> vector<3x32xf32>
    %c0_108 = arith.constant 0 : index
    %c0_109 = arith.constant 0 : index
    %147 = vector.load %arg18[%c0_108, %c0_109] : memref<1x32xf32, #tpu.memory_space<vmem>>, vector<1x32xf32>
    %148 = vector.broadcast %147 : vector<1x32xf32> to vector<3x32xf32>
    %149 = arith.addf %146, %148 : vector<3x32xf32>
    %c0_110 = arith.constant 0 : index
    %c0_111 = arith.constant 0 : index
    %c0_112 = arith.constant 0 : index
    %150 = vector.load %arg19[%c0_110, %c0_111, %c0_112] : memref<3x1x3xf32, #tpu.memory_space<vmem>>, vector<1x1x3xf32>
    %151 = vector.shape_cast %150 : vector<1x1x3xf32> to vector<1x3xf32>
    %cst_113 = arith.constant dense<0.000000e+00> : vector<1x32xf32>
    %152 = tpu.matmul %151, %149, %cst_113 {dimension_numbers = #tpu.dot_dimension_numbers<[1], [0], [0], [1], [0, 0, 1, 1], [], []>} : vector<1x3xf32>, vector<3x32xf32>, vector<1x32xf32> -> vector<1x32xf32>
    %c1_114 = arith.constant 1 : index
    %c0_115 = arith.constant 0 : index
    %c0_116 = arith.constant 0 : index
    %153 = vector.load %arg19[%c1_114, %c0_115, %c0_116] : memref<3x1x3xf32, #tpu.memory_space<vmem>>, vector<1x1x3xf32>
    %154 = vector.shape_cast %153 : vector<1x1x3xf32> to vector<1x3xf32>
    %cst_117 = arith.constant dense<0.000000e+00> : vector<1x32xf32>
    %155 = tpu.matmul %154, %149, %cst_117 {dimension_numbers = #tpu.dot_dimension_numbers<[1], [0], [0], [1], [0, 0, 1, 1], [], []>} : vector<1x3xf32>, vector<3x32xf32>, vector<1x32xf32> -> vector<1x32xf32>
    %c2_118 = arith.constant 2 : index
    %c0_119 = arith.constant 0 : index
    %c0_120 = arith.constant 0 : index
    %156 = vector.load %arg19[%c2_118, %c0_119, %c0_120] : memref<3x1x3xf32, #tpu.memory_space<vmem>>, vector<1x1x3xf32>
    %157 = vector.shape_cast %156 : vector<1x1x3xf32> to vector<1x3xf32>
    %cst_121 = arith.constant dense<0.000000e+00> : vector<1x32xf32>
    %158 = tpu.matmul %157, %149, %cst_121 {dimension_numbers = #tpu.dot_dimension_numbers<[1], [0], [0], [1], [0, 0, 1, 1], [], []>} : vector<1x3xf32>, vector<3x32xf32>, vector<1x32xf32> -> vector<1x32xf32>
    %159 = tpu.concatenate %152, %155, %158 in 1 : vector<1x32xf32>, vector<1x32xf32>, vector<1x32xf32> -> vector<1x96xf32>
    %c0_122 = arith.constant 0 : index
    %c0_123 = arith.constant 0 : index
    %160 = vector.load %arg20[%c0_122, %c0_123] : memref<96x32xf32, #tpu.memory_space<vmem>>, vector<96x32xf32>
    %cst_124 = arith.constant dense<0.000000e+00> : vector<1x32xf32>
    %161 = tpu.matmul %159, %160, %cst_124 {dimension_numbers = #tpu.dot_dimension_numbers<[1], [0], [0], [1], [0, 0, 1, 1], [], []>} : vector<1x96xf32>, vector<96x32xf32>, vector<1x32xf32> -> vector<1x32xf32>
    %c0_125 = arith.constant 0 : index
    %c0_126 = arith.constant 0 : index
    %162 = vector.load %arg21[%c0_125, %c0_126] : memref<1x32xf32, #tpu.memory_space<vmem>>, vector<1x32xf32>
    %163 = arith.addf %161, %162 : vector<1x32xf32>
    %c0_127 = arith.constant 0 : index
    %c0_128 = arith.constant 0 : index
    %c0_129 = arith.constant 0 : index
    %164 = vector.load %arg22[%c0_127, %c0_128, %c0_129] : memref<1x1x32xf32, #tpu.memory_space<vmem>>, vector<1x1x32xf32>
    %165 = vector.shape_cast %164 : vector<1x1x32xf32> to vector<1x32xf32>
    %166 = vector.shape_cast %163 : vector<1x32xf32> to vector<1x1x32xf32>
    tpu.vector_store %arg22[%c0_127, %c0_128, %c0_129], %166 {strides = array<i32>} : memref<1x1x32xf32, #tpu.memory_space<vmem>>, vector<1x1x32xf32>,
    return
  }
  func.func @transform_0(%arg0: i32) -> (i32, i32, i32) {
    %c0_i32 = arith.constant 0 : i32
    %c0_i32_0 = arith.constant 0 : i32
    %c0_i32_1 = arith.constant 0 : i32
    return %arg0, %c0_i32, %c0_i32_0 : i32, i32, i32
  }
  func.func @transform_1(%arg0: i32) -> (i32, i32) {
    %c0_i32 = arith.constant 0 : i32
    %c0_i32_0 = arith.constant 0 : i32
    %c0_i32_1 = arith.constant 0 : i32
    return %c0_i32, %c0_i32_0 : i32, i32
  }
  func.func @transform_2(%arg0: i32) -> (i32, i32) {
    %c0_i32 = arith.constant 0 : i32
    %c0_i32_0 = arith.constant 0 : i32
    %c0_i32_1 = arith.constant 0 : i32
    return %c0_i32, %c0_i32_0 : i32, i32
  }
  func.func @transform_3(%arg0: i32) -> (i32, i32, i32) {
    %c0_i32 = arith.constant 0 : i32
    %c0_i32_0 = arith.constant 0 : i32
    %c0_i32_1 = arith.constant 0 : i32
    %c0_i32_2 = arith.constant 0 : i32
    return %c0_i32, %c0_i32_0, %c0_i32_1 : i32, i32, i32
  }
  func.func @transform_4(%arg0: i32) -> (i32, i32) {
    %c0_i32 = arith.constant 0 : i32
    %c0_i32_0 = arith.constant 0 : i32
    %c0_i32_1 = arith.constant 0 : i32
    return %c0_i32, %c0_i32_0 : i32, i32
  }
  func.func @transform_5(%arg0: i32) -> (i32, i32) {
    %c0_i32 = arith.constant 0 : i32
    %c0_i32_0 = arith.constant 0 : i32
    %c0_i32_1 = arith.constant 0 : i32
    return %c0_i32, %c0_i32_0 : i32, i32
  }
  func.func @transform_6(%arg0: i32) -> (i32, i32, i32) {
    %c0_i32 = arith.constant 0 : i32
    %c0_i32_0 = arith.constant 0 : i32
    %c0_i32_1 = arith.constant 0 : i32
    %c0_i32_2 = arith.constant 0 : i32
    return %c0_i32, %c0_i32_0, %c0_i32_1 : i32, i32, i32
  }
  func.func @transform_7(%arg0: i32) -> (i32, i32) {
    %c0_i32 = arith.constant 0 : i32
    %c0_i32_0 = arith.constant 0 : i32
    %c0_i32_1 = arith.constant 0 : i32
    return %c0_i32, %c0_i32_0 : i32, i32
  }
  func.func @transform_8(%arg0: i32) -> (i32, i32) {
    %c0_i32 = arith.constant 0 : i32
    %c0_i32_0 = arith.constant 0 : i32
    %c0_i32_1 = arith.constant 0 : i32
    return %c0_i32, %c0_i32_0 : i32, i32
  }
  func.func @transform_9(%arg0: i32) -> (i32, i32, i32) {
    %c0_i32 = arith.constant 0 : i32
    %c0_i32_0 = arith.constant 0 : i32
    %c0_i32_1 = arith.constant 0 : i32
    %c0_i32_2 = arith.constant 0 : i32
    return %c0_i32, %c0_i32_0, %c0_i32_1 : i32, i32, i32
  }
  func.func @transform_10(%arg0: i32) -> (i32, i32) {
    %c0_i32 = arith.constant 0 : i32
    %c0_i32_0 = arith.constant 0 : i32
    %c0_i32_1 = arith.constant 0 : i32
    return %c0_i32, %c0_i32_0 : i32, i32
  }
  func.func @transform_11(%arg0: i32) -> (i32, i32) {
    %c0_i32 = arith.constant 0 : i32
    %c0_i32_0 = arith.constant 0 : i32
    %c0_i32_1 = arith.constant 0 : i32
    return %c0_i32, %c0_i32_0 : i32, i32
  }
  func.func @transform_12(%arg0: i32) -> (i32, i32, i32) {
    %c0_i32 = arith.constant 0 : i32
    %c0_i32_0 = arith.constant 0 : i32
    %c0_i32_1 = arith.constant 0 : i32
    %c0_i32_2 = arith.constant 0 : i32
    return %c0_i32, %c0_i32_0, %c0_i32_1 : i32, i32, i32
  }
  func.func @transform_13(%arg0: i32) -> (i32, i32) {
    %c0_i32 = arith.constant 0 : i32
    %c0_i32_0 = arith.constant 0 : i32
    %c0_i32_1 = arith.constant 0 : i32
    return %c0_i32, %c0_i32_0 : i32, i32
  }
  func.func @transform_14(%arg0: i32) -> (i32, i32) {
    %c0_i32 = arith.constant 0 : i32
    %c0_i32_0 = arith.constant 0 : i32
    %c0_i32_1 = arith.constant 0 : i32
    return %c0_i32, %c0_i32_0 : i32, i32
  }
  func.func @transform_15(%arg0: i32) -> (i32, i32, i32) {
    %c0_i32 = arith.constant 0 : i32
    %c0_i32_0 = arith.constant 0 : i32
    %c0_i32_1 = arith.constant 0 : i32
    %c0_i32_2 = arith.constant 0 : i32
    return %c0_i32, %c0_i32_0, %c0_i32_1 : i32, i32, i32
  }
  func.func @transform_16(%arg0: i32) -> (i32, i32) {
    %c0_i32 = arith.constant 0 : i32
    %c0_i32_0 = arith.constant 0 : i32
    %c0_i32_1 = arith.constant 0 : i32
    return %c0_i32, %c0_i32_0 : i32, i32
  }
  func.func @transform_17(%arg0: i32) -> (i32, i32) {
    %c0_i32 = arith.constant 0 : i32
    %c0_i32_0 = arith.constant 0 : i32
    %c0_i32_1 = arith.constant 0 : i32
    return %c0_i32, %c0_i32_0 : i32, i32
  }
  func.func @transform_18(%arg0: i32) -> (i32, i32, i32) {
    %c0_i32 = arith.constant 0 : i32
    %c0_i32_0 = arith.constant 0 : i32
    %c0_i32_1 = arith.constant 0 : i32
    %c0_i32_2 = arith.constant 0 : i32
    return %c0_i32, %c0_i32_0, %c0_i32_1 : i32, i32, i32
  }
  func.func @transform_19(%arg0: i32) -> (i32, i32) {
    %c0_i32 = arith.constant 0 : i32
    %c0_i32_0 = arith.constant 0 : i32
    %c0_i32_1 = arith.constant 0 : i32
    return %c0_i32, %c0_i32_0 : i32, i32
  }
  func.func @transform_20(%arg0: i32) -> (i32, i32) {
    %c0_i32 = arith.constant 0 : i32
    %c0_i32_0 = arith.constant 0 : i32
    %c0_i32_1 = arith.constant 0 : i32
    return %c0_i32, %c0_i32_0 : i32, i32
  }
  func.func @transform_21(%arg0: i32) -> (i32, i32, i32) {
    %c0_i32 = arith.constant 0 : i32
    %c0_i32_0 = arith.constant 0 : i32
    %c0_i32_1 = arith.constant 0 : i32
    return %arg0, %c0_i32, %c0_i32_0 : i32, i32, i32
  }
}

</mosaic_0001>

<bundles_post_ra>
// kernel: squeeze.9
= control target key start
LH: loop header
LB: loop body
LE: loop exit
PB: predicated region body
PF: predicated region fallthrough
CT: control target
= control target key end

     0   :  { %s7_s6 = smov 3  ;;  %s21_s9 = smov 3  ;;  %vm4_vm0 = vcmask 56320   ;;  %vm11_vm1 = vcmask 400720   ;;  %vm18_vm2 = vcmask 343320   ;;  %vm25_vm3 = vcmask 285920   ;;  %s106_s0 = inlined_call_operand.vmem [shape: f32[2,1,7,7], index: 0, kind: input, shape index: {}]   ;;  %s107_s1 = inlined_call_operand.vmem [shape: f32[2,49,1], index: 1, kind: output, shape index: {}]  }
   0x1   :  { %v54_v0 = vld [vmem:[%s106_s0 + $0x6] ss:$8 sm:%s7_s6]   ;;  %s66_s10 = smov 42   ;;  %v56_v1 = vld [vmem:[%s106_s0 + $0x4] ss:$8 sm:%s21_s9]   ;;  %s14_s13 = smov 3 }
   0x2   :  { %9 = vrot.lane.b32.xlu0 %v54_v0, %s66_s10  ;;  %s67_s14 = smov 28   ;;  %v55_v2 = vld [vmem:[%s106_s0 + $0x5] ss:$8 sm:%s14_s13]   ;;  %s28_s17 = smov 3  ;;  %vm32_vm4 = vcmask 228520   ;;  %vm39_vm5 = vcmask 171120  }
   0x3   :  { %23 = vrot.lane.b32.xlu1 %v56_v1, %s67_s14  ;;  %v57_v3 = vld [vmem:[%s106_s0 + $0x3] ss:$8 sm:%s28_s17]   ;;  %s35_s20 = smov 3  ;;  %s42_s21 = smov 3  ;;  %vm46_vm6 = vcmask 113720  }
   0x4   :  { %s68_s22 = smov 35   ;;  %v58_v4 = vld [vmem:[%s106_s0 + $0x2] ss:$8 sm:%s35_s20]   ;;  %s2_s25 = smov 3  ;;  %v59_v6 = vld [vmem:[%s106_s0 + $0x1] ss:$8 sm:%s42_s21]  }
   0x5   :  { %s69_s26 = smov 21   ;;  %v3_v5 = vld [vmem:[%s106_s0] ss:$8 sm:%s2_s25]   ;;  %s70_s0 = smov 14  }
   0x6   :  { %16 = vrot.lane.b32.xlu0 %v55_v2, %s68_s22  ;;  %5 = vst.msk [vmem:[#allocation0] sm:$0x3] %vm4_vm0, %v3_v5   ;;  %s71_s2 = smov 7  }
   0x7   :  { %30 = vrot.lane.b32.xlu1 %v57_v3, %s69_s26 }
   0xa   :  { %37 = vrot.lane.b32.xlu0 %v58_v4, %s70_s0 }
   0xb   :  { %44 = vrot.lane.b32.xlu1 %v59_v6, %s71_s2 }
  0x74   :  { %v10_v7 = vpop.permute.xlu0 %9  }
  0x75   :  { %12 = vst.msk [vmem:[#allocation0] sm:$0x3] %vm11_vm1, %v10_v7   ;;  %v24_v8 = vpop.permute.xlu1 %23  }
  0x78   :  { %v17_v9 = vpop.permute.xlu0 %16  }
  0x79   :  { %19 = vst.msk [vmem:[#allocation0] sm:$0x3] %vm18_vm2, %v17_v9   ;;  %v31_v10 = vpop.permute.xlu1 %30  }
  0x7a   :  { %26 = vst.msk [vmem:[#allocation0] sm:$0x3] %vm25_vm3, %v24_v8  }
  0x7b   :  { %33 = vst.msk [vmem:[#allocation0] sm:$0x3] %vm32_vm4, %v31_v10  }
  0x7c   :  { %v38_v11 = vpop.permute.xlu0 %37  }
  0x7d   :  { %40 = vst.msk [vmem:[#allocation0] sm:$0x3] %vm39_vm5, %v38_v11   ;;  %v45_v12 = vpop.permute.xlu1 %44  }
  0x7e   :  { %47 = vst.msk [vmem:[#allocation0] sm:$0x3] %vm46_vm6, %v45_v12  }
  0x85   :  { %v51_v13 = vld [vmem:[#allocation0] sm:$0x3] }
  0x86   :  { %53 = vst [vmem:[%s107_s1] sm:$0x3] %v51_v13 }

// kernel: forward.3
= control target key start
LH: loop header
LB: loop body
LE: loop exit
PB: predicated region body
PF: predicated region fallthrough
CT: control target
= control target key end

     0   :  { %vm28_vm0 = vcmask 254976   ;;  %v426_v7 = vmov 0.0   ;;  %s621_s0 = inlined_call_operand.vmem [shape: f32[2,32], index: 0, kind: input, shape index: {}]   ;;  %s622_s1 = inlined_call_operand.vmem [shape: f32[1,32], index: 1, kind: input, shape index: {}]   ;;  %s623_s2 = inlined_call_operand.vmem [shape: f32[1,32], index: 2, kind: input, shape index: {}]   ;;  %s624_s3 = inlined_call_operand.vmem [shape: f32[32,256], index: 3, kind: input, shape index: {}]   ;;  %s625_s4 = inlined_call_operand.vmem [shape: f32[1,256], index: 4, kind: input, shape index: {}]   ;;  %s626_s5 = inlined_call_operand.vmem [shape: f32[256,10], index: 5, kind: input, shape index: {}]   ;;  %s627_s6 = inlined_call_operand.vmem [shape: f32[1,10], index: 6, kind: input, shape index: {}]   ;;  %s628_s7 = inlined_call_operand.hbm [shape: f32[2,10], index: 7, kind: output, shape index: {}]  }
   0x1   :  { %v68_v0 = vld [vmem:[%s624_s3 + $0x8] sm:$0xff]  ;;  %v70_v1 = vld [vmem:[%s624_s3 + $0x18] sm:$0xff]  ;;  %v67_v2 = vld [vmem:[%s624_s3] sm:$0xff]  ;;  %155 = vmatprep.mubr.f32.mxu0 %v426_v7 }
   0x2   :  { %v348_v3 = vpack.c.bf16 %v70_v1, %v68_v0  ;;  %v69_v4 = vld [vmem:[%s624_s3 + $0x10] sm:$0xff]  ;;  %v72_v5 = vld [vmem:[%s624_s3 + $0x28] sm:$0xff]  ;;  %v74_v6 = vld [vmem:[%s624_s3 + $0x38] sm:$0xff] }
   0x3   :  { %v350_v8 = vpack.c.bf16 %v69_v4, %v67_v2  ;;  %v352_v9 = vpack.c.bf16 %v74_v6, %v72_v5  ;;  %v71_v10 = vld [vmem:[%s624_s3 + $0x20] sm:$0xff]  ;;  %v73_v11 = vld [vmem:[%s624_s3 + $0x30] sm:$0xff] }
   0x4   :  { %v27_v12 = vld [vmem:[%s621_s0] sm:$0x3]  ;;  %349 = vmatprep.subr.bf16.mxu0 %v348_v3  ;;  %v354_v14 = vpack.c.bf16 %v73_v11, %v71_v10 }
   0x5   :  { %v29_v13 = vsel %vm28_vm0, %v27_v12, 0.0  ;;  %351 = vmatpush1.bf16.msra.mxu0 %v350_v8 }
   0x6   :  { %v30_v15 = vrot.slane %v29_v13, 4 }
   0x7   :  { %12 = vsyncpa [#allocation3], 0  ;;  %353 = vmatprep.subr.bf16.mxu0 %v352_v9  ;;  %v309_v34 = vld [vmem:[%s622_s1] ss:$0 sm:$0xff]  ;;  %vm87_vm1 = vcmask 261120   ;;  %v77_v39 = vlaneseq  ;;  %vm162_vm2 = vcmask 1041408  }
   0x8   :  { %v31_v16 = vadd.f32 %v30_v15, %v29_v13  ;;  %v310_v36 = vld [vmem:[%s623_s2] ss:$0 sm:$0xff]  ;;  %v201_v54 = vld [vmem:[%s626_s5 + $0x88] sm:$0xff]  ;;  %v202_v58 = vld [vmem:[%s626_s5 + $0x90] sm:$0xff]  ;;  %vm293_vm3 = vcmask 74752  }
   0x9   :  { %355 = vmatpush1.bf16.msra.mxu0 %v354_v14  ;;  %v78_v40 = vshrl.u32 %v77_v39, 7  ;;  %v75_v42 = vld [vmem:[%s625_s4] sm:$0x3]  ;;  %v185_v57 = vld [vmem:[%s626_s5 + $0x8] sm:$0xff]  ;;  %v203_v59 = vld [vmem:[%s626_s5 + $0x98] sm:$0xff] }
   0xa   :  { %v32_v17 = vrot.slane %v31_v16, 2  ;;  %v200_v53 = vld [vmem:[%s626_s5 + $0x80] sm:$0xff]  ;;  %v360_v61 = vpack.c.bf16 %v203_v59, %v202_v58  ;;  %v186_v62 = vld [vmem:[%s626_s5 + $0x10] sm:$0xff]  ;;  %v187_v63 = vld [vmem:[%s626_s5 + $0x18] sm:$0xff] }
   0xb   :  { %v79_v41 = vsub.s32 0, %v78_v40  ;;  %v83_v43 = vsub.s32 1, %v78_v40  ;;  %v184_v55 = vld [vmem:[%s626_s5] sm:$0xff]  ;;  %v356_v56 = vpack.c.bf16 %v201_v54, %v200_v53  ;;  %v362_v0 = vpack.c.bf16 %v187_v63, %v186_v62  ;;  %v189_v15 = vld [vmem:[%s626_s5 + $0x28] sm:$0xff]  ;;  %v214_v40 = vld [vmem:[%s626_s5 + $0xf0] sm:$0xff] }
   0xc   :  { %v33_v18 = vadd.f32 %v32_v17, %v31_v16  ;;  %v358_v60 = vpack.c.bf16 %v185_v57, %v184_v55  ;;  %v204_v11 = vld [vmem:[%s626_s5 + $0xa0] sm:$0xff]  ;;  %v206_v17 = vld [vmem:[%s626_s5 + $0xb0] sm:$0xff]  ;;  %v197_v39 = vld [vmem:[%s626_s5 + $0x68] sm:$0xff] }
   0xd   :  { %v80_v44 = vrot.slane %v75_v42, %v79_v41  ;;  %v84_v45 = vrot.slane %v75_v42, %v83_v43  ;;  %357 = vmatprep.subr.bf16.mxu1 %v356_v56  ;;  %v188_v14 = vld [vmem:[%s626_s5 + $0x20] sm:$0xff]  ;;  %v215_v41 = vld [vmem:[%s626_s5 + $0xf8] sm:$0xff] }
   0xe   :  { %v34_v19 = vrot.slane %v33_v18, 1  ;;  %359 = vmatpush3.bf16.msra.mxu1 %v358_v60  ;;  %v366_v16 = vpack.c.bf16 %v189_v15, %v188_v14  ;;  %v384_v43 = vpack.c.bf16 %v215_v41, %v214_v40  ;;  %v312_v54 = vld [vmem:[%s627_s6] ss:$0 sm:$0xff] }
   0xf   :  { %361 = vmatprep.subr.bf16.mxu1 %v360_v61 }
  0x10   :  { %v35_v20 = vadd.f32 %v34_v19, %v33_v18  ;;  %v207_v18 = vld [vmem:[%s626_s5 + $0xb8] sm:$0xff] }
  0x11   :  { %v368_v19 = vpack.c.bf16 %v207_v18, %v206_v17 }
  0x12   :  { %v37_v21 = vmul.f32 0.5, %v35_v20  ;;  %363 = vmatpush3.bf16.msra.mxu1 %v362_v0  ;;  %v190_v20 = vld [vmem:[%s626_s5 + $0x30] sm:$0xff] }
  0x14   :  { %v38_v22 = vsub.f32 %v27_v12, %v37_v21  ;;  %v205_v12 = vld [vmem:[%s626_s5 + $0xa8] sm:$0xff]  ;;  %v191_v21 = vld [vmem:[%s626_s5 + $0x38] sm:$0xff] }
  0x15   :  { %v364_v13 = vpack.c.bf16 %v205_v12, %v204_v11 }
  0x16   :  { %v39_v23 = vmul.f32 %v38_v22, %v38_v22 }
  0x17   :  { %365 = vmatprep.subr.bf16.mxu1 %v364_v13 }
  0x18   :  { %v40_v24 = vsel %vm28_vm0, %v39_v23, 0.0  ;;  %367 = vmatpush3.bf16.msra.mxu1 %v366_v16  ;;  %v208_v23 = vld [vmem:[%s626_s5 + $0xc0] sm:$0xff] }
  0x19   :  { %v41_v25 = vrot.slane %v40_v24, 4  ;;  %369 = vmatprep.subr.bf16.mxu1 %v368_v19 }
  0x1b   :  { %v42_v26 = vadd.f32 %v41_v25, %v40_v24  ;;  %v209_v24 = vld [vmem:[%s626_s5 + $0xc8] sm:$0xff] }
  0x1c   :  { %v372_v25 = vpack.c.bf16 %v209_v24, %v208_v23 }
  0x1d   :  { %v43_v27 = vrot.slane %v42_v26, 2 }
  0x1f   :  { %v44_v28 = vadd.f32 %v43_v27, %v42_v26  ;;  %v192_v26 = vld [vmem:[%s626_s5 + $0x40] sm:$0xff]  ;;  %v193_v27 = vld [vmem:[%s626_s5 + $0x48] sm:$0xff] }
  0x21   :  { %v45_v29 = vrot.slane %v44_v28, 1 }
  0x23   :  { %v46_v30 = vadd.f32 %v45_v29, %v44_v28  ;;  %v374_v28 = vpack.c.bf16 %v193_v27, %v192_v26  ;;  %v210_v29 = vld [vmem:[%s626_s5 + $0xd0] sm:$0xff] }
  0x25   :  { %v47_v31 = vmul.f32 0.5, %v46_v30  ;;  %v211_v30 = vld [vmem:[%s626_s5 + $0xd8] sm:$0xff] }
  0x27   :  { %v48_v32 = vadd.f32 1e-05, %v47_v31  ;;  %v376_v31 = vpack.c.bf16 %v211_v30, %v210_v29 }
  0x29   :  { %390 = vrsqrt.f32 %v48_v32  ;;  %v194_v32 = vld [vmem:[%s626_s5 + $0x50] sm:$0xff] }
  0x33   :  { %v391_v33 = vpop.eup %390 }
  0x34   :  { %v50_v35 = vmul.f32 %v391_v33, %v38_v22  ;;  %v370_v22 = vpack.c.bf16 %v191_v21, %v190_v20  ;;  %v195_v33 = vld [vmem:[%s626_s5 + $0x58] sm:$0xff] }
  0x36   :  { %v58_v37 = vmul.f32 %v309_v34, %v50_v35  ;;  %371 = vmatpush3.bf16.msra.mxu1 %v370_v22  ;;  %v378_v34 = vpack.c.bf16 %v195_v33, %v194_v32  ;;  %v212_v35 = vld [vmem:[%s626_s5 + $0xe0] sm:$0xff] }
  0x37   :  { %373 = vmatprep.subr.bf16.mxu1 %v372_v25 }
  0x38   :  { %v66_v38 = vadd.f32 %v310_v36, %v58_v37  ;;  %v213_v36 = vld [vmem:[%s626_s5 + $0xe8] sm:$0xff]  ;;  %v196_v37 = vld [vmem:[%s626_s5 + $0x60] sm:$0xff] }
  0x39   :  { %v382_v42 = vpack.c.bf16 %v197_v39, %v196_v37 }
  0x3a   :  { %311 = vmatmul.mubr.msk.f32.vlgmr.msra.gmra.mrb[0].mxu0 %vm87_vm1, %v66_v38  ;;  %375 = vmatpush3.bf16.msra.mxu1 %v374_v28  ;;  %v380_v38 = vpack.c.bf16 %v213_v36, %v212_v35 }
  0x3b   :  { %377 = vmatprep.subr.bf16.mxu1 %v376_v31 }
  0x3e   :  { %379 = vmatpush3.bf16.msra.mxu1 %v378_v34 }
  0x3f   :  { %381 = vmatprep.subr.bf16.mxu1 %v380_v38 }
  0x42   :  { %383 = vmatpush3.bf16.msra.mxu1 %v382_v42 }
  0x43   :  { %385 = vmatprep.subr.bf16.mxu1 %v384_v43 }
 0x10d   :  { %v157_v46 = vpop.f32.mrb[0].mxu0 }
 0x10e   :  { %v158_v47 = vadd.f32 %v157_v46, %v80_v44  ;;  %v159_v48 = vpop.f32.mrb[1].mxu0  ;;  %v198_v44 = vld [vmem:[%s626_s5 + $0x70] sm:$0xff] }
 0x10f   :  { %v160_v49 = vadd.f32 %v159_v48, %v84_v45  ;;  %v199_v45 = vld [vmem:[%s626_s5 + $0x78] sm:$0xff]  ;;  %s427_s5 = smov [#allocation2]  }
 0x110   :  { %v163_v50 = vsel %vm162_vm2, %v158_v47, -inf  ;;  %v386_v46 = vpack.c.bf16 %v199_v45, %v198_v44  ;;  %s301_s30 = sshll.u32 %s427_s5, 4  ;;  %s302_s30 = int_to_ptr.vmem [resolvable:$true] %s301_s30 }
 0x111   :  { %v164_v51 = vsel %vm162_vm2, %v160_v49, -inf  ;;  %s402_s8 = scalar_lea.vmem %s302_s30, 32  ;;  %p407_p1 = scmp.lt.s32.totalorder %s302_s30, %s302_s30 }
 0x112   :  { %v165_v52 = vmax.f32 %v163_v50, %v164_v51  ;;  %387 = vmatpush3.bf16.msra.mxu1 %v386_v46  ;;  %p403_p0 = scmp.ne.s32.totalorder %s302_s30, %s402_s8  ;;  %p408_p2 = scmp.lt.s32.totalorder %s402_s8, %s402_s8 }
 0x114   :  { %166 = vmax.xlane.f32.xlu0 %v165_v52  ;;  %p409_p3 = por %p408_p2, %p407_p1 }
 0x116   :  { %p410_p4 = pnand %p409_p3, %p403_p0 }
 0x1a1   :  { %v167_v1 = vpop.xlane.xlu0 %166 }
 0x1a2   :  { %v168_v2 = vsub.f32 %v158_v47, %v167_v1  ;;  %v169_v3 = vsub.f32 %v160_v49, %v167_v1 }
 0x1a4   :  { %v170_v4 = vmul.f32 1.442695, %v168_v2  ;;  %v172_v5 = vmul.f32 1.442695, %v169_v3 }
 0x1a6   :  { %392 = vpow2.f32 %v170_v4 }
 0x1a7   :  { %394 = vpow2.f32 %v172_v5 }
 0x1b0   :  { %v393_v6 = vpop.eup %392 }
 0x1b1   :  { %v395_v7 = vpop.eup %394  ;;  %v174_v8 = vsel %vm162_vm2, %v393_v6, 0.0 }
 0x1b2   :  { %v175_v9 = vsel %vm162_vm2, %v395_v7, 0.0 }
 0x1b3   :  { %v176_v10 = vadd.f32 %v175_v9, %v174_v8 }
 0x1b5   :  { %177 = vadd.xlane.f32.xlu0 %v176_v10 }
 0x242   :  { %v178_v47 = vpop.xlane.xlu0 %177 }
 0x243   :  { %396 = vrcp.f32 %v178_v47 }
 0x24d   :  { %v397_v48 = vpop.eup %396 }
 0x24e   :  { %v180_v49 = vmul.f32 %v397_v48, %v393_v6  ;;  %v181_v50 = vmul.f32 %v397_v48, %v395_v7 }
 0x250   :  { %398 = vtanh.f32 %v180_v49 }
 0x251   :  { %400 = vtanh.f32 %v181_v50 }
 0x25a   :  { %v399_v51 = vpop.eup %398 }
 0x25b   :  { %v401_v52 = vpop.eup %400 }
 0x25c   :  { %287 = vmatprep.mubr.f32.mxu1 %v401_v52 }
 0x25d   :  { %288 = vmatmul.mubr.f32.vlgmr.msra.gmra.mrb[0].mxu1 %v399_v51 }
 0x330   :  { %v345_v53 = vpop.f32.mrb[0].mxu1 }
 0x331   :  { %v346_v55 = vpop.f32.mrb[1].mxu1 }
 0x332   :  { %v347_v56 = vadd.f32 %v346_v55, %v345_v53 }
 0x334   :  { %v290_v57 = vadd.f32 %v347_v56, %v312_v54 }
 0x336   :  { %294 = vst.msk [vmem:[#allocation2] sm:$0x3] %vm293_vm3, %v290_v57 }
 0x337   :  { %413 = shalt.err (!%p410_p4)
}
 0x338   :  { %s414_s11 = scalar_lea.hbm %s628_s7, 32 }
 0x339   :  { %p415_p5 = scmp.ne.s32.totalorder %s628_s7, %s414_s11  ;;  %p418_p6 = scmp.lt.u32.totalorder %s414_s11, %s628_s7 }
 0x33b   :  { %p420_p7 = pnand %p418_p6, %p415_p5 }
 0x33d   :  { %423 = shalt.err (!%p420_p7)
}
 0x33e   :  { %304 = dma.vmem_to_hbm [thread:$0]  %s302_s30, 32, %s628_s7, [#allocation3]  }
 0x33f   :  { %424 = dma.done.wait [#allocation3], 32  }
 0x340   :  { %425 = vsyncadd [#allocation3], 4294967264 }
 0x341   :  { %308 = vsyncpa [#allocation3], 1 }

// kernel: forward.2
= control target key start
LH: loop header
LB: loop body
LE: loop exit
PB: predicated region body
PF: predicated region fallthrough
CT: control target
= control target key end

     0   :  { %s6267_s0 = inlined_call_operand.vmem [shape: f32[2,49,9], index: 0, kind: input, shape index: {}]   ;;  %s6268_s1 = inlined_call_operand.vmem [shape: f32[9,32], index: 1, kind: input, shape index: {}]   ;;  %s6269_s2 = inlined_call_operand.vmem [shape: f32[1,32], index: 2, kind: input, shape index: {}]   ;;  %s6270_s3 = inlined_call_operand.vmem [shape: f32[9,49,1], index: 3, kind: input, shape index: {}]   ;;  %s6271_s4 = inlined_call_operand.vmem [shape: f32[288,32], index: 4, kind: input, shape index: {}]   ;;  %s6272_s5 = inlined_call_operand.vmem [shape: f32[1,32], index: 5, kind: input, shape index: {}]   ;;  %s6273_s6 = inlined_call_operand.vmem [shape: f32[3,28,49], index: 6, kind: input, shape index: {}]   ;;  %s6274_s7 = inlined_call_operand.vmem [shape: f32[96,32], index: 7, kind: input, shape index: {}]   ;;  %s6275_s8 = inlined_call_operand.vmem [shape: f32[1,32], index: 8, kind: input, shape index: {}]   ;;  %s6276_s9 = inlined_call_operand.vmem [shape: f32[3,6,28], index: 9, kind: input, shape index: {}]   ;;  %s6277_s10 = inlined_call_operand.vmem [shape: f32[96,32], index: 10, kind: input, shape index: {}]   ;;  %s6278_s11 = inlined_call_operand.vmem [shape: f32[1,32], index: 11, kind: input, shape index: {}]   ;;  %s6279_s12 = inlined_call_operand.vmem [shape: f32[9,6,1], index: 12, kind: input, shape index: {}]   ;;  %s6280_s13 = inlined_call_operand.vmem [shape: f32[288,32], index: 13, kind: input, shape index: {}]   ;;  %s6281_s14 = inlined_call_operand.vmem [shape: f32[1,32], index: 14, kind: input, shape index: {}]   ;;  %s6282_s15 = inlined_call_operand.vmem [shape: f32[3,3,6], index: 15, kind: input, shape index: {}]   ;;  %s6283_s16 = inlined_call_operand.vmem [shape: f32[96,32], index: 16, kind: input, shape index: {}]   ;;  %s6284_s17 = inlined_call_operand.vmem [shape: f32[1,32], index: 17, kind: input, shape index: {}]   ;;  %s6285_s18 = inlined_call_operand.vmem [shape: f32[3,1,3], index: 18, kind: input, shape index: {}]   ;;  %s6286_s19 = inlined_call_operand.vmem [shape: f32[96,32], index: 19, kind: input, shape index: {}]   ;;  %s6287_s20 = inlined_call_operand.vmem [shape: f32[1,32], index: 20, kind: input, shape index: {}]   ;;  %s6288_s21 = inlined_call_operand.vmem [shape: f32[2,1,32], index: 21, kind: output, shape index: {}]  }
   0x1   :  { %6312 = sst [smem:[#allocation10_spill]] %s6267_s0 }
   0x2   :  { %6313 = sst [smem:[#allocation11_spill]] %s6268_s1 }
   0x3   :  { %6314 = sst [smem:[#allocation12_spill]] %s6269_s2  ;;  %s4798_s2 = smov 0  }
   0x4   :  { %6315 = sst [smem:[#allocation13_spill]] %s6270_s3 }
   0x5   :  { %6316 = sst [smem:[#allocation14_spill]] %s6271_s4 }
   0x6   :  { %6317 = sst [smem:[#allocation15_spill]] %s6272_s5 }
   0x7   :  { %6318 = sst [smem:[#allocation16_spill]] %s6273_s6 }
   0x8   :  { %6319 = sst [smem:[#allocation17_spill]] %s6274_s7 }
   0x9 LB: > { %s3647_s25 = sadd.s32 4294967295, %s4678_s2   ;;  %p3651_p0 = scmp.ge.s32.totalorder %s4678_s2, 1  ;;  %s4678_s2 = sphi %s4798_s2, %s31_s2  }
   0xa   : > { %p587_p1 = scmp.lt.s32.totalorder %s4678_s2, 3 }
   0xc   : > { %p588_p2 = pnand %p3651_p0, %p587_p1 }
   0xe   : > { %591 = sbr.rel (%p588_p2) target bundleno = 3253 (0xcb5), region = 104 }
  0x15   : > { %s6320_s3 = sld [smem:[#allocation13_spill]]  ;;  %s6321_s30 = sld [smem:[#allocation11_spill]]  ;;  %vm691_vm0 = vcmask 1040384   ;;  %v4680_v3 = vmov 0   ;;  %vm4681_vm1 = vmmov 1   ;;  %v6292_v6 = vmov 0.0|0.0  }
  0x16   : > { %4547 = vset.pattern.permute.xlu1 %v4680_v3  ;;  %4546 = vset.pattern.permute.xlu0 %v4680_v3  ;;  %vm4316_vm2 = vmpackc.low %vm691_vm0, %vm4681_vm1  ;;  %p645_p3 = scmp.lt.s32.totalorder %s3647_s25, 1  ;;  %vm4683_vm3 = vmmov 0   ;;  %v6294_v9 = vmov 0.0   ;;  %vm669_vm4 = vcmask 72704   ;;  %s6322_s5 = sld [smem:[#allocation10_spill]]  ;;  %vm1135_vm5 = vcmask 1045504  }
  0x17   : > { %4314 = vmatprep.subr.bf16.mxu1 %v6292_v6  ;;  %4019 = vmatprep.mubr.msk.f32.mxu1 %vm4683_vm3, %v6294_v9  ;;  %s6323_s24 = sld [smem:[#allocation14_spill]]  ;;  %vm944_vm6 = vcmask 1041408   ;;  %vm1008_vm7 = vcmask 1046528   ;;  %s6329_s26 = sld [smem:[#allocation12_spill]]  ;;  %vm1522_vm8 = vcmask 261120   ;;  %vm1530_vm9 = vcmask 523264  }
  0x18   : > { %s6370_s25 = smov (!%p645_p3, %s3647_s25), 1  ;;  %4350 = vmatprep.subr.bf16.mxu0 %v6292_v6  ;;  %4048 = vmatprep.mubr.msk.f32.mxu0 %vm4683_vm3, %v6294_v9  ;;  %s6307_s29 = smov 64   ;;  %vm1538_vm10 = vcmask 785408   ;;  %vm1835_vm11 = vcmask 400384   ;;  %vm2301_vm12 = vcmask 1043456   ;;  %vm2297_vm14 = vcmask 228352  }
  0x19   : > { %s4529_s27 = smul.u32 56, %s6370_s25  ;;  %s6309_s0 = smov 32   ;;  %vm5872_vm13 = vmpackc.low %vm2301_vm12, %vm4681_vm1  ;;  %vm2632_vm15 = vcmask 1042432   ;;  %vm3275_vm1 = vcmask 23552  }
  0x1a   : > { %s6306_s4 = smov 96   ;;  %s6360_s6 = sld [smem:[#allocation16_spill]] }
  0x1b   : > { %v3662_v0 = vld [vmem:[%s6320_s3 + $0x38] sm:$0xff]  ;;  %v660_v2 = vld [vmem:[%s6321_s30] sm:$0xff]  ;;  %v661_v4 = vld [vmem:[%s6321_s30 + $0x8] sm:$0x1]  ;;  %s6363_s7 = sld [smem:[#allocation17_spill]]  ;;  %s6368_s23 = smov 96  }
  0x1c   : > { %v3683_v1 = vld [vmem:[%s6320_s3 + $0x118] sm:$0xff]  ;;  %855 = vperm.xlu1 %4547, %v3662_v0   ;;  %v4315_v5 = vpack.c.bf16 %v661_v4, %v660_v2  ;;  %v3663_v7 = vld [vmem:[%s6320_s3 + $0x40] sm:$0xff]  ;;  %s4841_s22 = scalar_lea.vmem %s6322_s5, %s4529_s27  ;;  %v3690_v11 = vld [vmem:[%s6320_s3 + $0x150] sm:$0xff]  ;;  %s6361_s27 = sld [smem:[#allocation15_spill]] }
  0x1d   : > { %1046 = vperm.xlu0 %4546, %v3683_v1   ;;  %v3684_v8 = vld [vmem:[%s6320_s3 + $0x120] sm:$0xff]  ;;  %v3691_v10 = vld [vmem:[%s6320_s3 + $0x158] sm:$0xff]  ;;  %v654_v13 = vld [vmem:[%s4841_s22 + $0x8] sm:$0xff] }
  0x1e   : > { %4317 = vmatpush3.bf16.msk.msra.mxu1 %vm4316_vm2, %v4315_v5  ;;  %v653_v12 = vld [vmem:[%s4841_s22] sm:$0xff]  ;;  %v3670_v14 = vld [vmem:[%s6320_s3 + $0x78] sm:$0xff]  ;;  %v3669_v15 = vld [vmem:[%s6320_s3 + $0x70] sm:$0xff]  ;;  %vm3598_vm2 = vcmask 253952  }
  0x1f   : > { %v655_v16 = vld [vmem:[%s4841_s22 + $0x10] sm:$0xff]  ;;  %v3697_v18 = vld [vmem:[%s6320_s3 + $0x188] sm:$0xff]  ;;  %v656_v19 = vld [vmem:[%s4841_s22 + $0x18] sm:$0xff] }
  0x20   : > { %859 = vperm.xlu1 %4547, %v3663_v7   ;;  %v3698_v17 = vld [vmem:[%s6320_s3 + $0x190] sm:$0xff]  ;;  %v3676_v21 = vld [vmem:[%s6320_s3 + $0xa8] sm:$0xff]  ;;  %v657_v22 = vld [vmem:[%s4841_s22 + $0x20] sm:$0xff] }
  0x21   : > { %1050 = vperm.xlu0 %4546, %v3684_v8   ;;  %4020 = vmatmul.mubr.msk.f32.vlgmr.msra.gmra.mrb[0].mxu1 %vm669_vm4, %v653_v12  ;;  %v3677_v20 = vld [vmem:[%s6320_s3 + $0xb0] sm:$0xff]  ;;  %v3664_v23 = vld [vmem:[%s6320_s3 + $0x48] sm:$0xff]  ;;  %v3671_v26 = vld [vmem:[%s6320_s3 + $0x80] sm:$0xff] }
  0x22   : > { %4022 = vmatprep.mubr.msk.f32.mxu1 %vm4683_vm3, %v6294_v9  ;;  %v3685_v24 = vld [vmem:[%s6320_s3 + $0x128] sm:$0xff]  ;;  %v3692_v27 = vld [vmem:[%s6320_s3 + $0x160] sm:$0xff]  ;;  %v659_v28 = vld [vmem:[%s4841_s22 + $0x30] sm:$0x1] }
  0x23   : > { %v658_v25 = vld [vmem:[%s4841_s22 + $0x28] sm:$0xff]  ;;  %v3678_v29 = vld [vmem:[%s6320_s3 + $0xb8] sm:$0xff]  ;;  %v3665_v31 = vld [vmem:[%s6320_s3 + $0x50] sm:$0xff] }
  0x24   : > { %1113 = vperm.xlu1 %4547, %v3691_v10   ;;  %v3699_v30 = vld [vmem:[%s6320_s3 + $0x198] sm:$0xff]  ;;  %v3686_v32 = vld [vmem:[%s6320_s3 + $0x130] sm:$0xff]  ;;  %v3672_v33 = vld [vmem:[%s6320_s3 + $0x88] sm:$0xff] }
  0x25   : > { %1109 = vperm.xlu0 %4546, %v3690_v11   ;;  %4023 = vmatmul.mubr.msk.f32.gmra.mrb[2].mxu1 %vm669_vm4, %v654_v13  ;;  %v3693_v34 = vld [vmem:[%s6320_s3 + $0x168] sm:$0xff]  ;;  %v3679_v35 = vld [vmem:[%s6320_s3 + $0xc0] sm:$0xff]  ;;  %v3666_v37 = vld [vmem:[%s6320_s3 + $0x58] sm:$0xff] }
  0x26   : > { %4025 = vmatprep.mubr.msk.f32.mxu1 %vm4683_vm3, %v6294_v9  ;;  %v3700_v36 = vld [vmem:[%s6320_s3 + $0x1a0] sm:$0xff]  ;;  %v3687_v38 = vld [vmem:[%s6320_s3 + $0x138] sm:$0xff]  ;;  %v3673_v39 = vld [vmem:[%s6320_s3 + $0x90] sm:$0xff] }
  0x27   : > { %v3694_v40 = vld [vmem:[%s6320_s3 + $0x170] sm:$0xff]  ;;  %v3680_v41 = vld [vmem:[%s6320_s3 + $0xc8] sm:$0xff]  ;;  %v3667_v43 = vld [vmem:[%s6320_s3 + $0x60] sm:$0xff] }
  0x28   : > { %922 = vperm.xlu1 %4547, %v3670_v14   ;;  %v3701_v42 = vld [vmem:[%s6320_s3 + $0x1a8] sm:$0xff]  ;;  %v3688_v44 = vld [vmem:[%s6320_s3 + $0x140] sm:$0xff]  ;;  %v3674_v45 = vld [vmem:[%s6320_s3 + $0x98] sm:$0xff] }
  0x29   : > { %918 = vperm.xlu0 %4546, %v3669_v15   ;;  %4026 = vmatmul.mubr.msk.f32.gmra.mrb[4].mxu1 %vm669_vm4, %v655_v16  ;;  %v3695_v46 = vld [vmem:[%s6320_s3 + $0x178] sm:$0xff]  ;;  %v3681_v47 = vld [vmem:[%s6320_s3 + $0xd0] sm:$0xff]  ;;  %v3668_v49 = vld [vmem:[%s6320_s3 + $0x68] sm:$0x1] }
  0x2a   : > { %4028 = vmatprep.mubr.msk.f32.mxu1 %vm4683_vm3, %v6294_v9  ;;  %v3702_v48 = vld [vmem:[%s6320_s3 + $0x1b0] sm:$0xff]  ;;  %v3689_v50 = vld [vmem:[%s6320_s3 + $0x148] sm:$0x1]  ;;  %v3675_v51 = vld [vmem:[%s6320_s3 + $0xa0] sm:$0x1] }
  0x2b   : > { %v3696_v52 = vld [vmem:[%s6320_s3 + $0x180] sm:$0x1]  ;;  %v3682_v53 = vld [vmem:[%s6320_s3 + $0xd8] sm:$0x1]  ;;  %v797_v55 = vld [vmem:[%s6320_s3 + $0x8] sm:$0xff] }
  0x2c   : > { %1177 = vperm.xlu1 %4547, %v3698_v17   ;;  %v3703_v54 = vld [vmem:[%s6320_s3 + $0x1b8] sm:$0x1]  ;;  %v796_v56 = vld [vmem:[%s6320_s3] sm:$0xff]  ;;  %v798_v58 = vld [vmem:[%s6320_s3 + $0x10] sm:$0xff] }
  0x2d   : > { %1173 = vperm.xlu0 %4546, %v3697_v18   ;;  %4029 = vmatmul.mubr.msk.f32.gmra.mrb[6].mxu1 %vm669_vm4, %v656_v19  ;;  %v3704_v57 = vld [vmem:[%s6320_s3 + $0x1c0] sm:$0xff]  ;;  %v799_v59 = vld [vmem:[%s6320_s3 + $0x18] sm:$0xff]  ;;  %v3705_v60 = vld [vmem:[%s6320_s3 + $0x1c8] sm:$0xff] }
  0x2e   : > { %4031 = vmatprep.mubr.msk.f32.mxu1 %vm4683_vm3, %v6294_v9  ;;  %v1599_v61 = vld [vmem:[%s6323_s24 + $0x100] sm:$0xff]  ;;  %v1600_v62 = vld [vmem:[%s6323_s24 + $0x108] sm:$0xff]  ;;  %v3706_v0 = vld [vmem:[%s6320_s3 + $0x1d0] sm:$0xff] }
  0x2f   : > { %v4351_v63 = vpack.c.bf16 %v1600_v62, %v1599_v61  ;;  %v800_v1 = vld [vmem:[%s6320_s3 + $0x20] sm:$0xff]  ;;  %v1601_v2 = vld [vmem:[%s6323_s24 + $0x110] sm:$0xff]  ;;  %v1602_v3 = vld [vmem:[%s6323_s24 + $0x118] sm:$0xff] }
  0x30   : > { %986 = vperm.xlu1 %4547, %v3677_v20   ;;  %v4354_v4 = vpack.c.bf16 %v1602_v3, %v1601_v2  ;;  %v801_v5 = vld [vmem:[%s6320_s3 + $0x28] sm:$0xff]  ;;  %v3707_v7 = vld [vmem:[%s6320_s3 + $0x1d8] sm:$0xff]  ;;  %v802_v8 = vld [vmem:[%s6320_s3 + $0x30] sm:$0x1] }
  0x31   : > { %982 = vperm.xlu0 %4546, %v3676_v21   ;;  %4032 = vmatmul.mubr.msk.f32.gmra.mrb[8].mxu1 %vm669_vm4, %v657_v22  ;;  %v3708_v10 = vld [vmem:[%s6320_s3 + $0x1e0] sm:$0xff]  ;;  %v3709_v11 = vld [vmem:[%s6320_s3 + $0x1e8] sm:$0xff]  ;;  %v1573_v2 = vld [vmem:[%s6323_s24 + $0x30] sm:$0xff] }
  0x32   : > { %4034 = vmatprep.mubr.msk.f32.mxu1 %vm4683_vm3, %v6294_v9  ;;  %4352 = vmatpush3.bf16.msra.mxu0 %v4351_v63  ;;  %v1574_v3 = vld [vmem:[%s6323_s24 + $0x38] sm:$0xff] }
  0x33   : > { %4353 = vmatprep.subr.bf16.mxu0 %v6292_v6 }
  0x34   : > { %863 = vperm.xlu1 %4547, %v3664_v23  }
  0x35   : > { %1054 = vperm.xlu0 %4546, %v3685_v24   ;;  %4035 = vmatmul.mubr.msk.f32.gmra.mrb[10].mxu1 %vm669_vm4, %v658_v25 }
  0x36   : > { %4037 = vmatprep.mubr.msk.f32.mxu1 %vm4683_vm3, %v6294_v9  ;;  %4355 = vmatpush3.bf16.msra.mxu0 %v4354_v4 }
  0x38   : > { %926 = vperm.xlu1 %4547, %v3671_v26  }
  0x39   : > { %1117 = vperm.xlu0 %4546, %v3692_v27   ;;  %4038 = vmatmul.mubr.msk.f32.gmra.mrb[12].mxu1 %vm669_vm4, %v659_v28 }
  0x3c   : > { %990 = vperm.xlu1 %4547, %v3678_v29  }
  0x3d   : > { %1181 = vperm.xlu0 %4546, %v3699_v30  }
  0x40   : > { %867 = vperm.xlu1 %4547, %v3665_v31  }
  0x41   : > { %1058 = vperm.xlu0 %4546, %v3686_v32  }
  0x44   : > { %930 = vperm.xlu1 %4547, %v3672_v33  }
  0x45   : > { %1121 = vperm.xlu0 %4546, %v3693_v34  }
  0x48   : > { %994 = vperm.xlu1 %4547, %v3679_v35   ;;  %v1583_v35 = vld [vmem:[%s6323_s24 + $0x80] sm:$0xff] }
  0x49   : > { %1185 = vperm.xlu0 %4546, %v3700_v36   ;;  %v1584_v36 = vld [vmem:[%s6323_s24 + $0x88] sm:$0xff] }
  0x4c   : > { %871 = vperm.xlu1 %4547, %v3666_v37   ;;  %v1567_v37 = vld [vmem:[%s6323_s24] sm:$0xff] }
  0x4d   : > { %1062 = vperm.xlu0 %4546, %v3687_v38  }
  0x50   : > { %934 = vperm.xlu1 %4547, %v3673_v39  }
  0x51   : > { %1125 = vperm.xlu0 %4546, %v3694_v40   ;;  %v4318_v40 = vpack.c.bf16 %v1584_v36, %v1583_v35  ;;  %v1594_v35 = vld [vmem:[%s6323_s24 + $0xd8] sm:$0xff] }
  0x53   : > { %4319 = vmatprep.subr.bf16.mxu1 %v4318_v40 }
  0x54   : > { %998 = vperm.xlu1 %4547, %v3680_v41   ;;  %v1568_v41 = vld [vmem:[%s6323_s24 + $0x8] sm:$0xff] }
  0x55   : > { %1189 = vperm.xlu0 %4546, %v3701_v42   ;;  %v1585_v42 = vld [vmem:[%s6323_s24 + $0x90] sm:$0xff] }
  0x58   : > { %875 = vperm.xlu1 %4547, %v3667_v43   ;;  %v1586_v43 = vld [vmem:[%s6323_s24 + $0x98] sm:$0xff] }
  0x59   : > { %1066 = vperm.xlu0 %4546, %v3688_v44  }
  0x5c   : > { %938 = vperm.xlu1 %4547, %v3674_v45   ;;  %v4320_v45 = vpack.c.bf16 %v1568_v41, %v1567_v37  ;;  %v1577_v41 = vld [vmem:[%s6323_s24 + $0x50] sm:$0xff] }
  0x5d   : > { %1129 = vperm.xlu0 %4546, %v3695_v46   ;;  %v4322_v46 = vpack.c.bf16 %v1586_v43, %v1585_v42  ;;  %v1578_v42 = vld [vmem:[%s6323_s24 + $0x58] sm:$0xff] }
  0x5e   : > { %4321 = vmatpush3.bf16.msra.mxu1 %v4320_v45  ;;  %v4340_v45 = vpack.c.bf16 %v1578_v42, %v1577_v41 }
  0x5f   : > { %4323 = vmatprep.subr.bf16.mxu1 %v4322_v46 }
  0x60   : > { %1002 = vperm.xlu1 %4547, %v3681_v47   ;;  %v1569_v47 = vld [vmem:[%s6323_s24 + $0x10] sm:$0xff] }
  0x61   : > { %1193 = vperm.xlu0 %4546, %v3702_v48   ;;  %v1570_v48 = vld [vmem:[%s6323_s24 + $0x18] sm:$0xff] }
  0x64   : > { %879 = vperm.xlu1 %4547, %v3668_v49   ;;  %v1587_v49 = vld [vmem:[%s6323_s24 + $0xa0] sm:$0xff] }
  0x65   : > { %1070 = vperm.xlu0 %4546, %v3689_v50   ;;  %v1588_v50 = vld [vmem:[%s6323_s24 + $0xa8] sm:$0xff] }
  0x68   : > { %942 = vperm.xlu1 %4547, %v3675_v51   ;;  %v4324_v51 = vpack.c.bf16 %v1570_v48, %v1569_v47 }
  0x69   : > { %1133 = vperm.xlu0 %4546, %v3696_v52  }
  0x6a   : > { %4325 = vmatpush3.bf16.msra.mxu1 %v4324_v51 }
  0x6c   : > { %1006 = vperm.xlu1 %4547, %v3682_v53   ;;  %v4326_v53 = vpack.c.bf16 %v1588_v50, %v1587_v49 }
  0x6d   : > { %1197 = vperm.xlu0 %4546, %v3703_v54   ;;  %v1571_v54 = vld [vmem:[%s6323_s24 + $0x20] sm:$0xff] }
  0x6e   : > { %4327 = vmatprep.subr.bf16.mxu1 %v4326_v53 }
  0x70   : > { %810 = vperm.xlu1 %4547, %v797_v55   ;;  %v1572_v55 = vld [vmem:[%s6323_s24 + $0x28] sm:$0xff] }
  0x71   : > { %805 = vperm.xlu0 %4546, %v796_v56   ;;  %v4328_v62 = vpack.c.bf16 %v1572_v55, %v1571_v54 }
  0x73   : > { %4329 = vmatpush3.bf16.msra.mxu1 %v4328_v62 }
  0x74   : > { %1236 = vperm.xlu1 %4547, %v3704_v57  }
  0x75   : > { %815 = vperm.xlu0 %4546, %v798_v58   ;;  %v1589_v58 = vld [vmem:[%s6323_s24 + $0xb0] sm:$0xff] }
  0x78   : > { %820 = vperm.xlu1 %4547, %v799_v59   ;;  %v1590_v59 = vld [vmem:[%s6323_s24 + $0xb8] sm:$0xff] }
  0x79   : > { %1241 = vperm.xlu0 %4546, %v3705_v60  }
  0x7c   : > { %1246 = vperm.xlu1 %4547, %v3706_v0  }
  0x7d   : > { %825 = vperm.xlu0 %4546, %v800_v1   ;;  %v4330_v1 = vpack.c.bf16 %v1590_v59, %v1589_v58 }
  0x7f   : > { %4331 = vmatprep.subr.bf16.mxu1 %v4330_v1 }
  0x80   : > { %830 = vperm.xlu1 %4547, %v801_v5   ;;  %v1591_v5 = vld [vmem:[%s6323_s24 + $0xc0] sm:$0xff] }
  0x81   : > { %1251 = vperm.xlu0 %4546, %v3707_v7   ;;  %v1592_v7 = vld [vmem:[%s6323_s24 + $0xc8] sm:$0xff] }
  0x84   : > { %835 = vperm.xlu1 %4547, %v802_v8   ;;  %v4332_v8 = vpack.c.bf16 %v1574_v3, %v1573_v2 }
  0x85   : > { %1256 = vperm.xlu0 %4546, %v3708_v10  }
  0x86   : > { %4333 = vmatpush3.bf16.msra.mxu1 %v4332_v8 }
  0x88   : > { %1261 = vperm.xlu1 %4547, %v3709_v11   ;;  %v4334_v11 = vpack.c.bf16 %v1592_v7, %v1591_v5 }
  0x8a   : > { %4335 = vmatprep.subr.bf16.mxu1 %v4334_v11 }
  0x9b   : > { %v5032_v12 = vpop.permute.xlu1 %855 }
  0x9c   : > { %v5034_v13 = vpop.permute.xlu0 %1046  ;;  %v881_v7 = vrot.slane %v5032_v12, 7 }
  0x9f   : > { %v5036_v14 = vpop.permute.xlu1 %859 }
  0xa0   : > { %v5038_v15 = vpop.permute.xlu0 %1050 }
  0xa3   : > { %v1114_v16 = vpop.permute.xlu1 %1113 }
  0xa4   : > { %v1137_v17 = vrot.slane %v1114_v16, 2  ;;  %v5040_v18 = vpop.permute.xlu0 %1109  ;;  %v1575_v16 = vld [vmem:[%s6323_s24 + $0x40] sm:$0xff] }
  0xa5   : > { %v6298_v19 = vrot.slane %v5040_v18, 2 }
  0xa7   : > { %v5046_v20 = vsel %vm1135_vm5, %v6298_v19, %v1137_v17  ;;  %v923_v21 = vpop.permute.xlu1 %922 }
  0xa8   : > { %v946_v22 = vrot.slane %v923_v21, 6  ;;  %v5048_v23 = vpop.permute.xlu0 %918 }
  0xa9   : > { %v945_v24 = vrot.slane %v5048_v23, 6 }
  0xab   : > { %v5054_v25 = vsel %vm944_vm6, %v945_v24, %v946_v22  ;;  %v5056_v26 = vpop.permute.xlu1 %1177 }
  0xac   : > { %v1200_v27 = vrot.slane %v5056_v26, 1  ;;  %v5059_v28 = vpop.permute.xlu0 %1173 }
  0xad   : > { %v6296_v29 = vrot.slane %v5059_v28, 1 }
  0xaf   : > { %v5067_v30 = vsel %vm1008_vm7, %v6296_v29, %v1200_v27  ;;  %v5069_v31 = vpop.permute.xlu1 %986 }
  0xb0   : > { %v1010_v32 = vrot.slane %v5069_v31, 1  ;;  %v5072_v33 = vpop.permute.xlu0 %982 }
  0xb1   : > { %v1009_v34 = vrot.slane %v5072_v33, 1 }
  0xb3   : > { %v5089_v38 = vsel %vm1008_vm7, %v1009_v34, %v1010_v32  ;;  %v5091_v39 = vpop.permute.xlu1 %863 }
  0xb4   : > { %v5102_v44 = vpop.permute.xlu0 %1054  ;;  %v884_v41 = vrot.slane %v5091_v39, 7 }
  0xb5   : > { %v1075_v42 = vrot.slane %v5102_v44, 7 }
  0xb7   : > { %v5116_v52 = vpop.permute.xlu1 %926 }
  0xb8   : > { %v948_v56 = vrot.slane %v5116_v52, 6  ;;  %v5125_v57 = vpop.permute.xlu0 %1117 }
  0xb9   : > { %v1139_v60 = vrot.slane %v5125_v57, 2 }
  0xba   : > { %v5137_v61 = vsel %vm944_vm6, %v946_v22, %v948_v56  ;;  %v1593_v22 = vld [vmem:[%s6323_s24 + $0xd0] sm:$0xff] }
  0xbb   : > { %v5142_v63 = vsel %vm1135_vm5, %v1137_v17, %v1139_v60  ;;  %v5144_v0 = vpop.permute.xlu1 %990  ;;  %v1576_v17 = vld [vmem:[%s6323_s24 + $0x48] sm:$0xff]  ;;  %v4338_v40 = vpack.c.bf16 %v1594_v35, %v1593_v22  ;;  %v6297_v22 = vrot.slane %v5034_v13, 7  ;;  %v1073_v35 = vrot.slane %v5038_v15, 7 }
  0xbc   : > { %v5152_v4 = vpop.permute.xlu0 %1181  ;;  %v4336_v36 = vpack.c.bf16 %v1576_v17, %v1575_v16  ;;  %v5223_v16 = vmul.f32 0.0, %v881_v7  ;;  %v882_v17 = vrot.slane %v5036_v14, 7  ;;  %v1012_v14 = vrot.slane %v5144_v0, 1 }
  0xbd   : > { %v1202_v15 = vrot.slane %v5152_v4, 1  ;;  %v5251_v39 = vsel %vm691_vm0, %v6297_v22, %v1073_v35 }
  0xbe   : > { %4337 = vmatpush3.bf16.msra.mxu1 %v4336_v36  ;;  %v5230_v36 = vmul.f32 0.0, %v945_v24 }
  0xbf   : > { %v5160_v10 = vpop.permute.xlu1 %867  ;;  %4339 = vmatprep.subr.bf16.mxu1 %v4338_v40  ;;  %v5234_v40 = vmul.f32 0.0, %v1009_v34  ;;  %v883_v34 = vsel %vm691_vm0, %v881_v7, %v882_v17  ;;  %v5267_v7 = vsel %vm1008_vm7, %v1010_v32, %v1012_v14 }
  0xc0   : > { %v5168_v21 = vpop.permute.xlu0 %1058  ;;  %v886_v23 = vrot.slane %v5160_v10, 7  ;;  %v5259_v10 = vsel %vm691_vm0, %v882_v17, %v884_v41 }
  0xc1   : > { %v1077_v24 = vrot.slane %v5168_v21, 7  ;;  %v5262_v21 = vsel %vm691_vm0, %v1073_v35, %v1075_v42 }
  0xc2   : > { %4341 = vmatpush3.bf16.msra.mxu1 %v4340_v45  ;;  %v5278_v17 = vsel %vm691_vm0, %v884_v41, %v886_v23 }
  0xc3   : > { %v5176_v37 = vpop.permute.xlu1 %930  ;;  %v5281_v35 = vsel %vm691_vm0, %v1075_v42, %v1077_v24 }
  0xc4   : > { %v5184_v43 = vpop.permute.xlu0 %1121  ;;  %v950_v6 = vrot.slane %v5176_v37, 6  ;;  %v5275_v37 = vsel %vm1008_vm7, %v1200_v27, %v1202_v15 }
  0xc5   : > { %v1141_v9 = vrot.slane %v5184_v43, 2 }
  0xc6   : > { %v5291_v26 = vsel %vm944_vm6, %v948_v56, %v950_v6 }
  0xc7   : > { %v5186_v46 = vpop.permute.xlu1 %994 }
  0xc8   : > { %v5188_v47 = vpop.permute.xlu0 %1185  ;;  %v1014_v31 = vrot.slane %v5186_v46, 1  ;;  %v5299_v46 = vsel %vm1135_vm5, %v1139_v60, %v1141_v9  ;;  %v5315_v60 = vld [vmem:[%s6329_s26] ss:$0 sm:$0xff] }
  0xc9   : > { %v1204_v32 = vrot.slane %v5188_v47, 1 }
  0xca   : > { %v5305_v56 = vsel %vm1008_vm7, %v1012_v14, %v1014_v31 }
  0xcb   : > { %v5190_v48 = vpop.permute.xlu1 %871 }
  0xcc   : > { %v5192_v49 = vpop.permute.xlu0 %1062  ;;  %v888_v0 = vrot.slane %v5190_v48, 7 }
  0xcd   : > { %v1079_v43 = vrot.slane %v5192_v49, 7 }
  0xcf   : > { %v5194_v50 = vpop.permute.xlu1 %934  ;;  %v5324_v14 = vsel %vm691_vm0, %v1077_v24, %v1079_v43 }
  0xd0   : > { %v5196_v51 = vpop.permute.xlu0 %1125  ;;  %v952_v44 = vrot.slane %v5194_v50, 6 }
  0xd1   : > { %v1143_v27 = vrot.slane %v5196_v51, 2 }
  0xd2   : > { %v5327_v29 = vsel %vm944_vm6, %v950_v6, %v952_v44 }
  0xd3   : > { %v5198_v53 = vpop.permute.xlu1 %998  ;;  %v5330_v22 = vsel %vm1135_vm5, %v1141_v9, %v1143_v27 }
  0xd4   : > { %v5200_v54 = vpop.permute.xlu0 %1189  ;;  %v1016_v41 = vrot.slane %v5198_v53, 1 }
  0xd5   : > { %v1206_v42 = vrot.slane %v5200_v54, 1  ;;  %v5318_v54 = vsel %vm1008_vm7, %v1202_v15, %v1204_v32 }
  0xd6   : > { %v5333_v19 = vsel %vm1008_vm7, %v1014_v31, %v1016_v41 }
  0xd7   : > { %v5202_v55 = vpop.permute.xlu1 %875  ;;  %v5336_v53 = vsel %vm1008_vm7, %v1204_v32, %v1206_v42 }
  0xd8   : > { %v5204_v58 = vpop.permute.xlu0 %1066  ;;  %v890_v47 = vrot.slane %v5202_v55, 7  ;;  %v5321_v55 = vsel %vm691_vm0, %v886_v23, %v888_v0 }
  0xd9   : > { %v6299_v48 = vrot.slane %v5204_v58, 7 }
  0xda   : > { %v5340_v23 = vsel %vm691_vm0, %v888_v0, %v890_v47 }
  0xdb   : > { %v5206_v59 = vpop.permute.xlu1 %938  ;;  %v5345_v6 = vsel %vm691_vm0, %v1079_v43, %v6299_v48 }
  0xdc   : > { %v5208_v62 = vpop.permute.xlu0 %1129  ;;  %v6300_v52 = vrot.slane %v5206_v59, 6 }
  0xdd   : > { %v6301_v50 = vrot.slane %v5208_v62, 2 }
  0xde   : > { %v5350_v9 = vsel %vm944_vm6, %v952_v44, %v6300_v52 }
  0xdf   : > { %v5210_v1 = vpop.permute.xlu1 %1002 }
  0xe0   : > { %6324 = vst [vmem:[#allocation2_spill] sm:$0xff] %v5210_v1  ;;  %v5212_v2 = vpop.permute.xlu0 %1193  ;;  %v6330_v0 = vrot.slane %v5210_v1, 1 }
  0xe1   : > { %6325 = vst [vmem:[#allocation3_spill] sm:$0xff] %v5212_v2  ;;  %v6331_v43 = vrot.slane %v5212_v2, 1 }
  0xe2   : > { %v5363_v32 = vsel %vm1008_vm7, %v1016_v41, %v6330_v0  ;;  %v6334_v0 = vrot.slane %v5034_v13, 7 }
  0xe3   : > { %v5214_v3 = vpop.permute.xlu1 %879  ;;  %v5368_v48 = vsel %vm1008_vm7, %v1206_v42, %v6331_v43  ;;  %v1595_v42 = vld [vmem:[%s6323_s24 + $0xe0] sm:$0xff]  ;;  %v1596_v43 = vld [vmem:[%s6323_s24 + $0xe8] sm:$0xff] }
  0xe4   : > { %v5216_v5 = vpop.permute.xlu0 %1070  ;;  %v892_v15 = vrot.slane %v5214_v3, 7  ;;  %v5358_v3 = vsel %vm1135_vm5, %v1143_v27, %v6301_v50  ;;  %v6333_v27 = vrot.slane %v5040_v18, 2 }
  0xe6   : > { %v5394_v18 = vsel %vm691_vm0, %v890_v47, %v892_v15 }
  0xe7   : > { %v5219_v8 = vpop.permute.xlu1 %942  ;;  %6335 = vst [vmem:[#allocation8_spill] sm:$0xff] %v5394_v18 }
  0xe8   : > { %v5221_v11 = vpop.permute.xlu0 %1133 }
  0xeb   : > { %v5236_v12 = vpop.permute.xlu1 %1006 }
  0xec   : > { %v5241_v45 = vpop.permute.xlu0 %1197 }
  0xef   : > { %v5256_v4 = vpop.permute.xlu1 %810 }
  0xf0   : > { %6326 = vst [vmem:[#allocation4_spill] sm:$0xff] %v5256_v4  ;;  %v5270_v33 = vpop.permute.xlu0 %805 }
  0xf1   : > { %6327 = vst [vmem:[#allocation5_spill] sm:$0xff] %v5270_v33 }
  0xf3   : > { %v1237_v49 = vpop.permute.xlu1 %1236 }
  0xf4   : > { %v5310_v57 = vpop.permute.xlu0 %815  ;;  %v761_v51 = vpop.f32.mrb[0].mxu1 }
  0xf5   : > { %6328 = vst [vmem:[#allocation6_spill] sm:$0xff] %v5310_v57  ;;  %v5353_v24 = vadd.f32 %v5315_v60, %v761_v51  ;;  %v4021_v31 = vpop.f32.mrb[1].mxu1  ;;  %v1580_v57 = vld [vmem:[%s6323_s24 + $0x68] sm:$0xff] }
  0xf7   : > { %v5371_v51 = vpop.permute.xlu1 %820  ;;  %v5375_v31 = vmul.f32 %v5054_v25, %v5353_v24  ;;  %v1156_v52 = vmul.f32 %v6333_v27, %v5353_v24  ;;  %v902_v41 = vmul.f32 %v883_v34, %v5353_v24  ;;  %v1092_v50 = vmul.f32 %v6334_v0, %v5353_v24  ;;  %v1579_v25 = vld [vmem:[%s6323_s24 + $0x60] sm:$0xff] }
  0xf8   : > { %6332 = vst [vmem:[#allocation7_spill] sm:$0xff] %v5371_v51  ;;  %v1242_v34 = vpop.permute.xlu0 %1241  ;;  %v766_v27 = vpop.f32.mrb[2].mxu1  ;;  %v5398_v13 = vmul.f32 %v5089_v38, %v5353_v24  ;;  %v6336_v0 = vrot.slane %v5059_v28, 1  ;;  %v4342_v51 = vpack.c.bf16 %v1596_v43, %v1595_v42  ;;  %v4344_v28 = vpack.c.bf16 %v1580_v57, %v1579_v25 }
  0xf9   : > { %v5407_v4 = vadd.f32 %v5315_v60, %v766_v27  ;;  %v4024_v47 = vpop.f32.mrb[3].mxu1  ;;  %v6305_v15 = vrot.slane %v5375_v31, 2  ;;  %v1447_v33 = vrot.slane %v1156_v52, 6  ;;  %v1284_v1 = vrot.slane %v902_v41, 1 }
  0xfa   : > { %v1219_v44 = vmul.f32 %v6336_v0, %v5353_v24  ;;  %v1406_v2 = vrot.slane %v1092_v50, 1  ;;  %v6304_v38 = vrot.slane %v5398_v13, 7  ;;  %4343 = vmatprep.subr.bf16.mxu1 %v4342_v51  ;;  %v6337_v27 = vrot.slane %v5230_v36, 2  ;;  %v1597_v50 = vld [vmem:[%s6323_s24 + $0xf0] sm:$0xff] }
  0xfb   : > { %v1269_v42 = vmul.f32 %v1237_v49, %v5407_v4  ;;  %v5414_v43 = vmul.f32 %v5046_v20, %v5407_v4  ;;  %v1093_v52 = vmul.f32 %v5251_v39, %v5407_v4  ;;  %v1598_v49 = vld [vmem:[%s6323_s24 + $0xf8] sm:$0xff]  ;;  %v6338_v20 = vrot.slane %v5223_v16, 1  ;;  %4345 = vmatpush3.bf16.msra.mxu1 %v4344_v28  ;;  %v1247_v25 = vpop.permute.xlu1 %1246 }
  0xfc   : > { %v1488_v18 = vrot.slane %v1219_v44, 7  ;;  %v1326_v0 = vsel %vm1135_vm5, %v6337_v27, %v6305_v15  ;;  %v771_v57 = vpop.f32.mrb[4].mxu1  ;;  %v5434_v36 = vmul.f32 %v5067_v30, %v5407_v4  ;;  %v6339_v39 = vrot.slane %v5234_v40, 7 }
  0xfd   : > { %v1285_v44 = vsel %vm1008_vm7, %v6338_v20, %v1284_v1  ;;  %v5443_v41 = vmul.f32 %v5259_v10, %v5407_v4  ;;  %v5446_v16 = vadd.f32 %v5315_v60, %v771_v57  ;;  %v4027_v47 = vpop.f32.mrb[5].mxu1  ;;  %4049 = vmatmul.mubr.msk.f32.vlgmr.msra.gmra.mrb[0].mxu0 %vm1522_vm8, %v1269_v42  ;;  %v1448_v30 = vrot.slane %v5414_v43, 6  ;;  %v5452_v20 = vpop.permute.xlu0 %825 }
  0xfe   : > { %v1367_v51 = vsel %vm691_vm0, %v6339_v39, %v6304_v38  ;;  %v1407_v27 = vrot.slane %v1093_v52, 1  ;;  %v967_v40 = vmul.f32 %v5137_v61, %v5407_v4  ;;  %6340 = vst [vmem:[#allocation9_spill] sm:$0xff] %v5452_v20  ;;  %v6341_v39 = vmov 0.0  }
  0xff   : > { %4051 = vmatprep.mubr.msk.f32.mxu0 %vm4683_vm3, %v6341_v39  ;;  %v1489_v10 = vrot.slane %v5434_v36, 7  ;;  %v5460_v57 = vmul.f32 %v5267_v7, %v5407_v4  ;;  %v4346_v42 = vpack.c.bf16 %v1598_v49, %v1597_v50  ;;  %v1270_v43 = vmul.f32 %v1242_v34, %v5446_v16  ;;  %v5491_v49 = vpop.permute.xlu1 %830 }
 0x100   : > { %v1449_v52 = vsel %vm944_vm6, %v1447_v33, %v1448_v30  ;;  %v1408_v61 = vsel %vm1008_vm7, %v1406_v2, %v1407_v27  ;;  %v5467_v47 = vmul.f32 %v5262_v21, %v5446_v16  ;;  %v776_v38 = vpop.f32.mrb[6].mxu1  ;;  %v6342_v20 = vrot.slane %v5443_v41, 1 }
 0x101   : > { %v4553_v15 = vpack.i.bf16 %v1326_v0, %v1449_v52  ;;  %v4548_v36 = vpack.i.bf16 %v1285_v44, %v1408_v61  ;;  %v1490_v28 = vsel %vm691_vm0, %v1488_v18, %v1489_v10  ;;  %4347 = vmatprep.subr.bf16.mxu1 %v4346_v42  ;;  %v5474_v34 = vadd.f32 %v5315_v60, %v776_v38  ;;  %v4030_v2 = vpop.f32.mrb[7].mxu1 }
 0x102   : > { %v1287_v7 = vsel %vm1008_vm7, %v1284_v1, %v6342_v20  ;;  %4052 = vmatmul.mubr.msk.f32.gmra.mrb[2].mxu0 %vm1522_vm8, %v1270_v43  ;;  %v4558_v33 = vpack.i.bf16 %v1367_v51, %v1490_v28  ;;  %v1409_v21 = vrot.slane %v5467_v47, 1  ;;  %v1158_v0 = vmul.f32 %v5142_v63, %v5446_v16  ;;  %v1252_v51 = vpop.permute.xlu0 %1251 }
 0x103   : > { %4554 = vrot.lane.b32.xlu1 %v4553_v15, %s6307_s29  ;;  %4549 = vrot.lane.b32.xlu0 %v4548_v36, %s6309_s0  ;;  %v1327_v1 = vrot.slane %v967_v40, 2  ;;  %v5484_v18 = vmul.f32 %v5275_v37, %v5446_v16  ;;  %v1368_v38 = vrot.slane %v5460_v57, 7  ;;  %v5489_v50 = vmul.f32 %v5291_v26, %v5446_v16 }
 0x104   : > { %4054 = vmatprep.mubr.msk.f32.mxu0 %vm4683_vm3, %v6341_v39  ;;  %v1271_v63 = vmul.f32 %v1247_v25, %v5474_v34  ;;  %v1410_v15 = vsel %vm1008_vm7, %v1407_v27, %v1409_v21  ;;  %v1450_v44 = vrot.slane %v1158_v0, 6  ;;  %v5501_v37 = vmul.f32 %v5299_v46, %v5474_v34  ;;  %v781_v40 = vpop.f32.mrb[8].mxu1 }
 0x105   : > { %v4563_v26 = vpack.i.bf16 %v1287_v7, %v1410_v15  ;;  %v6343_v20 = vrot.slane %v5375_v31, 2  ;;  %v6344_v25 = vrot.slane %v5398_v13, 7  ;;  %v1491_v27 = vrot.slane %v5484_v18, 7  ;;  %v4033_v46 = vpop.f32.mrb[9].mxu1 }
 0x106   : > { %v5513_v43 = vadd.f32 %v5315_v60, %v781_v40  ;;  %4055 = vmatmul.mubr.msk.f32.gmra.mrb[4].mxu0 %vm1522_vm8, %v1271_v63  ;;  %v1451_v52 = vsel %vm944_vm6, %v1448_v30, %v1450_v44  ;;  %v1329_v31 = vrot.slane %v5489_v50, 2  ;;  %v1452_v61 = vrot.slane %v5501_v37, 6 }
 0x107   : > { %v1328_v28 = vsel %vm1135_vm5, %v6343_v20, %v1327_v1  ;;  %v1369_v42 = vsel %vm691_vm0, %v6344_v25, %v1368_v38  ;;  %v956_v36 = vrot.slane %v5219_v8, 6  ;;  %4559 = vrot.lane.b32.xlu0 %v4558_v33, %s6306_s4  ;;  %4564 = vrot.lane.b32.xlu1 %v4563_v26, %s6309_s0  ;;  %v1492_v7 = vsel %vm691_vm0, %v1489_v10, %v1491_v27  ;;  %v5538_v26 = vpop.permute.xlu1 %835 }
 0x108   : > { %v4568_v13 = vpack.i.bf16 %v1328_v28, %v1451_v52  ;;  %v904_v2 = vmul.f32 %v5278_v17, %v5446_v16  ;;  %4057 = vmatprep.mubr.msk.f32.mxu0 %vm4683_vm3, %v6341_v39  ;;  %v1272_v30 = vmul.f32 %v1252_v51, %v5513_v43  ;;  %v4573_v0 = vpack.i.bf16 %v1369_v42, %v1492_v7  ;;  %v786_v63 = vpop.f32.mrb[10].mxu1  ;;  %v1257_v28 = vpop.permute.xlu0 %1256 }
 0x109   : > { %v1330_v18 = vsel %vm1135_vm5, %v1327_v1, %v1329_v31  ;;  %v1453_v33 = vsel %vm944_vm6, %v1450_v44, %v1452_v61  ;;  %v1095_v10 = vmul.f32 %v5281_v35, %v5474_v34  ;;  %v1032_v40 = vmul.f32 %v5305_v56, %v5446_v16  ;;  %v4036_v1 = vpop.f32.mrb[11].mxu1 }
 0x10a   : > { %v4583_v15 = vpack.i.bf16 %v1330_v18, %v1453_v33  ;;  %v1288_v17 = vrot.slane %v904_v2, 1  ;;  %v5541_v51 = vadd.f32 %v5315_v60, %v786_v63  ;;  %4058 = vmatmul.mubr.msk.f32.gmra.mrb[6].mxu0 %vm1522_vm8, %v1272_v30  ;;  %v1222_v44 = vmul.f32 %v5318_v54, %v5474_v34 }
 0x10b   : > { %v5548_v20 = vmul.f32 %v5321_v55, %v5474_v34  ;;  %v5552_v35 = vmul.f32 %v5324_v14, %v5513_v43  ;;  %v1147_v56 = vrot.slane %v5221_v11, 2  ;;  %4569 = vrot.lane.b32.xlu0 %v4568_v13, %s6307_s29  ;;  %4574 = vrot.lane.b32.xlu1 %v4573_v0, %s6306_s4  ;;  %v1411_v25 = vrot.slane %v1095_v10, 1  ;;  %v1262_v63 = vpop.permute.xlu1 %1261 }
 0x10c   : > { %v1370_v42 = vrot.slane %v1032_v40, 7  ;;  %v5559_v54 = vmul.f32 %v5327_v29, %v5474_v34  ;;  %4060 = vmatprep.mubr.msk.f32.mxu0 %vm4683_vm3, %v6341_v39  ;;  %v1273_v55 = vmul.f32 %v1257_v28, %v5541_v51  ;;  %v1493_v14 = vrot.slane %v1222_v44, 7  ;;  %v791_v52 = vpop.f32.mrb[12].mxu1 }
 0x10d   : > { %v1290_v46 = vrot.slane %v5548_v20, 1  ;;  %v1413_v11 = vrot.slane %v5552_v35, 1  ;;  %v6345_v13 = vrot.slane %v5443_v41, 1  ;;  %v1412_v29 = vsel %vm1008_vm7, %v1409_v21, %v1411_v25  ;;  %v4039_v47 = vpop.f32.mrb[13].mxu1  ;;  %v1581_v20 = vld [vmem:[%s6323_s24 + $0x70] sm:$0xff]  ;;  %v1582_v35 = vld [vmem:[%s6323_s24 + $0x78] sm:$0xff] }
 0x10e   : > { %v1160_v2 = vmul.f32 %v5330_v22, %v5513_v43  ;;  %v1331_v30 = vrot.slane %v5559_v54, 2  ;;  %v5576_v0 = vadd.f32 %v5315_v60, %v791_v52  ;;  %4061 = vmatmul.mubr.msk.f32.gmra.mrb[8].mxu0 %vm1522_vm8, %v1273_v55  ;;  %v1371_v41 = vsel %vm691_vm0, %v1368_v38, %v1370_v42  ;;  %v6350_v47 = vld [vmem:[#allocation8_spill] sm:$0xff] }
 0x10f   : > { %v1289_v7 = vsel %vm1008_vm7, %v6345_v13, %v1288_v17  ;;  %v1494_v33 = vsel %vm691_vm0, %v1491_v27, %v1493_v14  ;;  %4584 = vrot.lane.b32.xlu1 %v4583_v15, %s6307_s29  ;;  %4063 = vmatprep.mubr.msk.f32.mxu0 %vm4683_vm3, %v6341_v39  ;;  %v1291_v60 = vsel %vm1008_vm7, %v1288_v17, %v1290_v46  ;;  %v6346_v17 = vrot.slane %v5216_v5, 7 }
 0x110   : > { %v4578_v18 = vpack.i.bf16 %v1289_v7, %v1412_v29  ;;  %v4588_v22 = vpack.i.bf16 %v1371_v41, %v1494_v33  ;;  %v1414_v21 = vsel %vm1008_vm7, %v1411_v25, %v1413_v11  ;;  %v1454_v57 = vrot.slane %v1160_v2, 6 }
 0x111   : > { %v795_v38 = vsel %vm691_vm0, %v5576_v0, 0.0  ;;  %v4593_v27 = vpack.i.bf16 %v1291_v60, %v1414_v21  ;;  %v1033_v15 = vmul.f32 %v5333_v19, %v5474_v34  ;;  %v1223_v10 = vmul.f32 %v5336_v53, %v5513_v43  ;;  %v6351_v60 = vld [vmem:[#allocation3_spill] sm:$0xff] }
 0x112   : > { %4579 = vrot.lane.b32.xlu0 %v4578_v18, %s6309_s0  ;;  %v6347_v40 = vrot.slane %v5204_v58, 7  ;;  %v6348_v44 = vrot.slane %v5208_v62, 2  ;;  %v1274_v25 = vmul.f32 %v1262_v63, %v795_v38  ;;  %v1332_v54 = vsel %vm1135_vm5, %v1329_v31, %v1331_v30 }
 0x113   : > { %v1455_v19 = vsel %vm944_vm6, %v1452_v61, %v1454_v57  ;;  %v1372_v53 = vrot.slane %v1033_v15, 7  ;;  %v1495_v55 = vrot.slane %v1223_v10, 7  ;;  %v970_v58 = vmul.f32 %v5350_v9, %v5513_v43  ;;  %4594 = vrot.lane.b32.xlu1 %v4593_v27, %s6309_s0  ;;  %v6353_v10 = vld [vmem:[#allocation2_spill] sm:$0xff] }
 0x114   : > { %v1084_v1 = vsel %vm691_vm0, %v6347_v40, %v6346_v17  ;;  %v1148_v28 = vsel %vm1135_vm5, %v6348_v44, %v1147_v56  ;;  %v6349_v62 = vrot.slane %v5206_v59, 6  ;;  %v1020_v56 = vrot.slane %v5236_v12, 1  ;;  %4064 = vmatmul.mubr.msk.f32.gmra.mrb[10].mxu0 %vm1522_vm8, %v1274_v25 }
 0x115   : > { %v5621_v50 = vmul.f32 %v1148_v28, %v795_v38  ;;  %v4598_v37 = vpack.i.bf16 %v1332_v54, %v1455_v19  ;;  %v1373_v31 = vsel %vm691_vm0, %v1370_v42, %v1372_v53  ;;  %v1496_v9 = vsel %vm691_vm0, %v1493_v14, %v1495_v55  ;;  %4066 = vmatprep.mubr.msk.f32.mxu0 %vm4683_vm3, %v6341_v39 }
 0x116   : > { %v957_v5 = vsel %vm944_vm6, %v6349_v62, %v956_v36  ;;  %4589 = vrot.lane.b32.xlu0 %v4588_v22, %s6306_s4  ;;  %v1161_v59 = vmul.f32 %v5358_v3, %v5541_v51  ;;  %v1333_v8 = vrot.slane %v970_v58, 2  ;;  %v4603_v12 = vpack.i.bf16 %v1373_v31, %v1496_v9 }
 0x117   : > { %v906_v61 = vmul.f32 %v5340_v23, %v5513_v43  ;;  %v1097_v36 = vmul.f32 %v5345_v6, %v5541_v51  ;;  %v1034_v52 = vmul.f32 %v5363_v32, %v5513_v43  ;;  %v1210_v42 = vrot.slane %v5241_v45, 1 }
 0x118   : > { %v1456_v14 = vrot.slane %v1161_v59, 6  ;;  %v1224_v3 = vmul.f32 %v5368_v48, %v5541_v51  ;;  %v971_v13 = vmul.f32 %v957_v5, %v5541_v51  ;;  %v1098_v7 = vmul.f32 %v1084_v1, %v795_v38  ;;  %4604 = vrot.lane.b32.xlu1 %v4603_v12, %s6306_s4 }
 0x119   : > { %v1458_v29 = vrot.slane %v5621_v50, 6  ;;  %v1292_v23 = vrot.slane %v906_v61, 1  ;;  %v1415_v2 = vrot.slane %v1097_v36, 1  ;;  %v1334_v6 = vsel %vm1135_vm5, %v1331_v30, %v1333_v8  ;;  %v6355_v36 = vld [vmem:[#allocation5_spill] sm:$0xff] }
 0x11a   : > { %4599 = vrot.lane.b32.xlu0 %v4598_v37, %s6307_s29  ;;  %v1457_v32 = vsel %vm944_vm6, %v1454_v57, %v1456_v14  ;;  %v1374_v45 = vrot.slane %v1034_v52, 7  ;;  %v1497_v18 = vrot.slane %v1224_v3, 7  ;;  %v1335_v33 = vrot.slane %v971_v13, 2 }
 0x11b   : > { %v1293_v48 = vsel %vm1008_vm7, %v1290_v46, %v1292_v23  ;;  %v1416_v41 = vsel %vm1008_vm7, %v1413_v11, %v1415_v2  ;;  %v907_v22 = vmul.f32 %v6350_v47, %v5541_v51  ;;  %v6352_v21 = vrot.slane %v6351_v60, 1 }
 0x11c   : > { %v4613_v63 = vpack.i.bf16 %v1334_v6, %v1457_v32  ;;  %v4608_v57 = vpack.i.bf16 %v1293_v48, %v1416_v41  ;;  %v1417_v11 = vrot.slane %v1098_v7, 1  ;;  %v1498_v27 = vsel %vm691_vm0, %v1495_v55, %v1497_v18 }
 0x11d   : > { %v1211_v30 = vsel %vm1008_vm7, %v6352_v21, %v1210_v42  ;;  %v1459_v15 = vsel %vm944_vm6, %v1456_v14, %v1458_v29  ;;  %v6354_v17 = vrot.slane %v6353_v10, 1  ;;  %v1375_v1 = vsel %vm691_vm0, %v1372_v53, %v1374_v45  ;;  %v3710_v53 = vld [vmem:[%s6320_s3 + $0x1f0] sm:$0x1] }
 0x11e   : > { %v1225_v46 = vmul.f32 %v1211_v30, %v795_v38  ;;  %4614 = vrot.lane.b32.xlu0 %v4613_v63, %s6307_s29  ;;  %4609 = vrot.lane.b32.xlu1 %v4608_v57, %s6309_s0  ;;  %v1336_v44 = vsel %vm1135_vm5, %v1333_v8, %v1335_v33  ;;  %v1294_v28 = vrot.slane %v907_v22, 1  ;;  %v4348_v25 = vpack.c.bf16 %v1582_v35, %v1581_v20  ;;  %v6356_v21 = vld [vmem:[#allocation4_spill] sm:$0xff] }
 0x11f   : > { %v1021_v40 = vsel %vm1008_vm7, %v6354_v17, %v1020_v56  ;;  %v4618_v54 = vpack.i.bf16 %v1375_v1, %v1498_v27  ;;  %v4628_v19 = vpack.i.bf16 %v1336_v44, %v1459_v15  ;;  %v1418_v58 = vsel %vm1008_vm7, %v1415_v2, %v1417_v11 }
 0x120   : > { %v1035_v38 = vmul.f32 %v1021_v40, %v5541_v51  ;;  %v1499_v55 = vrot.slane %v1225_v46, 7  ;;  %4349 = vmatpush3.bf16.msra.mxu1 %v4348_v25  ;;  %v1295_v62 = vsel %vm1008_vm7, %v1292_v23, %v1294_v28  ;;  %v4643_v31 = vpack.i.bf16 %v1335_v33, %v1458_v29 }
 0x121   : > { %v4623_v56 = vpack.i.bf16 %v1295_v62, %v1418_v58  ;;  %v4638_v59 = vpack.i.bf16 %v1294_v28, %v1417_v11  ;;  %v838_v52 = vmul.f32 0.0, %v6355_v36  ;;  %v839_v30 = vmul.f32 %v6356_v21, %v5353_v24  ;;  %v6357_v28 = vld [vmem:[#allocation6_spill] sm:$0xff]  ;;  %v6358_v36 = vld [vmem:[#allocation7_spill] sm:$0xff] }
 0x122   : > { %4619 = vrot.lane.b32.xlu0 %v4618_v54, %s6306_s4  ;;  %4629 = vrot.lane.b32.xlu1 %v4628_v19, %s6307_s29  ;;  %v1376_v5 = vrot.slane %v1035_v38, 7  ;;  %v1500_v50 = vsel %vm691_vm0, %v1497_v18, %v1499_v55  ;;  %v840_v38 = vmul.f32 %v6357_v28, %v5407_v4 }
 0x124   : > { %v1377_v37 = vsel %vm691_vm0, %v1374_v45, %v1376_v5  ;;  %v4648_v8 = vpack.i.bf16 %v1376_v5, %v1499_v55 }
 0x125   : > { %v4633_v9 = vpack.i.bf16 %v1377_v37, %v1500_v50 }
 0x126   : > { %1266 = vperm.xlu1 %4547, %v3710_v53   ;;  %4624 = vrot.lane.b32.xlu0 %v4623_v56, %s6309_s0 }
 0x12a   : > { %4644 = vrot.lane.b32.xlu1 %v4643_v31, %s6307_s29  ;;  %4634 = vrot.lane.b32.xlu0 %v4633_v9, %s6306_s4  ;;  %s6364_s29 = smov 32  }
 0x12e   : > { %4639 = vrot.lane.b32.xlu0 %v4638_v59, %s6309_s0  ;;  %s6365_s0 = smov 64  }
 0x132   : > { %4649 = vrot.lane.b32.xlu0 %v4648_v8, %s6306_s4 }
 0x175   : > { %v4555_v12 = vpop.permute.xlu1 %4554  ;;  %v4550_v61 = vpop.permute.xlu0 %4549 }
 0x176   : > { %v4552_v42 = vunpack.i.h.bf16 %v4550_v61  ;;  %v4551_v14 = vunpack.i.l.bf16 %v4550_v61  ;;  %v4557_v3 = vunpack.i.h.bf16 %v4555_v12  ;;  %v4556_v13 = vunpack.i.l.bf16 %v4555_v12 }
 0x178   : > { %v1523_v7 = vsel %vm1522_vm8, %v838_v52, %v4552_v42  ;;  %v1546_v29 = vsel %vm1522_vm8, %v5353_v24, %v4551_v14  ;;  %v841_v52 = vmul.f32 %v6358_v36, %v5446_v16 }
 0x179   : > { %v4560_v23 = vpop.permute.xlu0 %4559  ;;  %v4565_v2 = vpop.permute.xlu1 %4564  ;;  %v1553_v48 = vsel %vm1530_vm9, %v1546_v29, %v4556_v13  ;;  %v1531_v41 = vsel %vm1530_vm9, %v1523_v7, %v4557_v3 }
 0x17a   : > { %v4562_v6 = vunpack.i.h.bf16 %v4560_v23  ;;  %v4561_v32 = vunpack.i.l.bf16 %v4560_v23  ;;  %v4567_v45 = vunpack.i.h.bf16 %v4565_v2  ;;  %v4566_v18 = vunpack.i.l.bf16 %v4565_v2 }
 0x17c   : > { %v1560_v33 = vsel %vm1538_vm10, %v1553_v48, %v4561_v32  ;;  %v1539_v47 = vsel %vm1538_vm10, %v1531_v41, %v4562_v6  ;;  %v1547_v46 = vsel %vm1522_vm8, %v5407_v4, %v4566_v18  ;;  %v1524_v11 = vsel %vm1522_vm8, %v839_v30, %v4567_v45  ;;  %v6359_v18 = vld [vmem:[#allocation9_spill] sm:$0xff] }
 0x17d   : > { %1695 = vmatprep.mubr.f32.mxu1 %v1560_v33  ;;  %v4570_v22 = vpop.permute.xlu0 %4569  ;;  %v4575_v60 = vpop.permute.xlu1 %4574  ;;  %v842_v48 = vmul.f32 %v6359_v18, %v5474_v34 }
 0x17e   : > { %v4572_v63 = vunpack.i.h.bf16 %v4570_v22  ;;  %v4571_v57 = vunpack.i.l.bf16 %v4570_v22  ;;  %v4577_v20 = vunpack.i.h.bf16 %v4575_v60  ;;  %v4576_v35 = vunpack.i.l.bf16 %v4575_v60  ;;  %1696 = vmatmul.mubr.f32.vlgmr.msra.gmra.mrb[14].mxu1 %v1539_v47 }
 0x180   : > { %v1554_v27 = vsel %vm1530_vm9, %v1547_v46, %v4571_v57  ;;  %v1532_v15 = vsel %vm1530_vm9, %v1524_v11, %v4572_v63 }
 0x181   : > { %v4585_v10 = vpop.permute.xlu1 %4584  ;;  %v1561_v17 = vsel %vm1538_vm10, %v1554_v27, %v4576_v35  ;;  %v1540_v40 = vsel %vm1538_vm10, %v1532_v15, %v4577_v20  ;;  %v843_v15 = vmul.f32 %v5491_v49, %v5513_v43 }
 0x182   : > { %1700 = vmatprep.mubr.f32.mxu1 %v1561_v17  ;;  %v4587_v25 = vunpack.i.h.bf16 %v4585_v10  ;;  %v4586_v54 = vunpack.i.l.bf16 %v4585_v10 }
 0x183   : > { %1701 = vmatmul.mubr.f32.gmra.mrb[16].mxu1 %v1540_v40 }
 0x184   : > { %v4580_v24 = vpop.permute.xlu0 %4579 }
 0x185   : > { %v4582_v1 = vunpack.i.h.bf16 %v4580_v24  ;;  %v4581_v44 = vunpack.i.l.bf16 %v4580_v24  ;;  %v4595_v19 = vpop.permute.xlu1 %4594 }
 0x186   : > { %v4597_v56 = vunpack.i.h.bf16 %v4595_v19  ;;  %v4596_v50 = vunpack.i.l.bf16 %v4595_v19 }
 0x187   : > { %v1548_v55 = vsel %vm1522_vm8, %v5446_v16, %v4581_v44  ;;  %v1525_v58 = vsel %vm1522_vm8, %v840_v38, %v4582_v1 }
 0x188   : > { %v4590_v53 = vpop.permute.xlu0 %4589  ;;  %v1555_v37 = vsel %vm1530_vm9, %v1548_v55, %v4586_v54  ;;  %v1533_v31 = vsel %vm1530_vm9, %v1525_v58, %v4587_v25  ;;  %v1549_v3 = vsel %vm1522_vm8, %v5474_v34, %v4596_v50  ;;  %v1526_v13 = vsel %vm1522_vm8, %v841_v52, %v4597_v56 }
 0x189   : > { %v4592_v62 = vunpack.i.h.bf16 %v4590_v53  ;;  %v4591_v5 = vunpack.i.l.bf16 %v4590_v53  ;;  %v844_v56 = vmul.f32 %v5538_v26, %v5541_v51 }
 0x18a   : > { %v4605_v4 = vpop.permute.xlu1 %4604 }
 0x18b   : > { %v1562_v9 = vsel %vm1538_vm10, %v1555_v37, %v4591_v5  ;;  %v1541_v59 = vsel %vm1538_vm10, %v1533_v31, %v4592_v62  ;;  %v4607_v12 = vunpack.i.h.bf16 %v4605_v4  ;;  %v4606_v61 = vunpack.i.l.bf16 %v4605_v4 }
 0x18c   : > { %1705 = vmatprep.mubr.f32.mxu1 %v1562_v9  ;;  %v4600_v8 = vpop.permute.xlu0 %4599 }
 0x18d   : > { %v4602_v42 = vunpack.i.h.bf16 %v4600_v8  ;;  %v4601_v14 = vunpack.i.l.bf16 %v4600_v8  ;;  %1706 = vmatmul.mubr.f32.gmra.mrb[18].mxu1 %v1541_v59 }
 0x18f   : > { %v1556_v7 = vsel %vm1530_vm9, %v1549_v3, %v4601_v14  ;;  %v1534_v29 = vsel %vm1530_vm9, %v1526_v13, %v4602_v42 }
 0x190   : > { %v4615_v23 = vpop.permute.xlu0 %4614  ;;  %v4610_v2 = vpop.permute.xlu1 %4609  ;;  %v1563_v6 = vsel %vm1538_vm10, %v1556_v7, %v4606_v61  ;;  %v1542_v32 = vsel %vm1538_vm10, %v1534_v29, %v4607_v12 }
 0x191   : > { %v4612_v45 = vunpack.i.h.bf16 %v4610_v2  ;;  %v4611_v16 = vunpack.i.l.bf16 %v4610_v2  ;;  %1710 = vmatprep.mubr.f32.mxu1 %v1563_v6  ;;  %v4617_v41 = vunpack.i.h.bf16 %v4615_v23  ;;  %v4616_v33 = vunpack.i.l.bf16 %v4615_v23  ;;  %v3724_v6 = vld [vmem:[%s6360_s6 + $0x20] sm:$0xff] }
 0x192   : > { %1711 = vmatmul.mubr.f32.gmra.mrb[20].mxu1 %v1542_v32  ;;  %v1831_v32 = vld [vmem:[%s6360_s6] sm:$0xff] }
 0x193   : > { %v1550_v47 = vsel %vm1522_vm8, %v5513_v43, %v4611_v16  ;;  %v1527_v22 = vsel %vm1522_vm8, %v842_v48, %v4612_v45  ;;  %v3711_v16 = vld [vmem:[%s6361_s27] ss:$0 sm:$0xff] }
 0x194   : > { %v4620_v60 = vpop.permute.xlu0 %4619  ;;  %v1557_v63 = vsel %vm1530_vm9, %v1550_v47, %v4616_v33  ;;  %v1535_v57 = vsel %vm1530_vm9, %v1527_v22, %v4617_v41  ;;  %v4630_v46 = vpop.permute.xlu1 %4629 }
 0x195   : > { %v4622_v21 = vunpack.i.h.bf16 %v4620_v60  ;;  %v4621_v30 = vunpack.i.l.bf16 %v4620_v60  ;;  %v4632_v40 = vunpack.i.h.bf16 %v4630_v46  ;;  %v4631_v24 = vunpack.i.l.bf16 %v4630_v46 }
 0x197   : > { %v1564_v20 = vsel %vm1538_vm10, %v1557_v63, %v4621_v30  ;;  %v1543_v35 = vsel %vm1538_vm10, %v1535_v57, %v4622_v21 }
 0x198   : > { %1715 = vmatprep.mubr.f32.mxu1 %v1564_v20  ;;  %v4625_v34 = vpop.permute.xlu0 %4624 }
 0x199   : > { %v4627_v11 = vunpack.i.h.bf16 %v4625_v34  ;;  %v4626_v27 = vunpack.i.l.bf16 %v4625_v34  ;;  %1716 = vmatmul.mubr.f32.gmra.mrb[22].mxu1 %v1543_v35 }
 0x19b   : > { %v1551_v10 = vsel %vm1522_vm8, %v5541_v51, %v4626_v27  ;;  %v1528_v17 = vsel %vm1522_vm8, %v843_v15, %v4627_v11 }
 0x19c   : > { %v4635_v1 = vpop.permute.xlu0 %4634  ;;  %v1558_v38 = vsel %vm1530_vm9, %v1551_v10, %v4631_v24  ;;  %v1536_v25 = vsel %vm1530_vm9, %v1528_v17, %v4632_v40 }
 0x19d   : > { %v4637_v44 = vunpack.i.h.bf16 %v4635_v1  ;;  %v4636_v28 = vunpack.i.l.bf16 %v4635_v1 }
 0x19f   : > { %v1565_v54 = vsel %vm1538_vm10, %v1558_v38, %v4636_v28  ;;  %v1544_v19 = vsel %vm1538_vm10, %v1536_v25, %v4637_v44 }
 0x1a0   : > { %1720 = vmatprep.mubr.f32.mxu1 %v1565_v54  ;;  %v4640_v49 = vpop.permute.xlu0 %4639 }
 0x1a1   : > { %1721 = vmatmul.mubr.f32.gmra.mrb[24].mxu1 %v1544_v19  ;;  %v4642_v58 = vunpack.i.h.bf16 %v4640_v49  ;;  %v4641_v53 = vunpack.i.l.bf16 %v4640_v49 }
 0x1a3   : > { %v1552_v4 = vsel %vm1522_vm8, %v5576_v0, %v4641_v53  ;;  %v1529_v59 = vsel %vm1522_vm8, %v844_v56, %v4642_v58 }
 0x1a4   : > { %v4650_v62 = vpop.permute.xlu0 %4649 }
 0x1a5   : > { %v1267_v43 = vpop.permute.xlu1 %1266  ;;  %v4652_v31 = vunpack.i.h.bf16 %v4650_v62  ;;  %v4651_v9 = vunpack.i.l.bf16 %v4650_v62 }
 0x1a6   : > { %v1275_v55 = vmul.f32 0.0, %v1267_v43 }
 0x1a8   : > { %4067 = vmatmul.mubr.msk.f32.gmra.mrb[12].mxu0 %vm1522_vm8, %v1275_v55 }
 0x1a9   : > { %v4645_v5 = vpop.permute.xlu1 %4644  ;;  %4083 = vmatprep.mubr.msk.f32.mxu0 %vm1835_vm11, %v1831_v32  ;;  %v2187_v32 = vld [vmem:[%s6363_s7 + $0x38] sm:$0xff] }
 0x1aa   : > { %v4647_v50 = vunpack.i.h.bf16 %v4645_v5  ;;  %v4646_v37 = vunpack.i.l.bf16 %v4645_v5 }
 0x1ac   : > { %v1559_v8 = vsel %vm1530_vm9, %v1552_v4, %v4646_v37  ;;  %v1537_v12 = vsel %vm1530_vm9, %v1529_v59, %v4647_v50  ;;  %v3726_v4 = vld [vmem:[%s6360_s6 + $0x30] sm:$0xff] }
 0x1ad   : > { %v1566_v61 = vsel %vm1538_vm10, %v1559_v8, %v4651_v9  ;;  %v1545_v36 = vsel %vm1538_vm10, %v1537_v12, %v4652_v31  ;;  %v3725_v31 = vld [vmem:[%s6360_s6 + $0x28] sm:$0xff]  ;;  %v1833_v59 = vld [vmem:[%s6360_s6 + $0x10] sm:$0xff]  ;;  %v3727_v8 = vld [vmem:[%s6360_s6 + $0x38] sm:$0xf] }
 0x1ae   : > { %1725 = vmatprep.mubr.f32.mxu1 %v1566_v61  ;;  %v1832_v9 = vld [vmem:[%s6360_s6 + $0x8] sm:$0xff]  ;;  %v1834_v12 = vld [vmem:[%s6360_s6 + $0x18] sm:$0xf]  ;;  %v3733_v61 = vld [vmem:[%s6360_s6 + $0x40] sm:$0xff] }
 0x1af   : > { %1726 = vmatmul.mubr.f32.gmra.mrb[26].mxu1 %v1545_v36  ;;  %v3734_v36 = vld [vmem:[%s6360_s6 + $0x48] sm:$0xff] }
 0x1b0   : > { %4103 = vmatprep.mubr.msk.f32.mxu1 %vm1835_vm11, %v3724_v6  ;;  %v2186_v6 = vld [vmem:[%s6363_s7 + $0x30] sm:$0xff] }
 0x1d0   : > { %v1797_v26 = vpop.f32.mrb[0].mxu0 }
 0x1d1   : > { %v4050_v51 = vpop.f32.mrb[1].mxu0 }
 0x1d2   : > { %v6362_v51 = vmov 0.0|0.0  }
 0x1d5   : > { %v1802_v52 = vpop.f32.mrb[2].mxu0 }
 0x1d6   : > { %v4053_v42 = vpop.f32.mrb[3].mxu0 }
 0x1d7   : > { %v2180_v42 = vld [vmem:[%s6363_s7] sm:$0xff] }
 0x1d9   : > { %v1807_v14 = vpop.f32.mrb[4].mxu0 }
 0x1da   : > { %v4056_v3 = vpop.f32.mrb[5].mxu0 }
 0x1db   : > { %v2182_v3 = vld [vmem:[%s6363_s7 + $0x10] sm:$0xff] }
 0x1dd   : > { %v1812_v13 = vpop.f32.mrb[6].mxu0 }
 0x1de   : > { %v4059_v0 = vpop.f32.mrb[7].mxu0 }
 0x1df   : > { %v2183_v0 = vld [vmem:[%s6363_s7 + $0x18] sm:$0xff] }
 0x1e1   : > { %v1817_v7 = vpop.f32.mrb[8].mxu0 }
 0x1e2   : > { %v4062_v29 = vpop.f32.mrb[9].mxu0 }
 0x1e3   : > { %v2184_v29 = vld [vmem:[%s6363_s7 + $0x20] sm:$0xff] }
 0x1e7   : > { %v1822_v23 = vpop.f32.mrb[10].mxu0 }
 0x1e8   : > { %v4065_v2 = vpop.f32.mrb[11].mxu0 }
 0x251   : > { %v3828_v45 = vpop.f32.mrb[14].mxu1 }
 0x252   : > { %v3829_v18 = vpop.f32.mrb[15].mxu1 }
 0x253   : > { %v3830_v48 = vadd.f32 %v3829_v18, %v3828_v45  ;;  %v2188_v45 = vld [vmem:[%s6363_s7 + $0x40] sm:$0xff]  ;;  %v2189_v18 = vld [vmem:[%s6363_s7 + $0x48] sm:$0xff] }
 0x255   : > { %v1698_v41 = vadd.f32 %v3830_v48, %v3711_v16  ;;  %v4408_v48 = vpack.c.bf16 %v2189_v18, %v2188_v45  ;;  %v2543_v45 = vld [vmem:[%s6277_s10 + $0x40] sm:$0xff]  ;;  %v2545_v18 = vld [vmem:[%s6277_s10 + $0x50] sm:$0xff] }
 0x256   : > { %v3831_v33 = vpop.f32.mrb[16].mxu1 }
 0x257   : > { %v1798_v47 = vadd.f32 %v1797_v26, %v1698_v41  ;;  %v3832_v22 = vpop.f32.mrb[17].mxu1  ;;  %v3735_v26 = vld [vmem:[%s6360_s6 + $0x50] sm:$0xff] }
 0x258   : > { %v3833_v60 = vadd.f32 %v3832_v22, %v3831_v33  ;;  %v2190_v41 = vld [vmem:[%s6363_s7 + $0x50] sm:$0xff]  ;;  %v2191_v33 = vld [vmem:[%s6363_s7 + $0x58] sm:$0xff] }
 0x25a   : > { %v1703_v21 = vadd.f32 %v3833_v60, %v3711_v16 }
 0x25c   : > { %v1803_v30 = vadd.f32 %v1802_v52, %v1703_v21  ;;  %v3736_v52 = vld [vmem:[%s6360_s6 + $0x58] sm:$0xf] }
 0x25e   : > { %v4356_v63 = vpack.c.bf16 %v1803_v30, %v1798_v47  ;;  %v4412_v47 = vpack.c.bf16 %v2191_v33, %v2190_v41  ;;  %v2546_v41 = vld [vmem:[%s6277_s10 + $0x58] sm:$0xff] }
 0x25f   : > { %v4453_v33 = vpack.c.bf16 %v2546_v41, %v2545_v18  ;;  %v2770_v18 = vld [vmem:[%s6280_s13 + $0x58] sm:$0xff]  ;;  %v3755_v41 = vld [vmem:[%s6278_s11] ss:$0 sm:$0xff] }
 0x260   : > { %v3834_v57 = vpop.f32.mrb[18].mxu1  ;;  %4357 = vmatprep.subr.bf16.mxu0 %v4356_v63  ;;  %4369 = vmatprep.subr.bf16.mxu1 %v4356_v63 }
 0x261   : > { %v3835_v20 = vpop.f32.mrb[19].mxu1  ;;  %4359 = vmatpush3.bf16.msra.mxu0 %v4356_v63  ;;  %4371 = vmatpush3.bf16.msra.mxu1 %v4356_v63 }
 0x262   : > { %v3836_v35 = vadd.f32 %v3835_v20, %v3834_v57 }
 0x264   : > { %v1708_v34 = vadd.f32 %v3836_v35, %v3711_v16 }
 0x265   : > { %v3837_v46 = vpop.f32.mrb[20].mxu1 }
 0x266   : > { %v1808_v11 = vadd.f32 %v1807_v14, %v1708_v34  ;;  %v3838_v27 = vpop.f32.mrb[21].mxu1  ;;  %v2181_v14 = vld [vmem:[%s6363_s7 + $0x8] sm:$0xff] }
 0x267   : > { %v3839_v15 = vadd.f32 %v3838_v27, %v3837_v46 }
 0x269   : > { %v1713_v10 = vadd.f32 %v3839_v15, %v3711_v16 }
 0x26b   : > { %v1813_v17 = vadd.f32 %v1812_v13, %v1713_v10  ;;  %v4392_v13 = vpack.c.bf16 %v2181_v14, %v2180_v42  ;;  %v2536_v42 = vld [vmem:[%s6277_s10 + $0x8] sm:$0xff]  ;;  %v2537_v14 = vld [vmem:[%s6277_s10 + $0x10] sm:$0xff] }
 0x26c   : > { %v3840_v40 = vpop.f32.mrb[22].mxu1 }
 0x26d   : > { %v4360_v24 = vpack.c.bf16 %v1813_v17, %v1808_v11  ;;  %v3841_v1 = vpop.f32.mrb[23].mxu1 }
 0x26e   : > { %v3842_v44 = vadd.f32 %v3841_v1, %v3840_v40 }
 0x26f   : > { %4361 = vmatprep.subr.bf16.mxu0 %v4360_v24  ;;  %4373 = vmatprep.subr.bf16.mxu1 %v4360_v24 }
 0x270   : > { %v1718_v28 = vadd.f32 %v3842_v44, %v3711_v16  ;;  %4363 = vmatpush3.bf16.msra.mxu0 %v4360_v24  ;;  %4375 = vmatpush3.bf16.msra.mxu1 %v4360_v24 }
 0x272   : > { %v1818_v38 = vadd.f32 %v1817_v7, %v1718_v28  ;;  %v4396_v7 = vpack.c.bf16 %v2183_v0, %v2182_v3 }
 0x274   : > { %v3843_v25 = vpop.f32.mrb[24].mxu1 }
 0x275   : > { %v3844_v54 = vpop.f32.mrb[25].mxu1 }
 0x276   : > { %v3845_v19 = vadd.f32 %v3844_v54, %v3843_v25 }
 0x278   : > { %v1723_v49 = vadd.f32 %v3845_v19, %v3711_v16 }
 0x27a   : > { %v1823_v43 = vadd.f32 %v1822_v23, %v1723_v49  ;;  %v2185_v23 = vld [vmem:[%s6363_s7 + $0x28] sm:$0xff] }
 0x27b   : > { %v1827_v55 = vpop.f32.mrb[12].mxu0  ;;  %v4400_v2 = vpack.c.bf16 %v2185_v23, %v2184_v29  ;;  %v2540_v29 = vld [vmem:[%s6277_s10 + $0x28] sm:$0xff] }
 0x27c   : > { %v4364_v58 = vpack.c.bf16 %v1823_v43, %v1818_v38  ;;  %v4068_v53 = vpop.f32.mrb[13].mxu0 }
 0x27d   : > { %v3742_v53 = vld [vmem:[%s6275_s8] ss:$0 sm:$0xff] }
 0x27e   : > { %4365 = vmatprep.subr.bf16.mxu0 %v4364_v58  ;;  %4377 = vmatprep.subr.bf16.mxu1 %v4364_v58 }
 0x27f   : > { %4367 = vmatpush3.bf16.msra.mxu0 %v4364_v58  ;;  %4379 = vmatpush3.bf16.msra.mxu1 %v4364_v58 }
 0x282   : > { %v3846_v62 = vpop.f32.mrb[26].mxu1 }
 0x283   : > { %v3847_v5 = vpop.f32.mrb[27].mxu1 }
 0x284   : > { %v3848_v56 = vadd.f32 %v3847_v5, %v3846_v62 }
 0x286   : > { %v1728_v50 = vadd.f32 %v3848_v56, %v3711_v16  ;;  %v4404_v16 = vpack.c.bf16 %v2187_v32, %v2186_v6  ;;  %v2542_v6 = vld [vmem:[%s6277_s10 + $0x38] sm:$0xff] }
 0x288   : > { %v1828_v37 = vadd.f32 %v1827_v55, %v1728_v50 }
 0x28a   : > { %4081 = vmatprep.subr.msk.mxu0 %vm691_vm0, %v1828_v37  ;;  %4101 = vmatprep.subr.msk.mxu1 %vm691_vm0, %v1828_v37 }
 0x28b   : > { %4082 = vmatpush3.msk.msra.mxu0 %vm691_vm0, %v1828_v37  ;;  %4102 = vmatpush3.msk.msra.mxu1 %vm691_vm0, %v1828_v37 }
 0x28c   : > { %4104 = vmatmul.mubr.msk.f32.vlgmr.msra.gmra.mrb[28].mxu1 %vm1835_vm11, %v3725_v31  ;;  %4381 = vmatprep.subr.bf16.mxu0 %v4356_v63 }
 0x28d   : > { %4084 = vmatmul.mubr.msk.f32.vlgmr.msra.gmra.mrb[14].mxu0 %vm1835_vm11, %v1832_v9  ;;  %4106 = vmatprep.mubr.msk.f32.mxu1 %vm1835_vm11, %v3726_v4 }
 0x28e   : > { %4383 = vmatpush3.bf16.msra.mxu0 %v4356_v63  ;;  %4086 = vmatprep.mubr.msk.f32.mxu0 %vm1835_vm11, %v1833_v59 }
 0x28f   : > { %4385 = vmatprep.subr.bf16.mxu0 %v4360_v24  ;;  %4393 = vmatprep.subr.bf16.mxu1 %v4392_v13 }
 0x290   : > { %4107 = vmatmul.mubr.msk.f32.gmra.mrb[30].mxu1 %vm1835_vm11, %v3727_v8  ;;  %v2763_v8 = vld [vmem:[%s6280_s13 + $0x20] sm:$0xff] }
 0x291   : > { %4087 = vmatmul.mubr.msk.f32.gmra.mrb[16].mxu0 %vm1835_vm11, %v1834_v12  ;;  %4395 = vmatpush3.bf16.msra.mxu1 %v4392_v13  ;;  %v2538_v13 = vld [vmem:[%s6277_s10 + $0x18] sm:$0xff] }
 0x292   : > { %4387 = vmatpush3.bf16.msra.mxu0 %v4360_v24  ;;  %4123 = vmatprep.mubr.msk.f32.mxu0 %vm1835_vm11, %v3733_v61  ;;  %v2296_v61 = vld [vmem:[%s6276_s9] sm:$0x3f]  ;;  %v4441_v0 = vpack.c.bf16 %v2538_v13, %v2537_v14  ;;  %v2766_v14 = vld [vmem:[%s6280_s13 + $0x38] sm:$0xff]  ;;  %v2784_v13 = vld [vmem:[%s6280_s13 + $0xc8] sm:$0xff] }
 0x293   : > { %4389 = vmatprep.subr.bf16.mxu0 %v4364_v58  ;;  %4397 = vmatprep.subr.bf16.mxu1 %v4396_v7 }
 0x295   : > { %4399 = vmatpush3.bf16.msra.mxu1 %v4396_v7  ;;  %v2539_v7 = vld [vmem:[%s6277_s10 + $0x20] sm:$0xff] }
 0x296   : > { %4391 = vmatpush3.bf16.msra.mxu0 %v4364_v58  ;;  %4401 = vmatprep.subr.bf16.mxu1 %v4400_v2  ;;  %v4444_v23 = vpack.c.bf16 %v2540_v29, %v2539_v7  ;;  %v2767_v29 = vld [vmem:[%s6280_s13 + $0x40] sm:$0xff] }
 0x297   : > { %4121 = vmatprep.subr.msk.mxu0 %vm691_vm0, %v1828_v37 }
 0x299   : > { %4403 = vmatpush3.bf16.msra.mxu1 %v4400_v2  ;;  %v2541_v2 = vld [vmem:[%s6277_s10 + $0x30] sm:$0xff] }
 0x29a   : > { %4122 = vmatpush3.msk.msra.mxu0 %vm691_vm0, %v1828_v37  ;;  %4405 = vmatprep.subr.bf16.mxu1 %v4404_v16  ;;  %v4447_v32 = vpack.c.bf16 %v2542_v6, %v2541_v2  ;;  %v2785_v2 = vld [vmem:[%s6280_s13 + $0xd0] sm:$0xff]  ;;  %v2786_v6 = vld [vmem:[%s6280_s13 + $0xd8] sm:$0xff] }
 0x29b   : > { %4124 = vmatmul.mubr.msk.f32.vlgmr.msra.gmra.mrb[18].mxu0 %vm1835_vm11, %v3734_v36  ;;  %4416 = vmatprep.subr.bf16.mxu0 %v6362_v51  ;;  %v3749_v36 = vld [vmem:[%s6276_s9 + $0x8] sm:$0x3f] }
 0x29c   : > { %4126 = vmatprep.mubr.msk.f32.mxu0 %vm1835_vm11, %v3735_v26  ;;  %v3752_v26 = vld [vmem:[%s6276_s9 + $0x10] sm:$0x3f] }
 0x29d   : > { %4407 = vmatpush3.bf16.msra.mxu1 %v4404_v16  ;;  %v2544_v16 = vld [vmem:[%s6277_s10 + $0x48] sm:$0xff] }
 0x29e   : > { %4409 = vmatprep.subr.bf16.mxu1 %v4408_v48 }
 0x29f   : > { %4127 = vmatmul.mubr.msk.f32.gmra.mrb[20].mxu0 %vm1835_vm11, %v3736_v52  ;;  %v2535_v52 = vld [vmem:[%s6277_s10] sm:$0xff] }
 0x2a0   : > { %4167 = vmatprep.mubr.msk.f32.mxu0 %vm4683_vm3, %v6341_v39  ;;  %v4438_v3 = vpack.c.bf16 %v2536_v42, %v2535_v52  ;;  %v2765_v42 = vld [vmem:[%s6280_s13 + $0x30] sm:$0xff] }
 0x2a1   : > { %4411 = vmatpush3.bf16.msra.mxu1 %v4408_v48  ;;  %v4450_v48 = vpack.c.bf16 %v2544_v16, %v2543_v45  ;;  %v4475_v45 = vpack.c.bf16 %v2786_v6, %v2785_v2  ;;  %v2769_v16 = vld [vmem:[%s6280_s13 + $0x50] sm:$0xff] }
 0x2a2   : > { %4413 = vmatprep.subr.bf16.mxu1 %v4412_v47 }
 0x2a5   : > { %4415 = vmatpush3.bf16.msra.mxu1 %v4412_v47 }
 0x35f   : > { %v4105_v22 = vpop.f32.mrb[28].mxu1 }
 0x360   : > { %2146 = vrot.lane.b32.xlu0 %v4105_v22, %s6364_s29  ;;  %v2019_v60 = vpop.f32.mrb[29].mxu1  ;;  %v4085_v21 = vpop.f32.mrb[14].mxu0 }
 0x361   : > { %2144 = vrot.lane.b32.xlu1 %v2019_v60, %s6364_s29  ;;  %v1917_v30 = vpop.f32.mrb[15].mxu0 }
 0x363   : > { %v4108_v63 = vpop.f32.mrb[30].mxu1 }
 0x364   : > { %2150 = vrot.lane.b32.xlu0 %v4108_v63, %s6364_s29  ;;  %v2029_v57 = vpop.f32.mrb[31].mxu1  ;;  %v4088_v20 = vpop.f32.mrb[16].mxu0  ;;  %v3757_v63 = vld [vmem:[%s6279_s12 + $0x8] sm:$0x3f] }
 0x365   : > { %2148 = vrot.lane.b32.xlu1 %v2029_v57, %s6364_s29  ;;  %v1927_v35 = vpop.f32.mrb[17].mxu0 }
 0x36e   : > { %v4125_v34 = vpop.f32.mrb[18].mxu0 }
 0x36f   : > { %2162 = vrot.lane.b32.xlu0 %v4125_v34, %s6365_s0  ;;  %v2121_v46 = vpop.f32.mrb[19].mxu0  ;;  %v3761_v34 = vld [vmem:[%s6279_s12 + $0x30] sm:$0x3f] }
 0x370   : > { %2160 = vrot.lane.b32.xlu1 %v2121_v46, %s6365_s0  ;;  %v2635_v46 = vld [vmem:[%s6279_s12] sm:$0x3f] }
 0x372   : > { %v4128_v11 = vpop.f32.mrb[20].mxu0 }
 0x373   : > { %2166 = vrot.lane.b32.xlu0 %v4128_v11, %s6365_s0  ;;  %v2131_v27 = vpop.f32.mrb[21].mxu0  ;;  %v3762_v11 = vld [vmem:[%s6279_s12 + $0x38] sm:$0x3f] }
 0x374   : > { %2164 = vrot.lane.b32.xlu1 %v2131_v27, %s6365_s0  ;;  %v3759_v27 = vld [vmem:[%s6279_s12 + $0x18] sm:$0x3f] }
 0x3d2   : > { %v2147_v15 = vpop.permute.xlu0 %2146 }
 0x3d3   : > { %v2145_v10 = vpop.permute.xlu1 %2144  ;;  %v2173_v28 = vsel %vm1522_vm8, %v4085_v21, %v2147_v15  ;;  %v3763_v15 = vld [vmem:[%s6279_s12 + $0x40] sm:$0x3f] }
 0x3d4   : > { %v2172_v1 = vsel %vm1522_vm8, %v1917_v30, %v2145_v10  ;;  %v3760_v30 = vld [vmem:[%s6279_s12 + $0x28] sm:$0x3f] }
 0x3d6   : > { %v2151_v17 = vpop.permute.xlu0 %2150 }
 0x3d7   : > { %v2149_v40 = vpop.permute.xlu1 %2148  ;;  %v2175_v43 = vsel %vm1522_vm8, %v4088_v20, %v2151_v17 }
 0x3d8   : > { %v2174_v19 = vsel %vm1522_vm8, %v1927_v35, %v2149_v40  ;;  %v3758_v35 = vld [vmem:[%s6279_s12 + $0x10] sm:$0x3f] }
 0x3e1   : > { %v2163_v24 = vpop.permute.xlu0 %2162 }
 0x3e2   : > { %v2161_v44 = vpop.permute.xlu1 %2160  ;;  %v2177_v25 = vsel %vm1530_vm9, %v2173_v28, %v2163_v24  ;;  %v2793_v28 = vld [vmem:[%s6280_s13 + $0x110] sm:$0xff] }
 0x3e3   : > { %v2176_v38 = vsel %vm1530_vm9, %v2172_v1, %v2161_v44  ;;  %v2791_v1 = vld [vmem:[%s6280_s13 + $0x100] sm:$0xff]  ;;  %v2792_v44 = vld [vmem:[%s6280_s13 + $0x108] sm:$0xff] }
 0x3e4   : > { %4153 = vmatprep.mubr.msk.f32.mxu1 %vm1538_vm10, %v2176_v38  ;;  %v4488_v38 = vpack.c.bf16 %v2792_v44, %v2791_v1 }
 0x3e5   : > { %4154 = vmatmul.mubr.msk.f32.vlgmr.msra.gmra.mrb[32].mxu1 %vm1538_vm10, %v2177_v25  ;;  %v2167_v54 = vpop.permute.xlu0 %2166  ;;  %v2794_v25 = vld [vmem:[%s6280_s13 + $0x118] sm:$0xff] }
 0x3e6   : > { %v2165_v49 = vpop.permute.xlu1 %2164  ;;  %v2179_v58 = vsel %vm1530_vm9, %v2175_v43, %v2167_v54  ;;  %v4491_v54 = vpack.c.bf16 %v2794_v25, %v2793_v28  ;;  %v2759_v43 = vld [vmem:[%s6280_s13] sm:$0xff]  ;;  %v2772_v25 = vld [vmem:[%s6280_s13 + $0x68] sm:$0xff] }
 0x3e7   : > { %v2178_v55 = vsel %vm1530_vm9, %v2174_v19, %v2165_v49  ;;  %v2775_v19 = vld [vmem:[%s6280_s13 + $0x80] sm:$0xff]  ;;  %v2776_v49 = vld [vmem:[%s6280_s13 + $0x88] sm:$0xff] }
 0x3e8   : > { %4156 = vmatprep.mubr.msk.f32.mxu1 %vm1538_vm10, %v2178_v55  ;;  %v4455_v55 = vpack.c.bf16 %v2776_v49, %v2775_v19 }
 0x3e9   : > { %4157 = vmatmul.mubr.msk.f32.gmra.mrb[34].mxu1 %vm1538_vm10, %v2179_v58  ;;  %v2760_v58 = vld [vmem:[%s6280_s13 + $0x8] sm:$0xff] }
 0x3ea   : > { %4456 = vmatprep.subr.bf16.mxu1 %v4455_v55 }
 0x4b8   : > { %v4155_v62 = vpop.f32.mrb[32].mxu1 }
 0x4b9   : > { %v2283_v5 = vadd.f32 %v4155_v62, %v3742_v53  ;;  %v2277_v56 = vpop.f32.mrb[33].mxu1  ;;  %v2778_v62 = vld [vmem:[%s6280_s13 + $0x98] sm:$0xff] }
 0x4ba   : > { %v2278_v50 = vadd.f32 %v3742_v53, %v2277_v56 }
 0x4bc   : > { %v4417_v37 = vpack.c.bf16 %v2283_v5, %v2278_v50  ;;  %v4158_v31 = vpop.f32.mrb[34].mxu1  ;;  %v4457_v5 = vpack.c.bf16 %v2760_v58, %v2759_v43  ;;  %v2761_v50 = vld [vmem:[%s6280_s13 + $0x10] sm:$0xff] }
 0x4bd   : > { %v2293_v9 = vadd.f32 %v4158_v31, %v3742_v53  ;;  %v2287_v4 = vpop.f32.mrb[35].mxu1  ;;  %v2779_v31 = vld [vmem:[%s6280_s13 + $0xa0] sm:$0xff] }
 0x4be   : > { %v2288_v59 = vadd.f32 %v3742_v53, %v2287_v4  ;;  %4418 = vmatpush3.bf16.msra.mxu0 %v4417_v37  ;;  %v2777_v53 = vld [vmem:[%s6280_s13 + $0x90] sm:$0xff]  ;;  %4458 = vmatpush3.bf16.msra.mxu1 %v4457_v5 }
 0x4bf   : > { %4419 = vmatprep.subr.bf16.mxu0 %v6362_v51  ;;  %v4459_v56 = vpack.c.bf16 %v2778_v62, %v2777_v53 }
 0x4c0   : > { %v4420_v12 = vpack.c.bf16 %v2293_v9, %v2288_v59  ;;  %v2780_v9 = vld [vmem:[%s6280_s13 + $0xa8] sm:$0xff] }
 0x4c1   : > { %4460 = vmatprep.subr.bf16.mxu1 %v4459_v56  ;;  %v4463_v59 = vpack.c.bf16 %v2780_v9, %v2779_v31 }
 0x4c2   : > { %4422 = vmatpush3.bf16.msk.msra.mxu0 %vm5872_vm13, %v4420_v12 }
 0x4c3   : > { %4423 = vmatprep.subr.bf16.mxu0 %v6362_v51 }
 0x4c5   : > { %4168 = vmatmul.mubr.msk.f32.vlgmr.msra.gmra.mrb[22].mxu0 %vm2297_vm14, %v2296_v61  ;;  %v2781_v61 = vld [vmem:[%s6280_s13 + $0xb0] sm:$0xff] }
 0x4c6   : > { %4425 = vmatpush3.bf16.msra.mxu0 %v4417_v37  ;;  %4178 = vmatprep.mubr.msk.f32.mxu0 %vm4683_vm3, %v6341_v39 }
 0x4c7   : > { %4426 = vmatprep.subr.bf16.mxu0 %v6362_v51 }
 0x4ca   : > { %4429 = vmatpush3.bf16.msk.msra.mxu0 %vm5872_vm13, %v4420_v12 }
 0x4cb   : > { %4430 = vmatprep.subr.bf16.mxu0 %v6362_v51 }
 0x4cd   : > { %4179 = vmatmul.mubr.msk.f32.vlgmr.msra.gmra.mrb[24].mxu0 %vm2297_vm14, %v3749_v36  ;;  %v2782_v36 = vld [vmem:[%s6280_s13 + $0xb8] sm:$0xff] }
 0x4ce   : > { %4432 = vmatpush3.bf16.msra.mxu0 %v4417_v37  ;;  %4189 = vmatprep.mubr.msk.f32.mxu0 %vm4683_vm3, %v6341_v39  ;;  %v2762_v37 = vld [vmem:[%s6280_s13 + $0x18] sm:$0xff]  ;;  %v4467_v52 = vpack.c.bf16 %v2782_v36, %v2781_v61 }
 0x4cf   : > { %4433 = vmatprep.subr.bf16.mxu0 %v6362_v51  ;;  %v4461_v4 = vpack.c.bf16 %v2762_v37, %v2761_v50 }
 0x4d1   : > { %4462 = vmatpush3.bf16.msra.mxu1 %v4461_v4 }
 0x4d2   : > { %4436 = vmatpush3.bf16.msk.msra.mxu0 %vm5872_vm13, %v4420_v12  ;;  %v2764_v12 = vld [vmem:[%s6280_s13 + $0x28] sm:$0xff]  ;;  %4464 = vmatprep.subr.bf16.mxu1 %v4463_v59 }
 0x4d3   : > { %4437 = vmatprep.subr.bf16.mxu0 %v6362_v51 }
 0x4d5   : > { %4190 = vmatmul.mubr.msk.f32.vlgmr.msra.gmra.mrb[26].mxu0 %vm2297_vm14, %v3752_v26  ;;  %v4465_v26 = vpack.c.bf16 %v2764_v12, %v2763_v8  ;;  %v2789_v8 = vld [vmem:[%s6280_s13 + $0xf0] sm:$0xff]  ;;  %v2790_v12 = vld [vmem:[%s6280_s13 + $0xf8] sm:$0xff] }
 0x4d6   : > { %4216 = vmatprep.mubr.msk.f32.mxu0 %vm4683_vm3, %v6341_v39  ;;  %4439 = vmatpush3.bf16.msra.mxu0 %v4438_v3  ;;  %v2783_v3 = vld [vmem:[%s6280_s13 + $0xc0] sm:$0xff]  ;;  %v4483_v2 = vpack.c.bf16 %v2790_v12, %v2789_v8 }
 0x4d7   : > { %4440 = vmatprep.subr.bf16.mxu0 %v6362_v51  ;;  %4466 = vmatpush3.bf16.msra.mxu1 %v4465_v26  ;;  %v4471_v7 = vpack.c.bf16 %v2784_v13, %v2783_v3  ;;  %v3190_v12 = vld [vmem:[%s6283_s16 + $0x40] sm:$0xff] }
 0x4d8   : > { %4468 = vmatprep.subr.bf16.mxu1 %v4467_v52 }
 0x4da   : > { %4442 = vmatpush3.bf16.msra.mxu0 %v4441_v0  ;;  %v4469_v0 = vpack.c.bf16 %v2766_v14, %v2765_v42 }
 0x4db   : > { %4443 = vmatprep.subr.bf16.mxu0 %v6362_v51 }
 0x4dc   : > { %4470 = vmatpush3.bf16.msra.mxu1 %v4469_v0  ;;  %v2773_v0 = vld [vmem:[%s6280_s13 + $0x70] sm:$0xff] }
 0x4dd   : > { %4472 = vmatprep.subr.bf16.mxu1 %v4471_v7  ;;  %v2774_v7 = vld [vmem:[%s6280_s13 + $0x78] sm:$0xff] }
 0x4de   : > { %4445 = vmatpush3.bf16.msra.mxu0 %v4444_v23  ;;  %v2768_v23 = vld [vmem:[%s6280_s13 + $0x48] sm:$0xff] }
 0x4df   : > { %4446 = vmatprep.subr.bf16.mxu0 %v6362_v51 }
 0x4e2   : > { %4448 = vmatpush3.bf16.msra.mxu0 %v4447_v32  ;;  %v4473_v32 = vpack.c.bf16 %v2768_v23, %v2767_v29 }
 0x4e3   : > { %4449 = vmatprep.subr.bf16.mxu0 %v6362_v51 }
 0x4e4   : > { %4474 = vmatpush3.bf16.msra.mxu1 %v4473_v32 }
 0x4e5   : > { %4476 = vmatprep.subr.bf16.mxu1 %v4475_v45 }
 0x4e6   : > { %4451 = vmatpush3.bf16.msra.mxu0 %v4450_v48  ;;  %v4477_v48 = vpack.c.bf16 %v2770_v18, %v2769_v16 }
 0x4e7   : > { %4452 = vmatprep.subr.bf16.mxu0 %v6362_v51 }
 0x4e8   : > { %4478 = vmatpush3.bf16.msra.mxu1 %v4477_v48  ;;  %v4485_v48 = vpack.c.bf16 %v2774_v7, %v2773_v0 }
 0x4ea   : > { %4454 = vmatpush3.bf16.msra.mxu0 %v4453_v33 }
 0x4eb   : > { %4487 = vmatprep.subr.bf16.mxu0 %v6362_v51 }
 0x598   : > { %v2371_v47 = vpop.f32.mrb[22].mxu0 }
 0x599   : > { %v4169_v22 = vpop.f32.mrb[23].mxu0 }
 0x5a0   : > { %v2446_v60 = vpop.f32.mrb[24].mxu0 }
 0x5a1   : > { %2526 = vrot.lane.b32.xlu1 %v2446_v60, %s6364_s29  ;;  %v4180_v21 = vpop.f32.mrb[25].mxu0 }
 0x5a5   : > { %2673 = vperm.xlu1 %4547, %v3760_v30  }
 0x5a8   : > { %v2521_v57 = vpop.f32.mrb[26].mxu0 }
 0x5a9   : > { %2646 = vperm.xlu1 %4547, %v3757_v63   ;;  %2530 = vrot.lane.b32.xlu0 %v2521_v57, %s6365_s0  ;;  %v4191_v20 = vpop.f32.mrb[27].mxu0 }
 0x5ad   : > { %2655 = vperm.xlu1 %4547, %v3758_v35   ;;  %2683 = vperm.xlu0 %4546, %v3761_v34  }
 0x5b1   : > { %2638 = vperm.xlu1 %4547, %v2635_v46   ;;  %2693 = vperm.xlu0 %4546, %v3762_v11  }
 0x5b5   : > { %2664 = vperm.xlu0 %4546, %v3759_v27  }
 0x5b9   : > { %2703 = vperm.xlu0 %4546, %v3763_v15  }
 0x613   : > { %v2527_v10 = vpop.permute.xlu1 %2526 }
 0x614   : > { %v2533_v17 = vsel %vm1522_vm8, %v2371_v47, %v2527_v10 }
 0x61b   : > { %v2531_v40 = vpop.permute.xlu0 %2530 }
 0x61c   : > { %v2534_v24 = vsel %vm1530_vm9, %v2533_v17, %v2531_v40  ;;  %v2787_v17 = vld [vmem:[%s6280_s13 + $0xe0] sm:$0xff]  ;;  %v2788_v40 = vld [vmem:[%s6280_s13 + $0xe8] sm:$0xff] }
 0x61d   : > { %4217 = vmatmul.mubr.msk.f32.vlgmr.msra.gmra.mrb[28].mxu0 %vm1538_vm10, %v2534_v24  ;;  %v2771_v24 = vld [vmem:[%s6280_s13 + $0x60] sm:$0xff] }
 0x61e   : > { %4227 = vmatprep.mubr.msk.f32.mxu0 %vm4683_vm3, %v6341_v39  ;;  %4489 = vmatpush3.bf16.msra.mxu0 %v4488_v38  ;;  %v4479_v38 = vpack.c.bf16 %v2788_v40, %v2787_v17  ;;  %v4481_v43 = vpack.c.bf16 %v2772_v25, %v2771_v24 }
 0x61f   : > { %4490 = vmatprep.subr.bf16.mxu0 %v6362_v51 }
 0x620   : > { %4480 = vmatprep.subr.bf16.mxu1 %v4479_v38 }
 0x621   : > { %4482 = vmatpush3.bf16.msra.mxu1 %v4481_v43  ;;  %v3768_v43 = vld [vmem:[%s6282_s15 + $0x4] sm:$0x7] }
 0x622   : > { %4492 = vmatpush3.bf16.msra.mxu0 %v4491_v54  ;;  %4484 = vmatprep.subr.bf16.mxu1 %v4483_v2 }
 0x623   : > { %4230 = vmatprep.subr.mxu0 %v6341_v39 }
 0x624   : > { %v2674_v21 = vpop.permute.xlu1 %2673 }
 0x625   : > { %v2675_v11 = vrot.slane %v2674_v21, 4  ;;  %4486 = vmatpush3.bf16.msra.mxu1 %v4485_v48 }
 0x626   : > { %4235 = vmatprep.subr.mxu1 %v6341_v39 }
 0x628   : > { %v2647_v57 = vpop.permute.xlu1 %2646 }
 0x629   : > { %v2648_v27 = vrot.slane %v2647_v57, 7 }
 0x62c   : > { %v2684_v60 = vpop.permute.xlu0 %2683  ;;  %v2656_v35 = vpop.permute.xlu1 %2655 }
 0x62d   : > { %v2657_v15 = vrot.slane %v2656_v35, 6  ;;  %v2685_v1 = vrot.slane %v2684_v60, 4 }
 0x630   : > { %v2694_v30 = vpop.permute.xlu0 %2693 }
 0x631   : > { %v2695_v44 = vrot.slane %v2694_v30, 3 }
 0x634   : > { %v2665_v20 = vpop.permute.xlu0 %2664 }
 0x635   : > { %v2666_v54 = vrot.slane %v2665_v20, 6 }
 0x638   : > { %v2704_v34 = vpop.permute.xlu0 %2703 }
 0x639   : > { %v2705_v28 = vrot.slane %v2704_v34, 2 }
 0x6f0   : > { %v2623_v33 = vpop.f32.mrb[28].mxu0 }
 0x6f1   : > { %v2624_v47 = vadd.f32 %v3755_v41, %v2623_v33  ;;  %v4218_v22 = vpop.f32.mrb[29].mxu0 }
 0x6f3   : > { %4668 = vtanh.f32 %v2624_v47  ;;  %v2639_v47 = vpop.permute.xlu1 %2638 }
 0x6fd   : > { %v4669_v63 = vpop.eup %4668 }
 0x6fe   : > { %4670 = vtanh.f32 %v4669_v63 }
 0x708   : > { %v6068_v46 = vpop.eup %4670 }
 0x709   : > { %v2630_v10 = vrot.slane %v6068_v46, 5 }
 0x70b   : > { %v2633_v19 = vsel %vm2632_vm15, 0.0, %v2630_v10  ;;  %v2634_v49 = vsel %vm691_vm0, %v2630_v10, 0.0  ;;  %vm2945_vm0 = vcmask 48128  }
 0x70c   : > { %v2707_v55 = vmul.f32 %v2705_v28, %v2633_v19  ;;  %v2708_v58 = vmul.f32 %v2705_v28, %v2634_v49  ;;  %v2659_v53 = vmul.f32 %v2657_v15, %v2633_v19  ;;  %v2687_v62 = vmul.f32 %v2685_v1, %v2633_v19 }
 0x70d   : > { %v2688_v5 = vmul.f32 %v2685_v1, %v2634_v49  ;;  %v2650_v56 = vmul.f32 %v2648_v27, %v2633_v19  ;;  %v2677_v50 = vmul.f32 %v2675_v11, %v2633_v19  ;;  %v2678_v37 = vmul.f32 %v2675_v11, %v2634_v49 }
 0x70e   : > { %v2750_v31 = vrot.slane %v2707_v55, 6  ;;  %v2751_v9 = vrot.slane %v2708_v58, 6  ;;  %v2715_v4 = vrot.slane %v2659_v53, 2  ;;  %v2734_v59 = vrot.slane %v2687_v62, 4  ;;  %v3771_v55 = vld [vmem:[%s6282_s15 + $0x8] sm:$0x7] }
 0x70f   : > { %v2735_v61 = vrot.slane %v2688_v5, 4  ;;  %v2710_v36 = vrot.slane %v2650_v56, 1  ;;  %v2726_v26 = vrot.slane %v2677_v50, 4  ;;  %v2727_v52 = vrot.slane %v2678_v37, 4  ;;  %v3182_v58 = vld [vmem:[%s6283_s16] sm:$0xff]  ;;  %v3183_v53 = vld [vmem:[%s6283_s16 + $0x8] sm:$0xff] }
 0x710   : > { %v2752_v42 = vsel %vm944_vm6, %v2750_v31, %v2751_v9  ;;  %v2668_v14 = vmul.f32 %v2666_v54, %v2633_v19  ;;  %v2697_v3 = vmul.f32 %v2695_v44, %v2633_v19  ;;  %v2698_v13 = vmul.f32 %v2695_v44, %v2634_v49  ;;  %v2944_v49 = vld [vmem:[%s6282_s15] sm:$0x7]  ;;  %v3184_v62 = vld [vmem:[%s6283_s16 + $0x10] sm:$0xff]  ;;  %v3185_v56 = vld [vmem:[%s6283_s16 + $0x18] sm:$0xff] }
 0x711   : > { %4228 = vmatmul.mubr.msk.f32.vlgmr.msra.gmra.mrb[30].mxu0 %vm1522_vm8, %v2752_v42  ;;  %v2736_v29 = vsel %vm2301_vm12, %v2734_v59, %v2735_v61  ;;  %v2728_v23 = vsel %vm2301_vm12, %v2726_v26, %v2727_v52  ;;  %v2641_v63 = vmul.f32 %v2639_v47, %v2633_v19  ;;  %v4494_v5 = vpack.c.bf16 %v3183_v53, %v3182_v58  ;;  %v3186_v37 = vld [vmem:[%s6283_s16 + $0x20] sm:$0xff]  ;;  %v3187_v31 = vld [vmem:[%s6283_s16 + $0x28] sm:$0xff]  ;;  %v3189_v59 = vld [vmem:[%s6283_s16 + $0x38] sm:$0xff] }
 0x712   : > { %v4658_v6 = vpack.i.bf16 %v2715_v4, %v2736_v29  ;;  %v4653_v32 = vpack.i.bf16 %v2710_v36, %v2728_v23  ;;  %v2720_v45 = vrot.slane %v2668_v14, 2  ;;  %v2742_v16 = vrot.slane %v2697_v3, 5  ;;  %4232 = vmatprep.mubr.msk.f32.mxu0 %vm4683_vm3, %v6341_v39  ;;  %v3188_v4 = vld [vmem:[%s6283_s16 + $0x30] sm:$0xff]  ;;  %v3191_v61 = vld [vmem:[%s6283_s16 + $0x48] sm:$0xff]  ;;  %v3193_v52 = vld [vmem:[%s6283_s16 + $0x58] sm:$0xff] }
 0x713   : > { %v2743_v18 = vrot.slane %v2698_v13, 5  ;;  %v4497_v50 = vpack.c.bf16 %v3185_v56, %v3184_v62  ;;  %v4500_v9 = vpack.c.bf16 %v3187_v31, %v3186_v37  ;;  %v4503_v8 = vpack.c.bf16 %v3189_v59, %v3188_v4  ;;  %v3192_v26 = vld [vmem:[%s6283_s16 + $0x50] sm:$0xff]  ;;  %v3781_v47 = vld [vmem:[%s6285_s18 + $0x2] sm:$0x1] }
 0x714   : > { %4659 = vrot.lane.b32.xlu0 %v4658_v6, %s6365_s0  ;;  %4654 = vrot.lane.b32.xlu1 %v4653_v32, %s6364_s29  ;;  %v4506_v36 = vpack.c.bf16 %v3191_v61, %v3190_v12  ;;  %v4509_v42 = vpack.c.bf16 %v3193_v52, %v3192_v26 }
 0x715   : > { %v2744_v41 = vsel %vm2632_vm15, %v2742_v16, %v2743_v18 }
 0x716   : > { %v4663_v33 = vpack.i.bf16 %v2720_v45, %v2744_v41  ;;  %v3774_v45 = vld [vmem:[%s6284_s17] ss:$0 sm:$0xff] }
 0x717   : > { %v3274_v41 = vld [vmem:[%s6285_s18] sm:$0x1] }
 0x718   : > { %4664 = vrot.lane.b32.xlu1 %v4663_v33, %s6368_s23  ;;  %v3778_v33 = vld [vmem:[%s6285_s18 + $0x1] sm:$0x1] }
 0x786   : > { %v4660_v22 = vpop.permute.xlu0 %4659  ;;  %v4655_v60 = vpop.permute.xlu1 %4654 }
 0x787   : > { %v4657_v21 = vunpack.i.h.bf16 %v4655_v60  ;;  %v4656_v30 = vunpack.i.l.bf16 %v4655_v60  ;;  %v4662_v57 = vunpack.i.h.bf16 %v4660_v22  ;;  %v4661_v20 = vunpack.i.l.bf16 %v4660_v22  ;;  %v3512_v22 = vld [vmem:[%s6286_s19] sm:$0xff]  ;;  %v3513_v60 = vld [vmem:[%s6286_s19 + $0x8] sm:$0xff] }
 0x789   : > { %v2753_v35 = vsel %vm1522_vm8, %v2641_v63, %v4657_v21  ;;  %v2756_v34 = vsel %vm1522_vm8, %v6068_v46, %v4656_v30  ;;  %v3764_v46 = vld [vmem:[%s6281_s14] ss:$0 sm:$0xff]  ;;  %v3514_v21 = vld [vmem:[%s6286_s19 + $0x10] sm:$0xff]  ;;  %v4512_v30 = vpack.c.bf16 %v3513_v60, %v3512_v22  ;;  %v3515_v63 = vld [vmem:[%s6286_s19 + $0x18] sm:$0xff] }
 0x78a   : > { %v4665_v11 = vpop.permute.xlu1 %4664  ;;  %v2757_v10 = vsel %vm1530_vm9, %v2756_v34, %v4661_v20  ;;  %v2754_v17 = vsel %vm1530_vm9, %v2753_v35, %v4662_v57  ;;  %v4515_v57 = vpack.c.bf16 %v3515_v63, %v3514_v21  ;;  %v3517_v20 = vld [vmem:[%s6286_s19 + $0x28] sm:$0xff]  ;;  %v3518_v34 = vld [vmem:[%s6286_s19 + $0x30] sm:$0xff] }
 0x78b   : > { %v4667_v27 = vunpack.i.h.bf16 %v4665_v11  ;;  %v4666_v15 = vunpack.i.l.bf16 %v4665_v11  ;;  %v3519_v11 = vld [vmem:[%s6286_s19 + $0x38] sm:$0xff] }
 0x78d   : > { %v2758_v40 = vsel %vm1538_vm10, %v2757_v10, %v4666_v15  ;;  %v2755_v24 = vsel %vm1538_vm10, %v2754_v17, %v4667_v27  ;;  %v4521_v27 = vpack.c.bf16 %v3519_v11, %v3518_v34  ;;  %v3520_v15 = vld [vmem:[%s6286_s19 + $0x40] sm:$0xff]  ;;  %v3521_v10 = vld [vmem:[%s6286_s19 + $0x48] sm:$0xff] }
 0x78e   : > { %2868 = vmatprep.mubr.f32.mxu1 %v2758_v40  ;;  %v4524_v17 = vpack.c.bf16 %v3521_v10, %v3520_v15  ;;  %v3522_v40 = vld [vmem:[%s6286_s19 + $0x50] sm:$0xff] }
 0x78f   : > { %2869 = vmatmul.mubr.f32.vlgmr.msra.gmra.mrb[36].mxu1 %v2755_v24  ;;  %v3523_v24 = vld [vmem:[%s6286_s19 + $0x58] sm:$0xff] }
 0x790   : > { %4237 = vmatprep.mubr.msk.f32.mxu1 %vm4683_vm3, %v6341_v39 }
 0x7e4   : > { %v2940_v1 = vpop.f32.mrb[30].mxu0 }
 0x7e5   : > { %v4229_v44 = vpop.f32.mrb[31].mxu0 }
 0x862   : > { %v3969_v28 = vpop.f32.mrb[36].mxu1 }
 0x863   : > { %v3970_v38 = vpop.f32.mrb[37].mxu1 }
 0x864   : > { %v3971_v25 = vadd.f32 %v3970_v38, %v3969_v28 }
 0x866   : > { %v2871_v54 = vadd.f32 %v3971_v25, %v3764_v46 }
 0x868   : > { %v2941_v19 = vadd.f32 %v2940_v1, %v2871_v54  ;;  %v4527_v1 = vpack.c.bf16 %v3523_v24, %v3522_v40 }
 0x86a   : > { %4231 = vmatpush3.msk.msra.mxu0 %vm1135_vm5, %v2941_v19  ;;  %4236 = vmatpush3.msk.msra.mxu1 %vm1135_vm5, %v2941_v19 }
 0x86b   : > { %4233 = vmatmul.mubr.msk.f32.vlgmr.msra.gmra.mrb[32].mxu0 %vm2945_vm0, %v2944_v49  ;;  %4238 = vmatmul.mubr.msk.f32.vlgmr.msra.gmra.mrb[38].mxu1 %vm2945_vm0, %v3768_v43 }
 0x86c   : > { %4240 = vmatprep.subr.mxu0 %v6341_v39  ;;  %4242 = vmatprep.mubr.msk.f32.mxu0 %vm4683_vm3, %v6341_v39 }
 0x86d   : > { %4241 = vmatpush3.msk.msra.mxu0 %vm1135_vm5, %v2941_v19  ;;  %4493 = vmatprep.subr.bf16.mxu1 %v6362_v51 }
 0x86e   : > { %4269 = vmatprep.mubr.msk.f32.mxu1 %vm4683_vm3, %v6341_v39  ;;  %4272 = vmatprep.subr.mxu0 %v6341_v39 }
 0x86f   : > { %4243 = vmatmul.mubr.msk.f32.vlgmr.msra.gmra.mrb[34].mxu0 %vm2945_vm0, %v3771_v55  ;;  %4495 = vmatpush3.bf16.msra.mxu1 %v4494_v5  ;;  %v3524_v55 = vld [vmem:[%s6287_s20] sm:$0x1] }
 0x870   : > { %4274 = vmatprep.mubr.msk.f32.mxu0 %vm4683_vm3, %v6341_v39  ;;  %4496 = vmatprep.subr.bf16.mxu1 %v6362_v51 }
 0x873   : > { %4498 = vmatpush3.bf16.msra.mxu1 %v4497_v50 }
 0x874   : > { %4499 = vmatprep.subr.bf16.mxu1 %v6362_v51 }
 0x877   : > { %4501 = vmatpush3.bf16.msra.mxu1 %v4500_v9 }
 0x878   : > { %4502 = vmatprep.subr.bf16.mxu1 %v6362_v51 }
 0x87b   : > { %4504 = vmatpush3.bf16.msra.mxu1 %v4503_v8 }
 0x87c   : > { %4505 = vmatprep.subr.bf16.mxu1 %v6362_v51 }
 0x87f   : > { %4507 = vmatpush3.bf16.msra.mxu1 %v4506_v36 }
 0x880   : > { %4508 = vmatprep.subr.bf16.mxu1 %v6362_v51 }
 0x883   : > { %4510 = vmatpush3.bf16.msra.mxu1 %v4509_v42 }
 0x93e   : > { %v3093_v14 = vpop.f32.mrb[38].mxu1  ;;  %v3018_v3 = vpop.f32.mrb[32].mxu0 }
 0x93f   : > { %3173 = vrot.lane.b32.xlu0 %v3093_v14, %s6364_s29  ;;  %v4234_v13 = vpop.f32.mrb[33].mxu0  ;;  %v4239_v0 = vpop.f32.mrb[39].mxu1 }
 0x942   : > { %v3168_v7 = vpop.f32.mrb[34].mxu0 }
 0x943   : > { %3177 = vrot.lane.b32.xlu1 %v3168_v7, %s6365_s0  ;;  %v4244_v29 = vpop.f32.mrb[35].mxu0 }
 0x9b1   : > { %v3174_v23 = vpop.permute.xlu0 %3173 }
 0x9b2   : > { %v3180_v2 = vsel %vm1522_vm8, %v3018_v3, %v3174_v23 }
 0x9b5   : > { %v3178_v6 = vpop.permute.xlu1 %3177 }
 0x9b6   : > { %v3181_v32 = vsel %vm1530_vm9, %v3180_v2, %v3178_v6 }
 0x9b7   : > { %4270 = vmatmul.mubr.msk.f32.vlgmr.msra.gmra.mrb[40].mxu1 %vm1538_vm10, %v3181_v32 }
 0xa8a   : > { %v3270_v16 = vpop.f32.mrb[40].mxu1 }
 0xa8b   : > { %v3271_v18 = vadd.f32 %v3774_v45, %v3270_v16  ;;  %v4271_v48 = vpop.f32.mrb[41].mxu1 }
 0xa8d   : > { %4273 = vmatpush3.msk.msra.mxu0 %vm2632_vm15, %v3271_v18 }
 0xa8e   : > { %4275 = vmatmul.mubr.msk.f32.vlgmr.msra.gmra.mrb[36].mxu0 %vm3275_vm1, %v3274_v41  ;;  %4277 = vmatprep.subr.mxu0 %v6341_v39 }
 0xa8f   : > { %4278 = vmatpush3.msk.msra.mxu0 %vm2632_vm15, %v3271_v18  ;;  %4279 = vmatprep.mubr.msk.f32.mxu0 %vm4683_vm3, %v6341_v39 }
 0xa90   : > { %4282 = vmatprep.subr.mxu0 %v6341_v39 }
 0xa92   : > { %4280 = vmatmul.mubr.msk.f32.vlgmr.msra.gmra.mrb[38].mxu0 %vm3275_vm1, %v3778_v33 }
 0xa93   : > { %4283 = vmatpush3.msk.msra.mxu0 %vm2632_vm15, %v3271_v18  ;;  %4284 = vmatprep.mubr.msk.f32.mxu0 %vm4683_vm3, %v6341_v39 }
 0xa94   : > { %4511 = vmatprep.subr.bf16.mxu0 %v6362_v51 }
 0xa96   : > { %4285 = vmatmul.mubr.msk.f32.vlgmr.msra.gmra.mrb[40].mxu0 %vm3275_vm1, %v3781_v47 }
 0xa97   : > { %4311 = vmatprep.mubr.msk.f32.mxu0 %vm4683_vm3, %v6341_v39  ;;  %4513 = vmatpush3.bf16.msra.mxu0 %v4512_v30  ;;  %v3516_v39 = vld [vmem:[%s6286_s19 + $0x20] sm:$0xff] }
 0xa98   : > { %4514 = vmatprep.subr.bf16.mxu0 %v6362_v51  ;;  %v4518_v35 = vpack.c.bf16 %v3517_v20, %v3516_v39 }
 0xa9b   : > { %4516 = vmatpush3.bf16.msra.mxu0 %v4515_v57 }
 0xa9c   : > { %4517 = vmatprep.subr.bf16.mxu0 %v6362_v51 }
 0xa9f   : > { %4519 = vmatpush3.bf16.msra.mxu0 %v4518_v35 }
 0xaa0   : > { %4520 = vmatprep.subr.bf16.mxu0 %v6362_v51 }
 0xaa3   : > { %4522 = vmatpush3.bf16.msra.mxu0 %v4521_v27 }
 0xaa4   : > { %4523 = vmatprep.subr.bf16.mxu0 %v6362_v51 }
 0xaa7   : > { %4525 = vmatpush3.bf16.msra.mxu0 %v4524_v17 }
 0xaa8   : > { %4526 = vmatprep.subr.bf16.mxu0 %v6362_v51 }
 0xaab   : > { %4528 = vmatpush3.bf16.msra.mxu0 %v4527_v1 }
 0xb61   : > { %v3348_v44 = vpop.f32.mrb[36].mxu0 }
 0xb62   : > { %v4276_v28 = vpop.f32.mrb[37].mxu0 }
 0xb65   : > { %v3423_v46 = vpop.f32.mrb[38].mxu0 }
 0xb66   : > { %3503 = vrot.lane.b32.xlu0 %v3423_v46, %s6364_s29  ;;  %v4281_v38 = vpop.f32.mrb[39].mxu0  ;;  %s652_s29 = scalar_lea.vmem %s6288_s21, %s6370_s25 }
 0xb69   : > { %v3498_v25 = vpop.f32.mrb[40].mxu0 }
 0xb6a   : > { %3507 = vrot.lane.b32.xlu1 %v3498_v25, %s6365_s0  ;;  %v4286_v51 = vpop.f32.mrb[41].mxu0 }
 0xbd8   : > { %v3504_v54 = vpop.permute.xlu0 %3503 }
 0xbd9   : > { %v3510_v19 = vsel %vm1522_vm8, %v3348_v44, %v3504_v54 }
 0xbdc   : > { %v3508_v49 = vpop.permute.xlu1 %3507 }
 0xbdd   : > { %v3511_v43 = vsel %vm1530_vm9, %v3510_v19, %v3508_v49 }
 0xbde   : > { %4312 = vmatmul.mubr.msk.f32.vlgmr.msra.gmra.mrb[42].mxu0 %vm1538_vm10, %v3511_v43 }
 0xcb1   : > { %v3594_v58 = vpop.f32.mrb[42].mxu0 }
 0xcb2   : > { %v3595_v53 = vadd.f32 %v3594_v58, %v3524_v55  ;;  %v4313_v62 = vpop.f32.mrb[43].mxu0 }
 0xcb4   : > { %3599 = vst.msk [vmem:[%s652_s29] sm:$0x1] %vm3598_vm2, %v3595_v53 }
 0xcb5 PF: > { %s31_s2 = sadd.s32 1, %s4678_s2  }
 0xcb6   : > { %p28_p4 = scmp.ge.s32.totalorder %s31_s2, 4  }
 0xcb8   :  { %30 = sbr.rel (!%p28_p4) target bundleno = 9 (0x9), region = 156 }

</bundles_post_ra>
